<compile_context>
chip_gen: v6e
topology: v6e:2x2x1
jax: 0.10.0
libtpu: 0.0.40
codegen_flags: <defaults>
</compile_context>

<pallas_src>
import functools
import math

import jax
import jax.numpy as jnp
from jax.experimental import pallas as pl
from jax.experimental.pallas import tpu as pltpu


# ---------------------------------------------------------------------------
# Kernel: one layer / one direction, one time-chunk per grid step.
# ---------------------------------------------------------------------------
def _rnn_chunk_kernel(x_ref, wih_ref, whh_ref, b_ref, h0_ref, y_ref,
                      h_scratch, xw_scratch, *, tc, t_real, reverse):
    """Refs (VMEM blocks):
      x_ref   : (Tc, Bp, Fp)  input chunk (time-major, padded, compute dtype)
      wih_ref : (Fp, Hp)      W_ih^T (pre-transposed, padded, compute dtype)
      whh_ref : (Hp, Hp)      W_hh^T (pre-transposed, padded, compute dtype)
      b_ref   : (1, Hp)       b_ih + b_hh (pre-summed, padded, f32)
      h0_ref  : (Bp, Hp)      initial hidden state (f32)
      y_ref   : (Tc, Bp, Hp)  output chunk (compute dtype)
      h_scratch  : (Bp, Hp)     f32 running hidden state (persists across chunks)
      xw_scratch : (Tc, Bp, Hp) per-chunk input projection (compute dtype)
    """
    c = pl.program_id(0)

    @pl.when(c == 0)
    def _():
        h_scratch[...] = h0_ref[...].astype(jnp.float32)

    bsz, hid = h_scratch.shape
    feat = x_ref.shape[-1]

    # Whole-chunk input projection + bias as ONE MXU GEMM (f32 accumulation),
    # off the serial critical path.  The reshape merges (Tc, Bp) -> Tc*Bp and is
    # layout-free because Bp is a multiple of the sublane packing for the
    # compute dtype (last dim unchanged).
    x_all = x_ref[...].reshape(tc * bsz, feat)
    xw = jnp.dot(x_all, wih_ref[...], preferred_element_type=jnp.float32)
    xw = xw + b_ref[...].astype(jnp.float32)            # (Tc*Bp, Hp) + (1, Hp)
    xw_scratch[...] = xw.reshape(tc, bsz, hid).astype(xw_scratch.dtype)

    whh = whh_ref[...]                                   # read once per chunk

    # The time axis may have been zero-padded up to a multiple of Tc.  Padded
    # steps only hurt the *reverse* direction (they are processed before the
    # real ones there), so only then freeze the carry on padded steps.
    if reverse and (t_real % tc != 0):
        chunk_start = (pl.num_programs(0) - 1 - c) * tc
    else:
        chunk_start = None

    def step(s, h):
        t = (tc - 1 - s) if reverse else s
        pre = xw_scratch[t].astype(jnp.float32) + jnp.dot(
            h.astype(whh.dtype), whh, preferred_element_type=jnp.float32)
        h_new = jnp.tanh(pre)                            # f32 carry
        y_ref[t] = h_new.astype(y_ref.dtype)
        if chunk_start is not None:
            h_new = jnp.where(chunk_start + t < t_real, h_new, h)
        return h_new

    unroll = tc if tc < 8 else 8                         # fixed partial unroll
    h_scratch[...] = jax.lax.fori_loop(0, tc, step, h_scratch[...],
                                       unroll=unroll)


def _rnn_layer(x_tm, wih_t, whh_t, b, h0, *, reverse, tc, t_real, vmem_limit):
    """x_tm: (Tp, Bp, Fp) time-major padded (Tp % tc == 0), compute dtype.
    Returns y: (Tp, Bp, Hp) in the compute dtype."""
    Tp, Bp, Fp = x_tm.shape
    Hp = whh_t.shape[0]
    nc = Tp // tc
    assert nc * tc == Tp

    tmap = (lambda c: (nc - 1 - c, 0, 0)) if reverse else (lambda c: (c, 0, 0))
    kernel = functools.partial(_rnn_chunk_kernel, tc=tc, t_real=t_real,
                               reverse=reverse)

    grid_spec = pltpu.PrefetchScalarGridSpec(
        num_scalar_prefetch=0,
        grid=(nc,),
        in_specs=[
            pl.BlockSpec((tc, Bp, Fp), tmap),            # x chunk (pipelined)
            pl.BlockSpec((Fp, Hp), lambda c: (0, 0)),    # W_ih^T (resident)
            pl.BlockSpec((Hp, Hp), lambda c: (0, 0)),    # W_hh^T (resident)
            pl.BlockSpec((1, Hp), lambda c: (0, 0)),     # b_ih + b_hh (f32)
            pl.BlockSpec((Bp, Hp), lambda c: (0, 0)),    # h0 (f32)
        ],
        out_specs=pl.BlockSpec((tc, Bp, Hp), tmap),      # y chunk (pipelined)
        scratch_shapes=[
            pltpu.VMEM((Bp, Hp), jnp.float32),           # running hidden state
            pltpu.VMEM((tc, Bp, Hp), x_tm.dtype),        # chunk input projection
        ],
    )

    return pl.pallas_call(
        kernel,
        grid_spec=grid_spec,
        out_shape=jax.ShapeDtypeStruct((Tp, Bp, Hp), x_tm.dtype),
        compiler_params=pltpu.CompilerParams(
            dimension_semantics=("arbitrary",),          # sequential recurrence
            vmem_limit_bytes=vmem_limit),
    )(x_tm, wih_t, whh_t, b, h0)


# ---------------------------------------------------------------------------
# Wrapper utilities
# ---------------------------------------------------------------------------
def _round_up(n, m):
    return ((n + m - 1) // m) * m


def _pad2(a, shape):
    return jnp.pad(a, [(0, s - d) for s, d in zip(shape, a.shape)])


def _sublane_multiple(dtype):
    # Sub-32-bit dtypes pack along sublanes: 8 rows f32, 16 bf16, 32 int8/fp8.
    return {4: 8, 2: 16, 1: 32}.get(jnp.dtype(dtype).itemsize, 8)


def _vmem_capacity_bytes():
    try:
        return int(pltpu.get_tpu_info().vmem_capacity_bytes)
    except Exception:                       # CPU / interpret / older API
        return 64 * 1024 * 1024             # v7x-safe fallback


def _plan_layer(T, Bp, Fp_max, Hp, comp_isz):
    """Pick the time-chunk size Tc and an explicit scoped-VMEM limit from an
    honest footprint: double-buffered x/y chunks, xw scratch, GEMM temporaries,
    double-buffered resident weights/bias/h0 and the f32 hidden-state scratch."""
    cap = _vmem_capacity_bytes()
    budget = int(0.60 * cap)                # ~76 MiB on 128-MiB chips, ~38 MiB v7x
    per_tc = Bp * (3 * Fp_max * comp_isz    # x: 2 pipeline buffers + value temp
                   + 2 * Hp * comp_isz      # y: 2 pipeline buffers
                   + Hp * comp_isz          # xw scratch row
                   + Hp * 4)                # f32 projection-GEMM result temp
    fixed = (2 * (Fp_max + Hp) * Hp * comp_isz   # W_ih^T + W_hh^T (double-buffered)
             + 2 * Hp * 4                        # bias (f32)
             + 2 * Bp * Hp * 4                   # h0 (f32)
             + Bp * Hp * 4)                      # running h scratch (f32)
    tc = max(1, (budget - fixed) // per_tc)
    tc = int(min(tc, T, 256))
    if tc >= 8:
        tc = (tc // 8) * 8                  # keeps the 8-way partial unroll exact
    footprint = fixed + tc * per_tc
    vmem_limit = int(max(32 << 20, min(int(0.85 * cap), footprint + (16 << 20))))
    return tc, vmem_limit


def init_rnn_params(key, input_size, hidden_size, num_layers, bidirectional,
                    dtype=jnp.float32):
    """Mirrors RNNCell.reset_parameters(): uniform(-1/sqrt(H), 1/sqrt(H))."""
    num_dir = 2 if bidirectional else 1
    stdv = 1.0 / math.sqrt(hidden_size)
    params = []
    for layer in range(num_layers):
        layer_in = input_size if layer == 0 else hidden_size * num_dir
        dirs = []
        for _ in range(num_dir):
            key, k1, k2, k3, k4 = jax.random.split(key, 5)
            dirs.append({
                "w_ih": jax.random.uniform(k1, (hidden_size, layer_in), dtype,
                                           minval=-stdv, maxval=stdv),
                "w_hh": jax.random.uniform(k2, (hidden_size, hidden_size), dtype,
                                           minval=-stdv, maxval=stdv),
                "b_ih": jax.random.uniform(k3, (1, hidden_size), dtype,
                                           minval=-stdv, maxval=stdv),
                "b_hh": jax.random.uniform(k4, (1, hidden_size), dtype,
                                           minval=-stdv, maxval=stdv),
            })
        params.append(dirs)
    return params


def _rnn_forward_impl(x, params, hx=None, *, compute_dtype=jnp.bfloat16):
    """Elman RNN forward (batch_first=True, tanh, eval / dropout=0.0).

    x: (B, T, input_size)
    returns: output (B, T, H * num_directions),
             hidden (num_layers * num_directions, B, H)
    """
    B, T, I = x.shape
    num_layers = len(params)
    num_dir = len(params[0])
    H = params[0][0]["w_hh"].shape[0]
    in_dtype = x.dtype
    cdt = jnp.dtype(compute_dtype)

    Bp = _round_up(B, _sublane_multiple(cdt))
    Hp = _round_up(H, 128)
    Ip = _round_up(I, 128)
    Fp_max = max(Ip, num_dir * Hp)

    tc, vmem_limit = _plan_layer(T, Bp, Fp_max, Hp, cdt.itemsize)
    Tp = _round_up(T, tc)                              # zero-pad time at the END

    if hx is None:
        hx = jnp.zeros((num_layers * num_dir, B, H), dtype=jnp.float32)

    # batch-major -> time-major ONCE; pad time/batch/feature ONCE.
    x_tm = jnp.transpose(x, (1, 0, 2)).astype(cdt)     # (T, B, I)
    layer_in = jnp.pad(x_tm, ((0, Tp - T), (0, Bp - B), (0, Ip - I)))

    finals = []
    for layer, layer_params in enumerate(params):
        dir_outs = []
        for d, p in enumerate(layer_params):
            wih_t = p["w_ih"].T.astype(cdt)            # (Fin, H) pre-transposed
            if layer == 0:
                wih_tp = _pad2(wih_t, (Ip, Hp))
            else:
                # Block-pad rows so they line up with the padded (Hp-strided)
                # concatenated activations of the previous layer.
                blocks = [_pad2(wih_t[dd * H:(dd + 1) * H], (Hp, Hp))
                          for dd in range(num_dir)]
                wih_tp = (jnp.concatenate(blocks, axis=0)
                          if num_dir > 1 else blocks[0])
            whh_tp = _pad2(p["w_hh"].T.astype(cdt), (Hp, Hp))
            b = _pad2((p["b_ih"] + p["b_hh"]).reshape(1, H).astype(jnp.float32),
                      (1, Hp))
            h0 = _pad2(hx[layer * num_dir + d].astype(jnp.float32), (Bp, Hp))

            y = _rnn_layer(layer_in, wih_tp, whh_tp, b, h0,
                           reverse=(d == 1), tc=tc, t_real=T,
                           vmem_limit=vmem_limit)
            dir_outs.append(y)                         # (Tp, Bp, Hp)
            # Final hidden == output at the boundary timestep (exactly, as in
            # the PyTorch loops): t = T-1 forward, t = 0 reverse.
            finals.append(y[T - 1 if d == 0 else 0, :B, :H].astype(in_dtype)[None])
        layer_in = (jnp.concatenate(dir_outs, axis=-1)
                    if num_dir > 1 else dir_outs[0])   # (Tp, Bp, num_dir*Hp)
        # NOTE: padded batch rows / padded time rows hold finite garbage (tanh
        # outputs driven by the broadcast bias); they never mix into real rows
        # and are sliced off below — never read layer_in beyond [:T, :B].

    # Un-pad and go back to batch-major ONCE.
    parts = [layer_in[:T, :B, dd * Hp: dd * Hp + H] for dd in range(num_dir)]
    out_tm = jnp.concatenate(parts, axis=-1) if num_dir > 1 else parts[0]
    output = jnp.transpose(out_tm, (1, 0, 2)).astype(in_dtype)   # (B, T, H*dir)
    hidden = jnp.concatenate(finals, axis=0)                     # (L*dir, B, H)
    return output, hidden


rnn_forward = jax.jit(_rnn_forward_impl, static_argnames=("compute_dtype",))


# ---------------------------------------------------------------------------
# Pure-JAX reference (mirrors the PyTorch loops) for sanity checking.
# ---------------------------------------------------------------------------
def _rnn_forward_ref(x, params, hx=None):
    B, T, _ = x.shape
    num_dir = len(params[0])
    H = params[0][0]["w_hh"].shape[0]
    num_layers = len(params)
    if hx is None:
        hx = jnp.zeros((num_layers * num_dir, B, H), dtype=x.dtype)
    layer_input = x
    finals = []
    for layer, layer_params in enumerate(params):
        dir_outputs = []
        for d, p in enumerate(layer_params):
            h = hx[layer * num_dir + d]
            outs = []
            steps = range(T - 1, -1, -1) if d == 1 else range(T)
            for t in steps:
                xt = layer_input[:, t, :]
                h = jnp.tanh(xt @ p["w_ih"].T + h @ p["w_hh"].T
                             + p["b_ih"][0] + p["b_hh"][0])
                outs.append(h[:, None, :])
            if d == 1:
                outs = outs[::-1]
            dir_outputs.append(jnp.concatenate(outs, axis=1))
            finals.append(h[None])
        layer_input = jnp.concatenate(dir_outputs, axis=-1)
    return layer_input, jnp.concatenate(finals, axis=0)


if __name__ == "__main__":
    B, T, I, H = 2, 8, 16, 32
    num_layers, bidirectional = 2, True
    num_dir = 2 if bidirectional else 1

    key = jax.random.PRNGKey(0)
    kx, kp = jax.random.split(key)
    x = jax.random.normal(kx, (B, T, I), dtype=jnp.float32)
    params = init_rnn_params(kp, I, H, num_layers, bidirectional)
    out_ref, hid_ref = _rnn_forward_ref(x, params)

    # 1) f32 compute path: tight check of the kernel structure.
    out32, hid32 = rnn_forward(x, params, compute_dtype=jnp.float32)
    out32, hid32 = jax.block_until_ready((out32, hid32))
    assert out32.shape == (B, T, H * num_dir), out32.shape
    assert hid32.shape == (num_layers * num_dir, B, H), hid32.shape
    assert jnp.allclose(out32, out_ref, atol=1e-4, rtol=1e-3), \
        float(jnp.max(jnp.abs(out32 - out_ref)))
    assert jnp.allclose(hid32, hid_ref, atol=1e-4, rtol=1e-3), \
        float(jnp.max(jnp.abs(hid32 - hid_ref)))

    # 2) default bf16 compute path (MXU-native weights, f32 accum / f32 carry).
    out, hid = rnn_forward(x, params)
    out, hid = jax.block_until_ready((out, hid))
    assert jnp.allclose(out, out_ref, atol=5e-2, rtol=5e-2), \
        float(jnp.max(jnp.abs(out.astype(jnp.float32) - out_ref)))
    assert jnp.allclose(hid, hid_ref, atol=5e-2, rtol=5e-2), \
        float(jnp.max(jnp.abs(hid.astype(jnp.float32) - hid_ref)))

    # 3) ragged T (not a multiple of the chosen chunk): exercises the padded
    #    time axis + masked reverse carry; f32 for a tight comparison.
    T2 = 11
    x2 = jax.random.normal(jax.random.PRNGKey(1), (B, T2, I), dtype=jnp.float32)
    out2, hid2 = rnn_forward(x2, params, compute_dtype=jnp.float32)
    out2, hid2 = jax.block_until_ready((out2, hid2))
    out2_ref, hid2_ref = _rnn_forward_ref(x2, params)
    assert jnp.allclose(out2, out2_ref, atol=1e-4, rtol=1e-3), \
        float(jnp.max(jnp.abs(out2 - out2_ref)))
    assert jnp.allclose(hid2, hid2_ref, atol=1e-4, rtol=1e-3), \
        float(jnp.max(jnp.abs(hid2 - hid2_ref)))

    print("KERNEL_OK")
</pallas_src>

<mosaic_0001>
module attributes {stable_mosaic.version = 11 : i64} {
  func.func @_rnn_chunk_kernel(%arg0: i32, %arg1: memref<8x8x128xf32, #tpu.memory_space<vmem>>, %arg2: memref<128x128xf32, #tpu.memory_space<vmem>>, %arg3: memref<128x128xf32, #tpu.memory_space<vmem>>, %arg4: memref<1x128xf32, #tpu.memory_space<vmem>>, %arg5: memref<8x128xf32, #tpu.memory_space<vmem>>, %arg6: memref<8x8x128xf32, #tpu.memory_space<vmem>>, %arg7: memref<8x128xf32, #tpu.memory_space<vmem>>, %arg8: memref<8x8x128xf32, #tpu.memory_space<vmem>>) attributes {dimension_semantics = [#tpu.dimension_semantics<arbitrary>], iteration_bounds = array<i64: 1>, scalar_prefetch = 0 : i64, scratch_operands = 2 : i64, tpu.core_type = #tpu.core_type<tc>, window_params = [{transform_indices = @transform_0, window_bounds = array<i64: 8, 8, 128>}, {pipeline_mode = #tpu.pipeline_mode<synchronous>, transform_indices = @transform_1, window_bounds = array<i64: 128, 128>}, {pipeline_mode = #tpu.pipeline_mode<synchronous>, transform_indices = @transform_2, window_bounds = array<i64: 128, 128>}, {pipeline_mode = #tpu.pipeline_mode<synchronous>, transform_indices = @transform_3, window_bounds = array<i64: 1, 128>}, {pipeline_mode = #tpu.pipeline_mode<synchronous>, transform_indices = @transform_4, window_bounds = array<i64: 8, 128>}, {transform_indices = @transform_5, window_bounds = array<i64: 8, 8, 128>}]} {
    %c0_i32 = arith.constant 0 : i32
    %0 = arith.cmpi eq, %arg0, %c0_i32 : i32
    %1 = arith.extui %0 : i1 to i32
    %c0_i32_0 = arith.constant 0 : i32
    %2 = arith.cmpi ne, %1, %c0_i32_0 : i32
    scf.if %2 {
      %c0_57 = arith.constant 0 : index
      %c0_58 = arith.constant 0 : index
      %95 = vector.load %arg5[%c0_57, %c0_58] : memref<8x128xf32, #tpu.memory_space<vmem>>, vector<8x128xf32>
      %c0_59 = arith.constant 0 : index
      %c0_60 = arith.constant 0 : index
      %96 = vector.load %arg7[%c0_59, %c0_60] : memref<8x128xf32, #tpu.memory_space<vmem>>, vector<8x128xf32>
      tpu.vector_store %arg7[%c0_59, %c0_60], %95 {strides = array<i32>} : memref<8x128xf32, #tpu.memory_space<vmem>>, vector<8x128xf32>,
    } else {
    }
    %c0 = arith.constant 0 : index
    %c0_1 = arith.constant 0 : index
    %c0_2 = arith.constant 0 : index
    %3 = vector.load %arg1[%c0, %c0_1, %c0_2] : memref<8x8x128xf32, #tpu.memory_space<vmem>>, vector<8x8x128xf32>
    %4 = vector.shape_cast %3 : vector<8x8x128xf32> to vector<64x128xf32>
    %c0_3 = arith.constant 0 : index
    %c0_4 = arith.constant 0 : index
    %5 = vector.load %arg2[%c0_3, %c0_4] : memref<128x128xf32, #tpu.memory_space<vmem>>, vector<128x128xf32>
    %cst = arith.constant dense<0.000000e+00> : vector<64x128xf32>
    %6 = tpu.matmul %4, %5, %cst {dimension_numbers = #tpu.dot_dimension_numbers<[1], [0], [0], [1], [0, 0, 1, 1], [], []>} : vector<64x128xf32>, vector<128x128xf32>, vector<64x128xf32> -> vector<64x128xf32>
    %c0_5 = arith.constant 0 : index
    %c0_6 = arith.constant 0 : index
    %7 = vector.load %arg4[%c0_5, %c0_6] : memref<1x128xf32, #tpu.memory_space<vmem>>, vector<1x128xf32>
    %8 = vector.broadcast %7 : vector<1x128xf32> to vector<64x128xf32>
    %9 = arith.addf %6, %8 : vector<64x128xf32>
    %10 = vector.shape_cast %9 : vector<64x128xf32> to vector<8x8x128xf32>
    %c0_7 = arith.constant 0 : index
    %c0_8 = arith.constant 0 : index
    %c0_9 = arith.constant 0 : index
    %11 = vector.load %arg8[%c0_7, %c0_8, %c0_9] : memref<8x8x128xf32, #tpu.memory_space<vmem>>, vector<8x8x128xf32>
    tpu.vector_store %arg8[%c0_7, %c0_8, %c0_9], %10 {strides = array<i32>} : memref<8x8x128xf32, #tpu.memory_space<vmem>>, vector<8x8x128xf32>,
    %c0_10 = arith.constant 0 : index
    %c0_11 = arith.constant 0 : index
    %12 = vector.load %arg3[%c0_10, %c0_11] : memref<128x128xf32, #tpu.memory_space<vmem>>, vector<128x128xf32>
    %c0_12 = arith.constant 0 : index
    %c0_13 = arith.constant 0 : index
    %13 = vector.load %arg7[%c0_12, %c0_13] : memref<8x128xf32, #tpu.memory_space<vmem>>, vector<8x128xf32>
    %c0_i32_14 = arith.constant 0 : i32
    %14 = arith.index_cast %c0_i32_14 : i32 to index
    %c0_15 = arith.constant 0 : index
    %c0_16 = arith.constant 0 : index
    %15 = vector.load %arg8[%14, %c0_15, %c0_16] : memref<8x8x128xf32, #tpu.memory_space<vmem>>, vector<1x8x128xf32>
    %16 = vector.shape_cast %15 : vector<1x8x128xf32> to vector<8x128xf32>
    %cst_17 = arith.constant dense<0.000000e+00> : vector<8x128xf32>
    %17 = tpu.matmul %13, %12, %cst_17 {dimension_numbers = #tpu.dot_dimension_numbers<[1], [0], [0], [1], [0, 0, 1, 1], [], []>} : vector<8x128xf32>, vector<128x128xf32>, vector<8x128xf32> -> vector<8x128xf32>
    %18 = arith.addf %16, %17 : vector<8x128xf32>
    %19 = math.tanh %18 : vector<8x128xf32>
    %20 = arith.index_cast %c0_i32_14 : i32 to index
    %c0_18 = arith.constant 0 : index
    %c0_19 = arith.constant 0 : index
    %21 = vector.load %arg6[%20, %c0_18, %c0_19] : memref<8x8x128xf32, #tpu.memory_space<vmem>>, vector<1x8x128xf32>
    %22 = vector.shape_cast %21 : vector<1x8x128xf32> to vector<8x128xf32>
    %23 = vector.shape_cast %19 : vector<8x128xf32> to vector<1x8x128xf32>
    tpu.vector_store %arg6[%20, %c0_18, %c0_19], %23 {strides = array<i32>} : memref<8x8x128xf32, #tpu.memory_space<vmem>>, vector<1x8x128xf32>,
    %c1_i32 = arith.constant 1 : i32
    %24 = arith.index_cast %c1_i32 : i32 to index
    %c0_20 = arith.constant 0 : index
    %c0_21 = arith.constant 0 : index
    %25 = vector.load %arg8[%24, %c0_20, %c0_21] : memref<8x8x128xf32, #tpu.memory_space<vmem>>, vector<1x8x128xf32>
    %26 = vector.shape_cast %25 : vector<1x8x128xf32> to vector<8x128xf32>
    %cst_22 = arith.constant dense<0.000000e+00> : vector<8x128xf32>
    %27 = tpu.matmul %19, %12, %cst_22 {dimension_numbers = #tpu.dot_dimension_numbers<[1], [0], [0], [1], [0, 0, 1, 1], [], []>} : vector<8x128xf32>, vector<128x128xf32>, vector<8x128xf32> -> vector<8x128xf32>
    %28 = arith.addf %26, %27 : vector<8x128xf32>
    %29 = math.tanh %28 : vector<8x128xf32>
    %30 = arith.index_cast %c1_i32 : i32 to index
    %c0_23 = arith.constant 0 : index
    %c0_24 = arith.constant 0 : index
    %31 = vector.load %arg6[%30, %c0_23, %c0_24] : memref<8x8x128xf32, #tpu.memory_space<vmem>>, vector<1x8x128xf32>
    %32 = vector.shape_cast %31 : vector<1x8x128xf32> to vector<8x128xf32>
    %33 = vector.shape_cast %29 : vector<8x128xf32> to vector<1x8x128xf32>
    tpu.vector_store %arg6[%30, %c0_23, %c0_24], %33 {strides = array<i32>} : memref<8x8x128xf32, #tpu.memory_space<vmem>>, vector<1x8x128xf32>,
    %c2_i32 = arith.constant 2 : i32
    %34 = arith.index_cast %c2_i32 : i32 to index
    %c0_25 = arith.constant 0 : index
    %c0_26 = arith.constant 0 : index
    %35 = vector.load %arg8[%34, %c0_25, %c0_26] : memref<8x8x128xf32, #tpu.memory_space<vmem>>, vector<1x8x128xf32>
    %36 = vector.shape_cast %35 : vector<1x8x128xf32> to vector<8x128xf32>
    %cst_27 = arith.constant dense<0.000000e+00> : vector<8x128xf32>
    %37 = tpu.matmul %29, %12, %cst_27 {dimension_numbers = #tpu.dot_dimension_numbers<[1], [0], [0], [1], [0, 0, 1, 1], [], []>} : vector<8x128xf32>, vector<128x128xf32>, vector<8x128xf32> -> vector<8x128xf32>
    %38 = arith.addf %36, %37 : vector<8x128xf32>
    %39 = math.tanh %38 : vector<8x128xf32>
    %40 = arith.index_cast %c2_i32 : i32 to index
    %c0_28 = arith.constant 0 : index
    %c0_29 = arith.constant 0 : index
    %41 = vector.load %arg6[%40, %c0_28, %c0_29] : memref<8x8x128xf32, #tpu.memory_space<vmem>>, vector<1x8x128xf32>
    %42 = vector.shape_cast %41 : vector<1x8x128xf32> to vector<8x128xf32>
    %43 = vector.shape_cast %39 : vector<8x128xf32> to vector<1x8x128xf32>
    tpu.vector_store %arg6[%40, %c0_28, %c0_29], %43 {strides = array<i32>} : memref<8x8x128xf32, #tpu.memory_space<vmem>>, vector<1x8x128xf32>,
    %c3_i32 = arith.constant 3 : i32
    %44 = arith.index_cast %c3_i32 : i32 to index
    %c0_30 = arith.constant 0 : index
    %c0_31 = arith.constant 0 : index
    %45 = vector.load %arg8[%44, %c0_30, %c0_31] : memref<8x8x128xf32, #tpu.memory_space<vmem>>, vector<1x8x128xf32>
    %46 = vector.shape_cast %45 : vector<1x8x128xf32> to vector<8x128xf32>
    %cst_32 = arith.constant dense<0.000000e+00> : vector<8x128xf32>
    %47 = tpu.matmul %39, %12, %cst_32 {dimension_numbers = #tpu.dot_dimension_numbers<[1], [0], [0], [1], [0, 0, 1, 1], [], []>} : vector<8x128xf32>, vector<128x128xf32>, vector<8x128xf32> -> vector<8x128xf32>
    %48 = arith.addf %46, %47 : vector<8x128xf32>
    %49 = math.tanh %48 : vector<8x128xf32>
    %50 = arith.index_cast %c3_i32 : i32 to index
    %c0_33 = arith.constant 0 : index
    %c0_34 = arith.constant 0 : index
    %51 = vector.load %arg6[%50, %c0_33, %c0_34] : memref<8x8x128xf32, #tpu.memory_space<vmem>>, vector<1x8x128xf32>
    %52 = vector.shape_cast %51 : vector<1x8x128xf32> to vector<8x128xf32>
    %53 = vector.shape_cast %49 : vector<8x128xf32> to vector<1x8x128xf32>
    tpu.vector_store %arg6[%50, %c0_33, %c0_34], %53 {strides = array<i32>} : memref<8x8x128xf32, #tpu.memory_space<vmem>>, vector<1x8x128xf32>,
    %c4_i32 = arith.constant 4 : i32
    %54 = arith.index_cast %c4_i32 : i32 to index
    %c0_35 = arith.constant 0 : index
    %c0_36 = arith.constant 0 : index
    %55 = vector.load %arg8[%54, %c0_35, %c0_36] : memref<8x8x128xf32, #tpu.memory_space<vmem>>, vector<1x8x128xf32>
    %56 = vector.shape_cast %55 : vector<1x8x128xf32> to vector<8x128xf32>
    %cst_37 = arith.constant dense<0.000000e+00> : vector<8x128xf32>
    %57 = tpu.matmul %49, %12, %cst_37 {dimension_numbers = #tpu.dot_dimension_numbers<[1], [0], [0], [1], [0, 0, 1, 1], [], []>} : vector<8x128xf32>, vector<128x128xf32>, vector<8x128xf32> -> vector<8x128xf32>
    %58 = arith.addf %56, %57 : vector<8x128xf32>
    %59 = math.tanh %58 : vector<8x128xf32>
    %60 = arith.index_cast %c4_i32 : i32 to index
    %c0_38 = arith.constant 0 : index
    %c0_39 = arith.constant 0 : index
    %61 = vector.load %arg6[%60, %c0_38, %c0_39] : memref<8x8x128xf32, #tpu.memory_space<vmem>>, vector<1x8x128xf32>
    %62 = vector.shape_cast %61 : vector<1x8x128xf32> to vector<8x128xf32>
    %63 = vector.shape_cast %59 : vector<8x128xf32> to vector<1x8x128xf32>
    tpu.vector_store %arg6[%60, %c0_38, %c0_39], %63 {strides = array<i32>} : memref<8x8x128xf32, #tpu.memory_space<vmem>>, vector<1x8x128xf32>,
    %c5_i32 = arith.constant 5 : i32
    %64 = arith.index_cast %c5_i32 : i32 to index
    %c0_40 = arith.constant 0 : index
    %c0_41 = arith.constant 0 : index
    %65 = vector.load %arg8[%64, %c0_40, %c0_41] : memref<8x8x128xf32, #tpu.memory_space<vmem>>, vector<1x8x128xf32>
    %66 = vector.shape_cast %65 : vector<1x8x128xf32> to vector<8x128xf32>
    %cst_42 = arith.constant dense<0.000000e+00> : vector<8x128xf32>
    %67 = tpu.matmul %59, %12, %cst_42 {dimension_numbers = #tpu.dot_dimension_numbers<[1], [0], [0], [1], [0, 0, 1, 1], [], []>} : vector<8x128xf32>, vector<128x128xf32>, vector<8x128xf32> -> vector<8x128xf32>
    %68 = arith.addf %66, %67 : vector<8x128xf32>
    %69 = math.tanh %68 : vector<8x128xf32>
    %70 = arith.index_cast %c5_i32 : i32 to index
    %c0_43 = arith.constant 0 : index
    %c0_44 = arith.constant 0 : index
    %71 = vector.load %arg6[%70, %c0_43, %c0_44] : memref<8x8x128xf32, #tpu.memory_space<vmem>>, vector<1x8x128xf32>
    %72 = vector.shape_cast %71 : vector<1x8x128xf32> to vector<8x128xf32>
    %73 = vector.shape_cast %69 : vector<8x128xf32> to vector<1x8x128xf32>
    tpu.vector_store %arg6[%70, %c0_43, %c0_44], %73 {strides = array<i32>} : memref<8x8x128xf32, #tpu.memory_space<vmem>>, vector<1x8x128xf32>,
    %c6_i32 = arith.constant 6 : i32
    %74 = arith.index_cast %c6_i32 : i32 to index
    %c0_45 = arith.constant 0 : index
    %c0_46 = arith.constant 0 : index
    %75 = vector.load %arg8[%74, %c0_45, %c0_46] : memref<8x8x128xf32, #tpu.memory_space<vmem>>, vector<1x8x128xf32>
    %76 = vector.shape_cast %75 : vector<1x8x128xf32> to vector<8x128xf32>
    %cst_47 = arith.constant dense<0.000000e+00> : vector<8x128xf32>
    %77 = tpu.matmul %69, %12, %cst_47 {dimension_numbers = #tpu.dot_dimension_numbers<[1], [0], [0], [1], [0, 0, 1, 1], [], []>} : vector<8x128xf32>, vector<128x128xf32>, vector<8x128xf32> -> vector<8x128xf32>
    %78 = arith.addf %76, %77 : vector<8x128xf32>
    %79 = math.tanh %78 : vector<8x128xf32>
    %80 = arith.index_cast %c6_i32 : i32 to index
    %c0_48 = arith.constant 0 : index
    %c0_49 = arith.constant 0 : index
    %81 = vector.load %arg6[%80, %c0_48, %c0_49] : memref<8x8x128xf32, #tpu.memory_space<vmem>>, vector<1x8x128xf32>
    %82 = vector.shape_cast %81 : vector<1x8x128xf32> to vector<8x128xf32>
    %83 = vector.shape_cast %79 : vector<8x128xf32> to vector<1x8x128xf32>
    tpu.vector_store %arg6[%80, %c0_48, %c0_49], %83 {strides = array<i32>} : memref<8x8x128xf32, #tpu.memory_space<vmem>>, vector<1x8x128xf32>,
    %c7_i32 = arith.constant 7 : i32
    %84 = arith.index_cast %c7_i32 : i32 to index
    %c0_50 = arith.constant 0 : index
    %c0_51 = arith.constant 0 : index
    %85 = vector.load %arg8[%84, %c0_50, %c0_51] : memref<8x8x128xf32, #tpu.memory_space<vmem>>, vector<1x8x128xf32>
    %86 = vector.shape_cast %85 : vector<1x8x128xf32> to vector<8x128xf32>
    %cst_52 = arith.constant dense<0.000000e+00> : vector<8x128xf32>
    %87 = tpu.matmul %79, %12, %cst_52 {dimension_numbers = #tpu.dot_dimension_numbers<[1], [0], [0], [1], [0, 0, 1, 1], [], []>} : vector<8x128xf32>, vector<128x128xf32>, vector<8x128xf32> -> vector<8x128xf32>
    %88 = arith.addf %86, %87 : vector<8x128xf32>
    %89 = math.tanh %88 : vector<8x128xf32>
    %90 = arith.index_cast %c7_i32 : i32 to index
    %c0_53 = arith.constant 0 : index
    %c0_54 = arith.constant 0 : index
    %91 = vector.load %arg6[%90, %c0_53, %c0_54] : memref<8x8x128xf32, #tpu.memory_space<vmem>>, vector<1x8x128xf32>
    %92 = vector.shape_cast %91 : vector<1x8x128xf32> to vector<8x128xf32>
    %93 = vector.shape_cast %89 : vector<8x128xf32> to vector<1x8x128xf32>
    tpu.vector_store %arg6[%90, %c0_53, %c0_54], %93 {strides = array<i32>} : memref<8x8x128xf32, #tpu.memory_space<vmem>>, vector<1x8x128xf32>,
    %c8_i32 = arith.constant 8 : i32
    %c0_55 = arith.constant 0 : index
    %c0_56 = arith.constant 0 : index
    %94 = vector.load %arg7[%c0_55, %c0_56] : memref<8x128xf32, #tpu.memory_space<vmem>>, vector<8x128xf32>
    tpu.vector_store %arg7[%c0_55, %c0_56], %89 {strides = array<i32>} : memref<8x128xf32, #tpu.memory_space<vmem>>, vector<8x128xf32>,
    return
  }
  func.func @transform_0(%arg0: i32) -> (i32, i32, i32) {
    %c0_i32 = arith.constant 0 : i32
    %c0_i32_0 = arith.constant 0 : i32
    %c0_i32_1 = arith.constant 0 : i32
    return %arg0, %c0_i32, %c0_i32_0 : i32, i32, i32
  }
  func.func @transform_1(%arg0: i32) -> (i32, i32) {
    %c0_i32 = arith.constant 0 : i32
    %c0_i32_0 = arith.constant 0 : i32
    %c0_i32_1 = arith.constant 0 : i32
    return %c0_i32, %c0_i32_0 : i32, i32
  }
  func.func @transform_2(%arg0: i32) -> (i32, i32) {
    %c0_i32 = arith.constant 0 : i32
    %c0_i32_0 = arith.constant 0 : i32
    %c0_i32_1 = arith.constant 0 : i32
    return %c0_i32, %c0_i32_0 : i32, i32
  }
  func.func @transform_3(%arg0: i32) -> (i32, i32) {
    %c0_i32 = arith.constant 0 : i32
    %c0_i32_0 = arith.constant 0 : i32
    %c0_i32_1 = arith.constant 0 : i32
    return %c0_i32, %c0_i32_0 : i32, i32
  }
  func.func @transform_4(%arg0: i32) -> (i32, i32) {
    %c0_i32 = arith.constant 0 : i32
    %c0_i32_0 = arith.constant 0 : i32
    %c0_i32_1 = arith.constant 0 : i32
    return %c0_i32, %c0_i32_0 : i32, i32
  }
  func.func @transform_5(%arg0: i32) -> (i32, i32, i32) {
    %c0_i32 = arith.constant 0 : i32
    %c0_i32_0 = arith.constant 0 : i32
    %c0_i32_1 = arith.constant 0 : i32
    return %arg0, %c0_i32, %c0_i32_0 : i32, i32, i32
  }
}

module attributes {stable_mosaic.version = 11 : i64} {
  func.func @_rnn_chunk_kernel(%arg0: i32, %arg1: memref<8x8x128xf32, #tpu.memory_space<vmem>>, %arg2: memref<128x128xf32, #tpu.memory_space<vmem>>, %arg3: memref<128x128xf32, #tpu.memory_space<vmem>>, %arg4: memref<1x128xf32, #tpu.memory_space<vmem>>, %arg5: memref<8x128xf32, #tpu.memory_space<vmem>>, %arg6: memref<8x8x128xf32, #tpu.memory_space<vmem>>, %arg7: memref<8x128xf32, #tpu.memory_space<vmem>>, %arg8: memref<8x8x128xf32, #tpu.memory_space<vmem>>) attributes {dimension_semantics = [#tpu.dimension_semantics<arbitrary>], iteration_bounds = array<i64: 1>, scalar_prefetch = 0 : i64, scratch_operands = 2 : i64, tpu.core_type = #tpu.core_type<tc>, window_params = [{transform_indices = @transform_0, window_bounds = array<i64: 8, 8, 128>}, {pipeline_mode = #tpu.pipeline_mode<synchronous>, transform_indices = @transform_1, window_bounds = array<i64: 128, 128>}, {pipeline_mode = #tpu.pipeline_mode<synchronous>, transform_indices = @transform_2, window_bounds = array<i64: 128, 128>}, {pipeline_mode = #tpu.pipeline_mode<synchronous>, transform_indices = @transform_3, window_bounds = array<i64: 1, 128>}, {pipeline_mode = #tpu.pipeline_mode<synchronous>, transform_indices = @transform_4, window_bounds = array<i64: 8, 128>}, {transform_indices = @transform_5, window_bounds = array<i64: 8, 8, 128>}]} {
    %c0_i32 = arith.constant 0 : i32
    %0 = arith.cmpi eq, %arg0, %c0_i32 : i32
    %1 = arith.extui %0 : i1 to i32
    %c0_i32_0 = arith.constant 0 : i32
    %2 = arith.cmpi ne, %1, %c0_i32_0 : i32
    scf.if %2 {
      %c0_65 = arith.constant 0 : index
      %c0_66 = arith.constant 0 : index
      %103 = vector.load %arg5[%c0_65, %c0_66] : memref<8x128xf32, #tpu.memory_space<vmem>>, vector<8x128xf32>
      %c0_67 = arith.constant 0 : index
      %c0_68 = arith.constant 0 : index
      %104 = vector.load %arg7[%c0_67, %c0_68] : memref<8x128xf32, #tpu.memory_space<vmem>>, vector<8x128xf32>
      tpu.vector_store %arg7[%c0_67, %c0_68], %103 {strides = array<i32>} : memref<8x128xf32, #tpu.memory_space<vmem>>, vector<8x128xf32>,
    } else {
    }
    %c0 = arith.constant 0 : index
    %c0_1 = arith.constant 0 : index
    %c0_2 = arith.constant 0 : index
    %3 = vector.load %arg1[%c0, %c0_1, %c0_2] : memref<8x8x128xf32, #tpu.memory_space<vmem>>, vector<8x8x128xf32>
    %4 = vector.shape_cast %3 : vector<8x8x128xf32> to vector<64x128xf32>
    %c0_3 = arith.constant 0 : index
    %c0_4 = arith.constant 0 : index
    %5 = vector.load %arg2[%c0_3, %c0_4] : memref<128x128xf32, #tpu.memory_space<vmem>>, vector<128x128xf32>
    %cst = arith.constant dense<0.000000e+00> : vector<64x128xf32>
    %6 = tpu.matmul %4, %5, %cst {dimension_numbers = #tpu.dot_dimension_numbers<[1], [0], [0], [1], [0, 0, 1, 1], [], []>} : vector<64x128xf32>, vector<128x128xf32>, vector<64x128xf32> -> vector<64x128xf32>
    %c0_5 = arith.constant 0 : index
    %c0_6 = arith.constant 0 : index
    %7 = vector.load %arg4[%c0_5, %c0_6] : memref<1x128xf32, #tpu.memory_space<vmem>>, vector<1x128xf32>
    %8 = vector.broadcast %7 : vector<1x128xf32> to vector<64x128xf32>
    %9 = arith.addf %6, %8 : vector<64x128xf32>
    %10 = vector.shape_cast %9 : vector<64x128xf32> to vector<8x8x128xf32>
    %c0_7 = arith.constant 0 : index
    %c0_8 = arith.constant 0 : index
    %c0_9 = arith.constant 0 : index
    %11 = vector.load %arg8[%c0_7, %c0_8, %c0_9] : memref<8x8x128xf32, #tpu.memory_space<vmem>>, vector<8x8x128xf32>
    tpu.vector_store %arg8[%c0_7, %c0_8, %c0_9], %10 {strides = array<i32>} : memref<8x8x128xf32, #tpu.memory_space<vmem>>, vector<8x8x128xf32>,
    %c0_10 = arith.constant 0 : index
    %c0_11 = arith.constant 0 : index
    %12 = vector.load %arg3[%c0_10, %c0_11] : memref<128x128xf32, #tpu.memory_space<vmem>>, vector<128x128xf32>
    %c0_12 = arith.constant 0 : index
    %c0_13 = arith.constant 0 : index
    %13 = vector.load %arg7[%c0_12, %c0_13] : memref<8x128xf32, #tpu.memory_space<vmem>>, vector<8x128xf32>
    %c0_i32_14 = arith.constant 0 : i32
    %c7_i32 = arith.constant 7 : i32
    %14 = arith.subi %c7_i32, %c0_i32_14 : i32
    %15 = arith.index_cast %14 : i32 to index
    %c0_15 = arith.constant 0 : index
    %c0_16 = arith.constant 0 : index
    %16 = vector.load %arg8[%15, %c0_15, %c0_16] : memref<8x8x128xf32, #tpu.memory_space<vmem>>, vector<1x8x128xf32>
    %17 = vector.shape_cast %16 : vector<1x8x128xf32> to vector<8x128xf32>
    %cst_17 = arith.constant dense<0.000000e+00> : vector<8x128xf32>
    %18 = tpu.matmul %13, %12, %cst_17 {dimension_numbers = #tpu.dot_dimension_numbers<[1], [0], [0], [1], [0, 0, 1, 1], [], []>} : vector<8x128xf32>, vector<128x128xf32>, vector<8x128xf32> -> vector<8x128xf32>
    %19 = arith.addf %17, %18 : vector<8x128xf32>
    %20 = math.tanh %19 : vector<8x128xf32>
    %21 = arith.index_cast %14 : i32 to index
    %c0_18 = arith.constant 0 : index
    %c0_19 = arith.constant 0 : index
    %22 = vector.load %arg6[%21, %c0_18, %c0_19] : memref<8x8x128xf32, #tpu.memory_space<vmem>>, vector<1x8x128xf32>
    %23 = vector.shape_cast %22 : vector<1x8x128xf32> to vector<8x128xf32>
    %24 = vector.shape_cast %20 : vector<8x128xf32> to vector<1x8x128xf32>
    tpu.vector_store %arg6[%21, %c0_18, %c0_19], %24 {strides = array<i32>} : memref<8x8x128xf32, #tpu.memory_space<vmem>>, vector<1x8x128xf32>,
    %c1_i32 = arith.constant 1 : i32
    %c7_i32_20 = arith.constant 7 : i32
    %25 = arith.subi %c7_i32_20, %c1_i32 : i32
    %26 = arith.index_cast %25 : i32 to index
    %c0_21 = arith.constant 0 : index
    %c0_22 = arith.constant 0 : index
    %27 = vector.load %arg8[%26, %c0_21, %c0_22] : memref<8x8x128xf32, #tpu.memory_space<vmem>>, vector<1x8x128xf32>
    %28 = vector.shape_cast %27 : vector<1x8x128xf32> to vector<8x128xf32>
    %cst_23 = arith.constant dense<0.000000e+00> : vector<8x128xf32>
    %29 = tpu.matmul %20, %12, %cst_23 {dimension_numbers = #tpu.dot_dimension_numbers<[1], [0], [0], [1], [0, 0, 1, 1], [], []>} : vector<8x128xf32>, vector<128x128xf32>, vector<8x128xf32> -> vector<8x128xf32>
    %30 = arith.addf %28, %29 : vector<8x128xf32>
    %31 = math.tanh %30 : vector<8x128xf32>
    %32 = arith.index_cast %25 : i32 to index
    %c0_24 = arith.constant 0 : index
    %c0_25 = arith.constant 0 : index
    %33 = vector.load %arg6[%32, %c0_24, %c0_25] : memref<8x8x128xf32, #tpu.memory_space<vmem>>, vector<1x8x128xf32>
    %34 = vector.shape_cast %33 : vector<1x8x128xf32> to vector<8x128xf32>
    %35 = vector.shape_cast %31 : vector<8x128xf32> to vector<1x8x128xf32>
    tpu.vector_store %arg6[%32, %c0_24, %c0_25], %35 {strides = array<i32>} : memref<8x8x128xf32, #tpu.memory_space<vmem>>, vector<1x8x128xf32>,
    %c2_i32 = arith.constant 2 : i32
    %c7_i32_26 = arith.constant 7 : i32
    %36 = arith.subi %c7_i32_26, %c2_i32 : i32
    %37 = arith.index_cast %36 : i32 to index
    %c0_27 = arith.constant 0 : index
    %c0_28 = arith.constant 0 : index
    %38 = vector.load %arg8[%37, %c0_27, %c0_28] : memref<8x8x128xf32, #tpu.memory_space<vmem>>, vector<1x8x128xf32>
    %39 = vector.shape_cast %38 : vector<1x8x128xf32> to vector<8x128xf32>
    %cst_29 = arith.constant dense<0.000000e+00> : vector<8x128xf32>
    %40 = tpu.matmul %31, %12, %cst_29 {dimension_numbers = #tpu.dot_dimension_numbers<[1], [0], [0], [1], [0, 0, 1, 1], [], []>} : vector<8x128xf32>, vector<128x128xf32>, vector<8x128xf32> -> vector<8x128xf32>
    %41 = arith.addf %39, %40 : vector<8x128xf32>
    %42 = math.tanh %41 : vector<8x128xf32>
    %43 = arith.index_cast %36 : i32 to index
    %c0_30 = arith.constant 0 : index
    %c0_31 = arith.constant 0 : index
    %44 = vector.load %arg6[%43, %c0_30, %c0_31] : memref<8x8x128xf32, #tpu.memory_space<vmem>>, vector<1x8x128xf32>
    %45 = vector.shape_cast %44 : vector<1x8x128xf32> to vector<8x128xf32>
    %46 = vector.shape_cast %42 : vector<8x128xf32> to vector<1x8x128xf32>
    tpu.vector_store %arg6[%43, %c0_30, %c0_31], %46 {strides = array<i32>} : memref<8x8x128xf32, #tpu.memory_space<vmem>>, vector<1x8x128xf32>,
    %c3_i32 = arith.constant 3 : i32
    %c7_i32_32 = arith.constant 7 : i32
    %47 = arith.subi %c7_i32_32, %c3_i32 : i32
    %48 = arith.index_cast %47 : i32 to index
    %c0_33 = arith.constant 0 : index
    %c0_34 = arith.constant 0 : index
    %49 = vector.load %arg8[%48, %c0_33, %c0_34] : memref<8x8x128xf32, #tpu.memory_space<vmem>>, vector<1x8x128xf32>
    %50 = vector.shape_cast %49 : vector<1x8x128xf32> to vector<8x128xf32>
    %cst_35 = arith.constant dense<0.000000e+00> : vector<8x128xf32>
    %51 = tpu.matmul %42, %12, %cst_35 {dimension_numbers = #tpu.dot_dimension_numbers<[1], [0], [0], [1], [0, 0, 1, 1], [], []>} : vector<8x128xf32>, vector<128x128xf32>, vector<8x128xf32> -> vector<8x128xf32>
    %52 = arith.addf %50, %51 : vector<8x128xf32>
    %53 = math.tanh %52 : vector<8x128xf32>
    %54 = arith.index_cast %47 : i32 to index
    %c0_36 = arith.constant 0 : index
    %c0_37 = arith.constant 0 : index
    %55 = vector.load %arg6[%54, %c0_36, %c0_37] : memref<8x8x128xf32, #tpu.memory_space<vmem>>, vector<1x8x128xf32>
    %56 = vector.shape_cast %55 : vector<1x8x128xf32> to vector<8x128xf32>
    %57 = vector.shape_cast %53 : vector<8x128xf32> to vector<1x8x128xf32>
    tpu.vector_store %arg6[%54, %c0_36, %c0_37], %57 {strides = array<i32>} : memref<8x8x128xf32, #tpu.memory_space<vmem>>, vector<1x8x128xf32>,
    %c4_i32 = arith.constant 4 : i32
    %c7_i32_38 = arith.constant 7 : i32
    %58 = arith.subi %c7_i32_38, %c4_i32 : i32
    %59 = arith.index_cast %58 : i32 to index
    %c0_39 = arith.constant 0 : index
    %c0_40 = arith.constant 0 : index
    %60 = vector.load %arg8[%59, %c0_39, %c0_40] : memref<8x8x128xf32, #tpu.memory_space<vmem>>, vector<1x8x128xf32>
    %61 = vector.shape_cast %60 : vector<1x8x128xf32> to vector<8x128xf32>
    %cst_41 = arith.constant dense<0.000000e+00> : vector<8x128xf32>
    %62 = tpu.matmul %53, %12, %cst_41 {dimension_numbers = #tpu.dot_dimension_numbers<[1], [0], [0], [1], [0, 0, 1, 1], [], []>} : vector<8x128xf32>, vector<128x128xf32>, vector<8x128xf32> -> vector<8x128xf32>
    %63 = arith.addf %61, %62 : vector<8x128xf32>
    %64 = math.tanh %63 : vector<8x128xf32>
    %65 = arith.index_cast %58 : i32 to index
    %c0_42 = arith.constant 0 : index
    %c0_43 = arith.constant 0 : index
    %66 = vector.load %arg6[%65, %c0_42, %c0_43] : memref<8x8x128xf32, #tpu.memory_space<vmem>>, vector<1x8x128xf32>
    %67 = vector.shape_cast %66 : vector<1x8x128xf32> to vector<8x128xf32>
    %68 = vector.shape_cast %64 : vector<8x128xf32> to vector<1x8x128xf32>
    tpu.vector_store %arg6[%65, %c0_42, %c0_43], %68 {strides = array<i32>} : memref<8x8x128xf32, #tpu.memory_space<vmem>>, vector<1x8x128xf32>,
    %c5_i32 = arith.constant 5 : i32
    %c7_i32_44 = arith.constant 7 : i32
    %69 = arith.subi %c7_i32_44, %c5_i32 : i32
    %70 = arith.index_cast %69 : i32 to index
    %c0_45 = arith.constant 0 : index
    %c0_46 = arith.constant 0 : index
    %71 = vector.load %arg8[%70, %c0_45, %c0_46] : memref<8x8x128xf32, #tpu.memory_space<vmem>>, vector<1x8x128xf32>
    %72 = vector.shape_cast %71 : vector<1x8x128xf32> to vector<8x128xf32>
    %cst_47 = arith.constant dense<0.000000e+00> : vector<8x128xf32>
    %73 = tpu.matmul %64, %12, %cst_47 {dimension_numbers = #tpu.dot_dimension_numbers<[1], [0], [0], [1], [0, 0, 1, 1], [], []>} : vector<8x128xf32>, vector<128x128xf32>, vector<8x128xf32> -> vector<8x128xf32>
    %74 = arith.addf %72, %73 : vector<8x128xf32>
    %75 = math.tanh %74 : vector<8x128xf32>
    %76 = arith.index_cast %69 : i32 to index
    %c0_48 = arith.constant 0 : index
    %c0_49 = arith.constant 0 : index
    %77 = vector.load %arg6[%76, %c0_48, %c0_49] : memref<8x8x128xf32, #tpu.memory_space<vmem>>, vector<1x8x128xf32>
    %78 = vector.shape_cast %77 : vector<1x8x128xf32> to vector<8x128xf32>
    %79 = vector.shape_cast %75 : vector<8x128xf32> to vector<1x8x128xf32>
    tpu.vector_store %arg6[%76, %c0_48, %c0_49], %79 {strides = array<i32>} : memref<8x8x128xf32, #tpu.memory_space<vmem>>, vector<1x8x128xf32>,
    %c6_i32 = arith.constant 6 : i32
    %c7_i32_50 = arith.constant 7 : i32
    %80 = arith.subi %c7_i32_50, %c6_i32 : i32
    %81 = arith.index_cast %80 : i32 to index
    %c0_51 = arith.constant 0 : index
    %c0_52 = arith.constant 0 : index
    %82 = vector.load %arg8[%81, %c0_51, %c0_52] : memref<8x8x128xf32, #tpu.memory_space<vmem>>, vector<1x8x128xf32>
    %83 = vector.shape_cast %82 : vector<1x8x128xf32> to vector<8x128xf32>
    %cst_53 = arith.constant dense<0.000000e+00> : vector<8x128xf32>
    %84 = tpu.matmul %75, %12, %cst_53 {dimension_numbers = #tpu.dot_dimension_numbers<[1], [0], [0], [1], [0, 0, 1, 1], [], []>} : vector<8x128xf32>, vector<128x128xf32>, vector<8x128xf32> -> vector<8x128xf32>
    %85 = arith.addf %83, %84 : vector<8x128xf32>
    %86 = math.tanh %85 : vector<8x128xf32>
    %87 = arith.index_cast %80 : i32 to index
    %c0_54 = arith.constant 0 : index
    %c0_55 = arith.constant 0 : index
    %88 = vector.load %arg6[%87, %c0_54, %c0_55] : memref<8x8x128xf32, #tpu.memory_space<vmem>>, vector<1x8x128xf32>
    %89 = vector.shape_cast %88 : vector<1x8x128xf32> to vector<8x128xf32>
    %90 = vector.shape_cast %86 : vector<8x128xf32> to vector<1x8x128xf32>
    tpu.vector_store %arg6[%87, %c0_54, %c0_55], %90 {strides = array<i32>} : memref<8x8x128xf32, #tpu.memory_space<vmem>>, vector<1x8x128xf32>,
    %c7_i32_56 = arith.constant 7 : i32
    %c7_i32_57 = arith.constant 7 : i32
    %91 = arith.subi %c7_i32_57, %c7_i32_56 : i32
    %92 = arith.index_cast %91 : i32 to index
    %c0_58 = arith.constant 0 : index
    %c0_59 = arith.constant 0 : index
    %93 = vector.load %arg8[%92, %c0_58, %c0_59] : memref<8x8x128xf32, #tpu.memory_space<vmem>>, vector<1x8x128xf32>
    %94 = vector.shape_cast %93 : vector<1x8x128xf32> to vector<8x128xf32>
    %cst_60 = arith.constant dense<0.000000e+00> : vector<8x128xf32>
    %95 = tpu.matmul %86, %12, %cst_60 {dimension_numbers = #tpu.dot_dimension_numbers<[1], [0], [0], [1], [0, 0, 1, 1], [], []>} : vector<8x128xf32>, vector<128x128xf32>, vector<8x128xf32> -> vector<8x128xf32>
    %96 = arith.addf %94, %95 : vector<8x128xf32>
    %97 = math.tanh %96 : vector<8x128xf32>
    %98 = arith.index_cast %91 : i32 to index
    %c0_61 = arith.constant 0 : index
    %c0_62 = arith.constant 0 : index
    %99 = vector.load %arg6[%98, %c0_61, %c0_62] : memref<8x8x128xf32, #tpu.memory_space<vmem>>, vector<1x8x128xf32>
    %100 = vector.shape_cast %99 : vector<1x8x128xf32> to vector<8x128xf32>
    %101 = vector.shape_cast %97 : vector<8x128xf32> to vector<1x8x128xf32>
    tpu.vector_store %arg6[%98, %c0_61, %c0_62], %101 {strides = array<i32>} : memref<8x8x128xf32, #tpu.memory_space<vmem>>, vector<1x8x128xf32>,
    %c8_i32 = arith.constant 8 : i32
    %c0_63 = arith.constant 0 : index
    %c0_64 = arith.constant 0 : index
    %102 = vector.load %arg7[%c0_63, %c0_64] : memref<8x128xf32, #tpu.memory_space<vmem>>, vector<8x128xf32>
    tpu.vector_store %arg7[%c0_63, %c0_64], %97 {strides = array<i32>} : memref<8x128xf32, #tpu.memory_space<vmem>>, vector<8x128xf32>,
    return
  }
  func.func @transform_0(%arg0: i32) -> (i32, i32, i32) {
    %c0_i32 = arith.constant 0 : i32
    %0 = arith.subi %c0_i32, %arg0 : i32
    %c0_i32_0 = arith.constant 0 : i32
    %c0_i32_1 = arith.constant 0 : i32
    %c0_i32_2 = arith.constant 0 : i32
    return %0, %c0_i32_0, %c0_i32_1 : i32, i32, i32
  }
  func.func @transform_1(%arg0: i32) -> (i32, i32) {
    %c0_i32 = arith.constant 0 : i32
    %c0_i32_0 = arith.constant 0 : i32
    %c0_i32_1 = arith.constant 0 : i32
    return %c0_i32, %c0_i32_0 : i32, i32
  }
  func.func @transform_2(%arg0: i32) -> (i32, i32) {
    %c0_i32 = arith.constant 0 : i32
    %c0_i32_0 = arith.constant 0 : i32
    %c0_i32_1 = arith.constant 0 : i32
    return %c0_i32, %c0_i32_0 : i32, i32
  }
  func.func @transform_3(%arg0: i32) -> (i32, i32) {
    %c0_i32 = arith.constant 0 : i32
    %c0_i32_0 = arith.constant 0 : i32
    %c0_i32_1 = arith.constant 0 : i32
    return %c0_i32, %c0_i32_0 : i32, i32
  }
  func.func @transform_4(%arg0: i32) -> (i32, i32) {
    %c0_i32 = arith.constant 0 : i32
    %c0_i32_0 = arith.constant 0 : i32
    %c0_i32_1 = arith.constant 0 : i32
    return %c0_i32, %c0_i32_0 : i32, i32
  }
  func.func @transform_5(%arg0: i32) -> (i32, i32, i32) {
    %c0_i32 = arith.constant 0 : i32
    %0 = arith.subi %c0_i32, %arg0 : i32
    %c0_i32_0 = arith.constant 0 : i32
    %c0_i32_1 = arith.constant 0 : i32
    %c0_i32_2 = arith.constant 0 : i32
    return %0, %c0_i32_0, %c0_i32_1 : i32, i32, i32
  }
}

module attributes {stable_mosaic.version = 11 : i64} {
  func.func @_rnn_chunk_kernel(%arg0: i32, %arg1: memref<8x8x256xf32, #tpu.memory_space<vmem>>, %arg2: memref<256x128xf32, #tpu.memory_space<vmem>>, %arg3: memref<128x128xf32, #tpu.memory_space<vmem>>, %arg4: memref<1x128xf32, #tpu.memory_space<vmem>>, %arg5: memref<8x128xf32, #tpu.memory_space<vmem>>, %arg6: memref<8x8x128xf32, #tpu.memory_space<vmem>>, %arg7: memref<8x128xf32, #tpu.memory_space<vmem>>, %arg8: memref<8x8x128xf32, #tpu.memory_space<vmem>>) attributes {dimension_semantics = [#tpu.dimension_semantics<arbitrary>], iteration_bounds = array<i64: 1>, scalar_prefetch = 0 : i64, scratch_operands = 2 : i64, tpu.core_type = #tpu.core_type<tc>, window_params = [{transform_indices = @transform_0, window_bounds = array<i64: 8, 8, 256>}, {pipeline_mode = #tpu.pipeline_mode<synchronous>, transform_indices = @transform_1, window_bounds = array<i64: 256, 128>}, {pipeline_mode = #tpu.pipeline_mode<synchronous>, transform_indices = @transform_2, window_bounds = array<i64: 128, 128>}, {pipeline_mode = #tpu.pipeline_mode<synchronous>, transform_indices = @transform_3, window_bounds = array<i64: 1, 128>}, {pipeline_mode = #tpu.pipeline_mode<synchronous>, transform_indices = @transform_4, window_bounds = array<i64: 8, 128>}, {transform_indices = @transform_5, window_bounds = array<i64: 8, 8, 128>}]} {
    %c0_i32 = arith.constant 0 : i32
    %0 = arith.cmpi eq, %arg0, %c0_i32 : i32
    %1 = arith.extui %0 : i1 to i32
    %c0_i32_0 = arith.constant 0 : i32
    %2 = arith.cmpi ne, %1, %c0_i32_0 : i32
    scf.if %2 {
      %c0_57 = arith.constant 0 : index
      %c0_58 = arith.constant 0 : index
      %95 = vector.load %arg5[%c0_57, %c0_58] : memref<8x128xf32, #tpu.memory_space<vmem>>, vector<8x128xf32>
      %c0_59 = arith.constant 0 : index
      %c0_60 = arith.constant 0 : index
      %96 = vector.load %arg7[%c0_59, %c0_60] : memref<8x128xf32, #tpu.memory_space<vmem>>, vector<8x128xf32>
      tpu.vector_store %arg7[%c0_59, %c0_60], %95 {strides = array<i32>} : memref<8x128xf32, #tpu.memory_space<vmem>>, vector<8x128xf32>,
    } else {
    }
    %c0 = arith.constant 0 : index
    %c0_1 = arith.constant 0 : index
    %c0_2 = arith.constant 0 : index
    %3 = vector.load %arg1[%c0, %c0_1, %c0_2] : memref<8x8x256xf32, #tpu.memory_space<vmem>>, vector<8x8x256xf32>
    %4 = vector.shape_cast %3 : vector<8x8x256xf32> to vector<64x256xf32>
    %c0_3 = arith.constant 0 : index
    %c0_4 = arith.constant 0 : index
    %5 = vector.load %arg2[%c0_3, %c0_4] : memref<256x128xf32, #tpu.memory_space<vmem>>, vector<256x128xf32>
    %cst = arith.constant dense<0.000000e+00> : vector<64x128xf32>
    %6 = tpu.matmul %4, %5, %cst {dimension_numbers = #tpu.dot_dimension_numbers<[1], [0], [0], [1], [0, 0, 1, 1], [], []>} : vector<64x256xf32>, vector<256x128xf32>, vector<64x128xf32> -> vector<64x128xf32>
    %c0_5 = arith.constant 0 : index
    %c0_6 = arith.constant 0 : index
    %7 = vector.load %arg4[%c0_5, %c0_6] : memref<1x128xf32, #tpu.memory_space<vmem>>, vector<1x128xf32>
    %8 = vector.broadcast %7 : vector<1x128xf32> to vector<64x128xf32>
    %9 = arith.addf %6, %8 : vector<64x128xf32>
    %10 = vector.shape_cast %9 : vector<64x128xf32> to vector<8x8x128xf32>
    %c0_7 = arith.constant 0 : index
    %c0_8 = arith.constant 0 : index
    %c0_9 = arith.constant 0 : index
    %11 = vector.load %arg8[%c0_7, %c0_8, %c0_9] : memref<8x8x128xf32, #tpu.memory_space<vmem>>, vector<8x8x128xf32>
    tpu.vector_store %arg8[%c0_7, %c0_8, %c0_9], %10 {strides = array<i32>} : memref<8x8x128xf32, #tpu.memory_space<vmem>>, vector<8x8x128xf32>,
    %c0_10 = arith.constant 0 : index
    %c0_11 = arith.constant 0 : index
    %12 = vector.load %arg3[%c0_10, %c0_11] : memref<128x128xf32, #tpu.memory_space<vmem>>, vector<128x128xf32>
    %c0_12 = arith.constant 0 : index
    %c0_13 = arith.constant 0 : index
    %13 = vector.load %arg7[%c0_12, %c0_13] : memref<8x128xf32, #tpu.memory_space<vmem>>, vector<8x128xf32>
    %c0_i32_14 = arith.constant 0 : i32
    %14 = arith.index_cast %c0_i32_14 : i32 to index
    %c0_15 = arith.constant 0 : index
    %c0_16 = arith.constant 0 : index
    %15 = vector.load %arg8[%14, %c0_15, %c0_16] : memref<8x8x128xf32, #tpu.memory_space<vmem>>, vector<1x8x128xf32>
    %16 = vector.shape_cast %15 : vector<1x8x128xf32> to vector<8x128xf32>
    %cst_17 = arith.constant dense<0.000000e+00> : vector<8x128xf32>
    %17 = tpu.matmul %13, %12, %cst_17 {dimension_numbers = #tpu.dot_dimension_numbers<[1], [0], [0], [1], [0, 0, 1, 1], [], []>} : vector<8x128xf32>, vector<128x128xf32>, vector<8x128xf32> -> vector<8x128xf32>
    %18 = arith.addf %16, %17 : vector<8x128xf32>
    %19 = math.tanh %18 : vector<8x128xf32>
    %20 = arith.index_cast %c0_i32_14 : i32 to index
    %c0_18 = arith.constant 0 : index
    %c0_19 = arith.constant 0 : index
    %21 = vector.load %arg6[%20, %c0_18, %c0_19] : memref<8x8x128xf32, #tpu.memory_space<vmem>>, vector<1x8x128xf32>
    %22 = vector.shape_cast %21 : vector<1x8x128xf32> to vector<8x128xf32>
    %23 = vector.shape_cast %19 : vector<8x128xf32> to vector<1x8x128xf32>
    tpu.vector_store %arg6[%20, %c0_18, %c0_19], %23 {strides = array<i32>} : memref<8x8x128xf32, #tpu.memory_space<vmem>>, vector<1x8x128xf32>,
    %c1_i32 = arith.constant 1 : i32
    %24 = arith.index_cast %c1_i32 : i32 to index
    %c0_20 = arith.constant 0 : index
    %c0_21 = arith.constant 0 : index
    %25 = vector.load %arg8[%24, %c0_20, %c0_21] : memref<8x8x128xf32, #tpu.memory_space<vmem>>, vector<1x8x128xf32>
    %26 = vector.shape_cast %25 : vector<1x8x128xf32> to vector<8x128xf32>
    %cst_22 = arith.constant dense<0.000000e+00> : vector<8x128xf32>
    %27 = tpu.matmul %19, %12, %cst_22 {dimension_numbers = #tpu.dot_dimension_numbers<[1], [0], [0], [1], [0, 0, 1, 1], [], []>} : vector<8x128xf32>, vector<128x128xf32>, vector<8x128xf32> -> vector<8x128xf32>
    %28 = arith.addf %26, %27 : vector<8x128xf32>
    %29 = math.tanh %28 : vector<8x128xf32>
    %30 = arith.index_cast %c1_i32 : i32 to index
    %c0_23 = arith.constant 0 : index
    %c0_24 = arith.constant 0 : index
    %31 = vector.load %arg6[%30, %c0_23, %c0_24] : memref<8x8x128xf32, #tpu.memory_space<vmem>>, vector<1x8x128xf32>
    %32 = vector.shape_cast %31 : vector<1x8x128xf32> to vector<8x128xf32>
    %33 = vector.shape_cast %29 : vector<8x128xf32> to vector<1x8x128xf32>
    tpu.vector_store %arg6[%30, %c0_23, %c0_24], %33 {strides = array<i32>} : memref<8x8x128xf32, #tpu.memory_space<vmem>>, vector<1x8x128xf32>,
    %c2_i32 = arith.constant 2 : i32
    %34 = arith.index_cast %c2_i32 : i32 to index
    %c0_25 = arith.constant 0 : index
    %c0_26 = arith.constant 0 : index
    %35 = vector.load %arg8[%34, %c0_25, %c0_26] : memref<8x8x128xf32, #tpu.memory_space<vmem>>, vector<1x8x128xf32>
    %36 = vector.shape_cast %35 : vector<1x8x128xf32> to vector<8x128xf32>
    %cst_27 = arith.constant dense<0.000000e+00> : vector<8x128xf32>
    %37 = tpu.matmul %29, %12, %cst_27 {dimension_numbers = #tpu.dot_dimension_numbers<[1], [0], [0], [1], [0, 0, 1, 1], [], []>} : vector<8x128xf32>, vector<128x128xf32>, vector<8x128xf32> -> vector<8x128xf32>
    %38 = arith.addf %36, %37 : vector<8x128xf32>
    %39 = math.tanh %38 : vector<8x128xf32>
    %40 = arith.index_cast %c2_i32 : i32 to index
    %c0_28 = arith.constant 0 : index
    %c0_29 = arith.constant 0 : index
    %41 = vector.load %arg6[%40, %c0_28, %c0_29] : memref<8x8x128xf32, #tpu.memory_space<vmem>>, vector<1x8x128xf32>
    %42 = vector.shape_cast %41 : vector<1x8x128xf32> to vector<8x128xf32>
    %43 = vector.shape_cast %39 : vector<8x128xf32> to vector<1x8x128xf32>
    tpu.vector_store %arg6[%40, %c0_28, %c0_29], %43 {strides = array<i32>} : memref<8x8x128xf32, #tpu.memory_space<vmem>>, vector<1x8x128xf32>,
    %c3_i32 = arith.constant 3 : i32
    %44 = arith.index_cast %c3_i32 : i32 to index
    %c0_30 = arith.constant 0 : index
    %c0_31 = arith.constant 0 : index
    %45 = vector.load %arg8[%44, %c0_30, %c0_31] : memref<8x8x128xf32, #tpu.memory_space<vmem>>, vector<1x8x128xf32>
    %46 = vector.shape_cast %45 : vector<1x8x128xf32> to vector<8x128xf32>
    %cst_32 = arith.constant dense<0.000000e+00> : vector<8x128xf32>
    %47 = tpu.matmul %39, %12, %cst_32 {dimension_numbers = #tpu.dot_dimension_numbers<[1], [0], [0], [1], [0, 0, 1, 1], [], []>} : vector<8x128xf32>, vector<128x128xf32>, vector<8x128xf32> -> vector<8x128xf32>
    %48 = arith.addf %46, %47 : vector<8x128xf32>
    %49 = math.tanh %48 : vector<8x128xf32>
    %50 = arith.index_cast %c3_i32 : i32 to index
    %c0_33 = arith.constant 0 : index
    %c0_34 = arith.constant 0 : index
    %51 = vector.load %arg6[%50, %c0_33, %c0_34] : memref<8x8x128xf32, #tpu.memory_space<vmem>>, vector<1x8x128xf32>
    %52 = vector.shape_cast %51 : vector<1x8x128xf32> to vector<8x128xf32>
    %53 = vector.shape_cast %49 : vector<8x128xf32> to vector<1x8x128xf32>
    tpu.vector_store %arg6[%50, %c0_33, %c0_34], %53 {strides = array<i32>} : memref<8x8x128xf32, #tpu.memory_space<vmem>>, vector<1x8x128xf32>,
    %c4_i32 = arith.constant 4 : i32
    %54 = arith.index_cast %c4_i32 : i32 to index
    %c0_35 = arith.constant 0 : index
    %c0_36 = arith.constant 0 : index
    %55 = vector.load %arg8[%54, %c0_35, %c0_36] : memref<8x8x128xf32, #tpu.memory_space<vmem>>, vector<1x8x128xf32>
    %56 = vector.shape_cast %55 : vector<1x8x128xf32> to vector<8x128xf32>
    %cst_37 = arith.constant dense<0.000000e+00> : vector<8x128xf32>
    %57 = tpu.matmul %49, %12, %cst_37 {dimension_numbers = #tpu.dot_dimension_numbers<[1], [0], [0], [1], [0, 0, 1, 1], [], []>} : vector<8x128xf32>, vector<128x128xf32>, vector<8x128xf32> -> vector<8x128xf32>
    %58 = arith.addf %56, %57 : vector<8x128xf32>
    %59 = math.tanh %58 : vector<8x128xf32>
    %60 = arith.index_cast %c4_i32 : i32 to index
    %c0_38 = arith.constant 0 : index
    %c0_39 = arith.constant 0 : index
    %61 = vector.load %arg6[%60, %c0_38, %c0_39] : memref<8x8x128xf32, #tpu.memory_space<vmem>>, vector<1x8x128xf32>
    %62 = vector.shape_cast %61 : vector<1x8x128xf32> to vector<8x128xf32>
    %63 = vector.shape_cast %59 : vector<8x128xf32> to vector<1x8x128xf32>
    tpu.vector_store %arg6[%60, %c0_38, %c0_39], %63 {strides = array<i32>} : memref<8x8x128xf32, #tpu.memory_space<vmem>>, vector<1x8x128xf32>,
    %c5_i32 = arith.constant 5 : i32
    %64 = arith.index_cast %c5_i32 : i32 to index
    %c0_40 = arith.constant 0 : index
    %c0_41 = arith.constant 0 : index
    %65 = vector.load %arg8[%64, %c0_40, %c0_41] : memref<8x8x128xf32, #tpu.memory_space<vmem>>, vector<1x8x128xf32>
    %66 = vector.shape_cast %65 : vector<1x8x128xf32> to vector<8x128xf32>
    %cst_42 = arith.constant dense<0.000000e+00> : vector<8x128xf32>
    %67 = tpu.matmul %59, %12, %cst_42 {dimension_numbers = #tpu.dot_dimension_numbers<[1], [0], [0], [1], [0, 0, 1, 1], [], []>} : vector<8x128xf32>, vector<128x128xf32>, vector<8x128xf32> -> vector<8x128xf32>
    %68 = arith.addf %66, %67 : vector<8x128xf32>
    %69 = math.tanh %68 : vector<8x128xf32>
    %70 = arith.index_cast %c5_i32 : i32 to index
    %c0_43 = arith.constant 0 : index
    %c0_44 = arith.constant 0 : index
    %71 = vector.load %arg6[%70, %c0_43, %c0_44] : memref<8x8x128xf32, #tpu.memory_space<vmem>>, vector<1x8x128xf32>
    %72 = vector.shape_cast %71 : vector<1x8x128xf32> to vector<8x128xf32>
    %73 = vector.shape_cast %69 : vector<8x128xf32> to vector<1x8x128xf32>
    tpu.vector_store %arg6[%70, %c0_43, %c0_44], %73 {strides = array<i32>} : memref<8x8x128xf32, #tpu.memory_space<vmem>>, vector<1x8x128xf32>,
    %c6_i32 = arith.constant 6 : i32
    %74 = arith.index_cast %c6_i32 : i32 to index
    %c0_45 = arith.constant 0 : index
    %c0_46 = arith.constant 0 : index
    %75 = vector.load %arg8[%74, %c0_45, %c0_46] : memref<8x8x128xf32, #tpu.memory_space<vmem>>, vector<1x8x128xf32>
    %76 = vector.shape_cast %75 : vector<1x8x128xf32> to vector<8x128xf32>
    %cst_47 = arith.constant dense<0.000000e+00> : vector<8x128xf32>
    %77 = tpu.matmul %69, %12, %cst_47 {dimension_numbers = #tpu.dot_dimension_numbers<[1], [0], [0], [1], [0, 0, 1, 1], [], []>} : vector<8x128xf32>, vector<128x128xf32>, vector<8x128xf32> -> vector<8x128xf32>
    %78 = arith.addf %76, %77 : vector<8x128xf32>
    %79 = math.tanh %78 : vector<8x128xf32>
    %80 = arith.index_cast %c6_i32 : i32 to index
    %c0_48 = arith.constant 0 : index
    %c0_49 = arith.constant 0 : index
    %81 = vector.load %arg6[%80, %c0_48, %c0_49] : memref<8x8x128xf32, #tpu.memory_space<vmem>>, vector<1x8x128xf32>
    %82 = vector.shape_cast %81 : vector<1x8x128xf32> to vector<8x128xf32>
    %83 = vector.shape_cast %79 : vector<8x128xf32> to vector<1x8x128xf32>
    tpu.vector_store %arg6[%80, %c0_48, %c0_49], %83 {strides = array<i32>} : memref<8x8x128xf32, #tpu.memory_space<vmem>>, vector<1x8x128xf32>,
    %c7_i32 = arith.constant 7 : i32
    %84 = arith.index_cast %c7_i32 : i32 to index
    %c0_50 = arith.constant 0 : index
    %c0_51 = arith.constant 0 : index
    %85 = vector.load %arg8[%84, %c0_50, %c0_51] : memref<8x8x128xf32, #tpu.memory_space<vmem>>, vector<1x8x128xf32>
    %86 = vector.shape_cast %85 : vector<1x8x128xf32> to vector<8x128xf32>
    %cst_52 = arith.constant dense<0.000000e+00> : vector<8x128xf32>
    %87 = tpu.matmul %79, %12, %cst_52 {dimension_numbers = #tpu.dot_dimension_numbers<[1], [0], [0], [1], [0, 0, 1, 1], [], []>} : vector<8x128xf32>, vector<128x128xf32>, vector<8x128xf32> -> vector<8x128xf32>
    %88 = arith.addf %86, %87 : vector<8x128xf32>
    %89 = math.tanh %88 : vector<8x128xf32>
    %90 = arith.index_cast %c7_i32 : i32 to index
    %c0_53 = arith.constant 0 : index
    %c0_54 = arith.constant 0 : index
    %91 = vector.load %arg6[%90, %c0_53, %c0_54] : memref<8x8x128xf32, #tpu.memory_space<vmem>>, vector<1x8x128xf32>
    %92 = vector.shape_cast %91 : vector<1x8x128xf32> to vector<8x128xf32>
    %93 = vector.shape_cast %89 : vector<8x128xf32> to vector<1x8x128xf32>
    tpu.vector_store %arg6[%90, %c0_53, %c0_54], %93 {strides = array<i32>} : memref<8x8x128xf32, #tpu.memory_space<vmem>>, vector<1x8x128xf32>,
    %c8_i32 = arith.constant 8 : i32
    %c0_55 = arith.constant 0 : index
    %c0_56 = arith.constant 0 : index
    %94 = vector.load %arg7[%c0_55, %c0_56] : memref<8x128xf32, #tpu.memory_space<vmem>>, vector<8x128xf32>
    tpu.vector_store %arg7[%c0_55, %c0_56], %89 {strides = array<i32>} : memref<8x128xf32, #tpu.memory_space<vmem>>, vector<8x128xf32>,
    return
  }
  func.func @transform_0(%arg0: i32) -> (i32, i32, i32) {
    %c0_i32 = arith.constant 0 : i32
    %c0_i32_0 = arith.constant 0 : i32
    %c0_i32_1 = arith.constant 0 : i32
    return %arg0, %c0_i32, %c0_i32_0 : i32, i32, i32
  }
  func.func @transform_1(%arg0: i32) -> (i32, i32) {
    %c0_i32 = arith.constant 0 : i32
    %c0_i32_0 = arith.constant 0 : i32
    %c0_i32_1 = arith.constant 0 : i32
    return %c0_i32, %c0_i32_0 : i32, i32
  }
  func.func @transform_2(%arg0: i32) -> (i32, i32) {
    %c0_i32 = arith.constant 0 : i32
    %c0_i32_0 = arith.constant 0 : i32
    %c0_i32_1 = arith.constant 0 : i32
    return %c0_i32, %c0_i32_0 : i32, i32
  }
  func.func @transform_3(%arg0: i32) -> (i32, i32) {
    %c0_i32 = arith.constant 0 : i32
    %c0_i32_0 = arith.constant 0 : i32
    %c0_i32_1 = arith.constant 0 : i32
    return %c0_i32, %c0_i32_0 : i32, i32
  }
  func.func @transform_4(%arg0: i32) -> (i32, i32) {
    %c0_i32 = arith.constant 0 : i32
    %c0_i32_0 = arith.constant 0 : i32
    %c0_i32_1 = arith.constant 0 : i32
    return %c0_i32, %c0_i32_0 : i32, i32
  }
  func.func @transform_5(%arg0: i32) -> (i32, i32, i32) {
    %c0_i32 = arith.constant 0 : i32
    %c0_i32_0 = arith.constant 0 : i32
    %c0_i32_1 = arith.constant 0 : i32
    return %arg0, %c0_i32, %c0_i32_0 : i32, i32, i32
  }
}

module attributes {stable_mosaic.version = 11 : i64} {
  func.func @_rnn_chunk_kernel(%arg0: i32, %arg1: memref<8x8x256xf32, #tpu.memory_space<vmem>>, %arg2: memref<256x128xf32, #tpu.memory_space<vmem>>, %arg3: memref<128x128xf32, #tpu.memory_space<vmem>>, %arg4: memref<1x128xf32, #tpu.memory_space<vmem>>, %arg5: memref<8x128xf32, #tpu.memory_space<vmem>>, %arg6: memref<8x8x128xf32, #tpu.memory_space<vmem>>, %arg7: memref<8x128xf32, #tpu.memory_space<vmem>>, %arg8: memref<8x8x128xf32, #tpu.memory_space<vmem>>) attributes {dimension_semantics = [#tpu.dimension_semantics<arbitrary>], iteration_bounds = array<i64: 1>, scalar_prefetch = 0 : i64, scratch_operands = 2 : i64, tpu.core_type = #tpu.core_type<tc>, window_params = [{transform_indices = @transform_0, window_bounds = array<i64: 8, 8, 256>}, {pipeline_mode = #tpu.pipeline_mode<synchronous>, transform_indices = @transform_1, window_bounds = array<i64: 256, 128>}, {pipeline_mode = #tpu.pipeline_mode<synchronous>, transform_indices = @transform_2, window_bounds = array<i64: 128, 128>}, {pipeline_mode = #tpu.pipeline_mode<synchronous>, transform_indices = @transform_3, window_bounds = array<i64: 1, 128>}, {pipeline_mode = #tpu.pipeline_mode<synchronous>, transform_indices = @transform_4, window_bounds = array<i64: 8, 128>}, {transform_indices = @transform_5, window_bounds = array<i64: 8, 8, 128>}]} {
    %c0_i32 = arith.constant 0 : i32
    %0 = arith.cmpi eq, %arg0, %c0_i32 : i32
    %1 = arith.extui %0 : i1 to i32
    %c0_i32_0 = arith.constant 0 : i32
    %2 = arith.cmpi ne, %1, %c0_i32_0 : i32
    scf.if %2 {
      %c0_65 = arith.constant 0 : index
      %c0_66 = arith.constant 0 : index
      %103 = vector.load %arg5[%c0_65, %c0_66] : memref<8x128xf32, #tpu.memory_space<vmem>>, vector<8x128xf32>
      %c0_67 = arith.constant 0 : index
      %c0_68 = arith.constant 0 : index
      %104 = vector.load %arg7[%c0_67, %c0_68] : memref<8x128xf32, #tpu.memory_space<vmem>>, vector<8x128xf32>
      tpu.vector_store %arg7[%c0_67, %c0_68], %103 {strides = array<i32>} : memref<8x128xf32, #tpu.memory_space<vmem>>, vector<8x128xf32>,
    } else {
    }
    %c0 = arith.constant 0 : index
    %c0_1 = arith.constant 0 : index
    %c0_2 = arith.constant 0 : index
    %3 = vector.load %arg1[%c0, %c0_1, %c0_2] : memref<8x8x256xf32, #tpu.memory_space<vmem>>, vector<8x8x256xf32>
    %4 = vector.shape_cast %3 : vector<8x8x256xf32> to vector<64x256xf32>
    %c0_3 = arith.constant 0 : index
    %c0_4 = arith.constant 0 : index
    %5 = vector.load %arg2[%c0_3, %c0_4] : memref<256x128xf32, #tpu.memory_space<vmem>>, vector<256x128xf32>
    %cst = arith.constant dense<0.000000e+00> : vector<64x128xf32>
    %6 = tpu.matmul %4, %5, %cst {dimension_numbers = #tpu.dot_dimension_numbers<[1], [0], [0], [1], [0, 0, 1, 1], [], []>} : vector<64x256xf32>, vector<256x128xf32>, vector<64x128xf32> -> vector<64x128xf32>
    %c0_5 = arith.constant 0 : index
    %c0_6 = arith.constant 0 : index
    %7 = vector.load %arg4[%c0_5, %c0_6] : memref<1x128xf32, #tpu.memory_space<vmem>>, vector<1x128xf32>
    %8 = vector.broadcast %7 : vector<1x128xf32> to vector<64x128xf32>
    %9 = arith.addf %6, %8 : vector<64x128xf32>
    %10 = vector.shape_cast %9 : vector<64x128xf32> to vector<8x8x128xf32>
    %c0_7 = arith.constant 0 : index
    %c0_8 = arith.constant 0 : index
    %c0_9 = arith.constant 0 : index
    %11 = vector.load %arg8[%c0_7, %c0_8, %c0_9] : memref<8x8x128xf32, #tpu.memory_space<vmem>>, vector<8x8x128xf32>
    tpu.vector_store %arg8[%c0_7, %c0_8, %c0_9], %10 {strides = array<i32>} : memref<8x8x128xf32, #tpu.memory_space<vmem>>, vector<8x8x128xf32>,
    %c0_10 = arith.constant 0 : index
    %c0_11 = arith.constant 0 : index
    %12 = vector.load %arg3[%c0_10, %c0_11] : memref<128x128xf32, #tpu.memory_space<vmem>>, vector<128x128xf32>
    %c0_12 = arith.constant 0 : index
    %c0_13 = arith.constant 0 : index
    %13 = vector.load %arg7[%c0_12, %c0_13] : memref<8x128xf32, #tpu.memory_space<vmem>>, vector<8x128xf32>
    %c0_i32_14 = arith.constant 0 : i32
    %c7_i32 = arith.constant 7 : i32
    %14 = arith.subi %c7_i32, %c0_i32_14 : i32
    %15 = arith.index_cast %14 : i32 to index
    %c0_15 = arith.constant 0 : index
    %c0_16 = arith.constant 0 : index
    %16 = vector.load %arg8[%15, %c0_15, %c0_16] : memref<8x8x128xf32, #tpu.memory_space<vmem>>, vector<1x8x128xf32>
    %17 = vector.shape_cast %16 : vector<1x8x128xf32> to vector<8x128xf32>
    %cst_17 = arith.constant dense<0.000000e+00> : vector<8x128xf32>
    %18 = tpu.matmul %13, %12, %cst_17 {dimension_numbers = #tpu.dot_dimension_numbers<[1], [0], [0], [1], [0, 0, 1, 1], [], []>} : vector<8x128xf32>, vector<128x128xf32>, vector<8x128xf32> -> vector<8x128xf32>
    %19 = arith.addf %17, %18 : vector<8x128xf32>
    %20 = math.tanh %19 : vector<8x128xf32>
    %21 = arith.index_cast %14 : i32 to index
    %c0_18 = arith.constant 0 : index
    %c0_19 = arith.constant 0 : index
    %22 = vector.load %arg6[%21, %c0_18, %c0_19] : memref<8x8x128xf32, #tpu.memory_space<vmem>>, vector<1x8x128xf32>
    %23 = vector.shape_cast %22 : vector<1x8x128xf32> to vector<8x128xf32>
    %24 = vector.shape_cast %20 : vector<8x128xf32> to vector<1x8x128xf32>
    tpu.vector_store %arg6[%21, %c0_18, %c0_19], %24 {strides = array<i32>} : memref<8x8x128xf32, #tpu.memory_space<vmem>>, vector<1x8x128xf32>,
    %c1_i32 = arith.constant 1 : i32
    %c7_i32_20 = arith.constant 7 : i32
    %25 = arith.subi %c7_i32_20, %c1_i32 : i32
    %26 = arith.index_cast %25 : i32 to index
    %c0_21 = arith.constant 0 : index
    %c0_22 = arith.constant 0 : index
    %27 = vector.load %arg8[%26, %c0_21, %c0_22] : memref<8x8x128xf32, #tpu.memory_space<vmem>>, vector<1x8x128xf32>
    %28 = vector.shape_cast %27 : vector<1x8x128xf32> to vector<8x128xf32>
    %cst_23 = arith.constant dense<0.000000e+00> : vector<8x128xf32>
    %29 = tpu.matmul %20, %12, %cst_23 {dimension_numbers = #tpu.dot_dimension_numbers<[1], [0], [0], [1], [0, 0, 1, 1], [], []>} : vector<8x128xf32>, vector<128x128xf32>, vector<8x128xf32> -> vector<8x128xf32>
    %30 = arith.addf %28, %29 : vector<8x128xf32>
    %31 = math.tanh %30 : vector<8x128xf32>
    %32 = arith.index_cast %25 : i32 to index
    %c0_24 = arith.constant 0 : index
    %c0_25 = arith.constant 0 : index
    %33 = vector.load %arg6[%32, %c0_24, %c0_25] : memref<8x8x128xf32, #tpu.memory_space<vmem>>, vector<1x8x128xf32>
    %34 = vector.shape_cast %33 : vector<1x8x128xf32> to vector<8x128xf32>
    %35 = vector.shape_cast %31 : vector<8x128xf32> to vector<1x8x128xf32>
    tpu.vector_store %arg6[%32, %c0_24, %c0_25], %35 {strides = array<i32>} : memref<8x8x128xf32, #tpu.memory_space<vmem>>, vector<1x8x128xf32>,
    %c2_i32 = arith.constant 2 : i32
    %c7_i32_26 = arith.constant 7 : i32
    %36 = arith.subi %c7_i32_26, %c2_i32 : i32
    %37 = arith.index_cast %36 : i32 to index
    %c0_27 = arith.constant 0 : index
    %c0_28 = arith.constant 0 : index
    %38 = vector.load %arg8[%37, %c0_27, %c0_28] : memref<8x8x128xf32, #tpu.memory_space<vmem>>, vector<1x8x128xf32>
    %39 = vector.shape_cast %38 : vector<1x8x128xf32> to vector<8x128xf32>
    %cst_29 = arith.constant dense<0.000000e+00> : vector<8x128xf32>
    %40 = tpu.matmul %31, %12, %cst_29 {dimension_numbers = #tpu.dot_dimension_numbers<[1], [0], [0], [1], [0, 0, 1, 1], [], []>} : vector<8x128xf32>, vector<128x128xf32>, vector<8x128xf32> -> vector<8x128xf32>
    %41 = arith.addf %39, %40 : vector<8x128xf32>
    %42 = math.tanh %41 : vector<8x128xf32>
    %43 = arith.index_cast %36 : i32 to index
    %c0_30 = arith.constant 0 : index
    %c0_31 = arith.constant 0 : index
    %44 = vector.load %arg6[%43, %c0_30, %c0_31] : memref<8x8x128xf32, #tpu.memory_space<vmem>>, vector<1x8x128xf32>
    %45 = vector.shape_cast %44 : vector<1x8x128xf32> to vector<8x128xf32>
    %46 = vector.shape_cast %42 : vector<8x128xf32> to vector<1x8x128xf32>
    tpu.vector_store %arg6[%43, %c0_30, %c0_31], %46 {strides = array<i32>} : memref<8x8x128xf32, #tpu.memory_space<vmem>>, vector<1x8x128xf32>,
    %c3_i32 = arith.constant 3 : i32
    %c7_i32_32 = arith.constant 7 : i32
    %47 = arith.subi %c7_i32_32, %c3_i32 : i32
    %48 = arith.index_cast %47 : i32 to index
    %c0_33 = arith.constant 0 : index
    %c0_34 = arith.constant 0 : index
    %49 = vector.load %arg8[%48, %c0_33, %c0_34] : memref<8x8x128xf32, #tpu.memory_space<vmem>>, vector<1x8x128xf32>
    %50 = vector.shape_cast %49 : vector<1x8x128xf32> to vector<8x128xf32>
    %cst_35 = arith.constant dense<0.000000e+00> : vector<8x128xf32>
    %51 = tpu.matmul %42, %12, %cst_35 {dimension_numbers = #tpu.dot_dimension_numbers<[1], [0], [0], [1], [0, 0, 1, 1], [], []>} : vector<8x128xf32>, vector<128x128xf32>, vector<8x128xf32> -> vector<8x128xf32>
    %52 = arith.addf %50, %51 : vector<8x128xf32>
    %53 = math.tanh %52 : vector<8x128xf32>
    %54 = arith.index_cast %47 : i32 to index
    %c0_36 = arith.constant 0 : index
    %c0_37 = arith.constant 0 : index
    %55 = vector.load %arg6[%54, %c0_36, %c0_37] : memref<8x8x128xf32, #tpu.memory_space<vmem>>, vector<1x8x128xf32>
    %56 = vector.shape_cast %55 : vector<1x8x128xf32> to vector<8x128xf32>
    %57 = vector.shape_cast %53 : vector<8x128xf32> to vector<1x8x128xf32>
    tpu.vector_store %arg6[%54, %c0_36, %c0_37], %57 {strides = array<i32>} : memref<8x8x128xf32, #tpu.memory_space<vmem>>, vector<1x8x128xf32>,
    %c4_i32 = arith.constant 4 : i32
    %c7_i32_38 = arith.constant 7 : i32
    %58 = arith.subi %c7_i32_38, %c4_i32 : i32
    %59 = arith.index_cast %58 : i32 to index
    %c0_39 = arith.constant 0 : index
    %c0_40 = arith.constant 0 : index
    %60 = vector.load %arg8[%59, %c0_39, %c0_40] : memref<8x8x128xf32, #tpu.memory_space<vmem>>, vector<1x8x128xf32>
    %61 = vector.shape_cast %60 : vector<1x8x128xf32> to vector<8x128xf32>
    %cst_41 = arith.constant dense<0.000000e+00> : vector<8x128xf32>
    %62 = tpu.matmul %53, %12, %cst_41 {dimension_numbers = #tpu.dot_dimension_numbers<[1], [0], [0], [1], [0, 0, 1, 1], [], []>} : vector<8x128xf32>, vector<128x128xf32>, vector<8x128xf32> -> vector<8x128xf32>
    %63 = arith.addf %61, %62 : vector<8x128xf32>
    %64 = math.tanh %63 : vector<8x128xf32>
    %65 = arith.index_cast %58 : i32 to index
    %c0_42 = arith.constant 0 : index
    %c0_43 = arith.constant 0 : index
    %66 = vector.load %arg6[%65, %c0_42, %c0_43] : memref<8x8x128xf32, #tpu.memory_space<vmem>>, vector<1x8x128xf32>
    %67 = vector.shape_cast %66 : vector<1x8x128xf32> to vector<8x128xf32>
    %68 = vector.shape_cast %64 : vector<8x128xf32> to vector<1x8x128xf32>
    tpu.vector_store %arg6[%65, %c0_42, %c0_43], %68 {strides = array<i32>} : memref<8x8x128xf32, #tpu.memory_space<vmem>>, vector<1x8x128xf32>,
    %c5_i32 = arith.constant 5 : i32
    %c7_i32_44 = arith.constant 7 : i32
    %69 = arith.subi %c7_i32_44, %c5_i32 : i32
    %70 = arith.index_cast %69 : i32 to index
    %c0_45 = arith.constant 0 : index
    %c0_46 = arith.constant 0 : index
    %71 = vector.load %arg8[%70, %c0_45, %c0_46] : memref<8x8x128xf32, #tpu.memory_space<vmem>>, vector<1x8x128xf32>
    %72 = vector.shape_cast %71 : vector<1x8x128xf32> to vector<8x128xf32>
    %cst_47 = arith.constant dense<0.000000e+00> : vector<8x128xf32>
    %73 = tpu.matmul %64, %12, %cst_47 {dimension_numbers = #tpu.dot_dimension_numbers<[1], [0], [0], [1], [0, 0, 1, 1], [], []>} : vector<8x128xf32>, vector<128x128xf32>, vector<8x128xf32> -> vector<8x128xf32>
    %74 = arith.addf %72, %73 : vector<8x128xf32>
    %75 = math.tanh %74 : vector<8x128xf32>
    %76 = arith.index_cast %69 : i32 to index
    %c0_48 = arith.constant 0 : index
    %c0_49 = arith.constant 0 : index
    %77 = vector.load %arg6[%76, %c0_48, %c0_49] : memref<8x8x128xf32, #tpu.memory_space<vmem>>, vector<1x8x128xf32>
    %78 = vector.shape_cast %77 : vector<1x8x128xf32> to vector<8x128xf32>
    %79 = vector.shape_cast %75 : vector<8x128xf32> to vector<1x8x128xf32>
    tpu.vector_store %arg6[%76, %c0_48, %c0_49], %79 {strides = array<i32>} : memref<8x8x128xf32, #tpu.memory_space<vmem>>, vector<1x8x128xf32>,
    %c6_i32 = arith.constant 6 : i32
    %c7_i32_50 = arith.constant 7 : i32
    %80 = arith.subi %c7_i32_50, %c6_i32 : i32
    %81 = arith.index_cast %80 : i32 to index
    %c0_51 = arith.constant 0 : index
    %c0_52 = arith.constant 0 : index
    %82 = vector.load %arg8[%81, %c0_51, %c0_52] : memref<8x8x128xf32, #tpu.memory_space<vmem>>, vector<1x8x128xf32>
    %83 = vector.shape_cast %82 : vector<1x8x128xf32> to vector<8x128xf32>
    %cst_53 = arith.constant dense<0.000000e+00> : vector<8x128xf32>
    %84 = tpu.matmul %75, %12, %cst_53 {dimension_numbers = #tpu.dot_dimension_numbers<[1], [0], [0], [1], [0, 0, 1, 1], [], []>} : vector<8x128xf32>, vector<128x128xf32>, vector<8x128xf32> -> vector<8x128xf32>
    %85 = arith.addf %83, %84 : vector<8x128xf32>
    %86 = math.tanh %85 : vector<8x128xf32>
    %87 = arith.index_cast %80 : i32 to index
    %c0_54 = arith.constant 0 : index
    %c0_55 = arith.constant 0 : index
    %88 = vector.load %arg6[%87, %c0_54, %c0_55] : memref<8x8x128xf32, #tpu.memory_space<vmem>>, vector<1x8x128xf32>
    %89 = vector.shape_cast %88 : vector<1x8x128xf32> to vector<8x128xf32>
    %90 = vector.shape_cast %86 : vector<8x128xf32> to vector<1x8x128xf32>
    tpu.vector_store %arg6[%87, %c0_54, %c0_55], %90 {strides = array<i32>} : memref<8x8x128xf32, #tpu.memory_space<vmem>>, vector<1x8x128xf32>,
    %c7_i32_56 = arith.constant 7 : i32
    %c7_i32_57 = arith.constant 7 : i32
    %91 = arith.subi %c7_i32_57, %c7_i32_56 : i32
    %92 = arith.index_cast %91 : i32 to index
    %c0_58 = arith.constant 0 : index
    %c0_59 = arith.constant 0 : index
    %93 = vector.load %arg8[%92, %c0_58, %c0_59] : memref<8x8x128xf32, #tpu.memory_space<vmem>>, vector<1x8x128xf32>
    %94 = vector.shape_cast %93 : vector<1x8x128xf32> to vector<8x128xf32>
    %cst_60 = arith.constant dense<0.000000e+00> : vector<8x128xf32>
    %95 = tpu.matmul %86, %12, %cst_60 {dimension_numbers = #tpu.dot_dimension_numbers<[1], [0], [0], [1], [0, 0, 1, 1], [], []>} : vector<8x128xf32>, vector<128x128xf32>, vector<8x128xf32> -> vector<8x128xf32>
    %96 = arith.addf %94, %95 : vector<8x128xf32>
    %97 = math.tanh %96 : vector<8x128xf32>
    %98 = arith.index_cast %91 : i32 to index
    %c0_61 = arith.constant 0 : index
    %c0_62 = arith.constant 0 : index
    %99 = vector.load %arg6[%98, %c0_61, %c0_62] : memref<8x8x128xf32, #tpu.memory_space<vmem>>, vector<1x8x128xf32>
    %100 = vector.shape_cast %99 : vector<1x8x128xf32> to vector<8x128xf32>
    %101 = vector.shape_cast %97 : vector<8x128xf32> to vector<1x8x128xf32>
    tpu.vector_store %arg6[%98, %c0_61, %c0_62], %101 {strides = array<i32>} : memref<8x8x128xf32, #tpu.memory_space<vmem>>, vector<1x8x128xf32>,
    %c8_i32 = arith.constant 8 : i32
    %c0_63 = arith.constant 0 : index
    %c0_64 = arith.constant 0 : index
    %102 = vector.load %arg7[%c0_63, %c0_64] : memref<8x128xf32, #tpu.memory_space<vmem>>, vector<8x128xf32>
    tpu.vector_store %arg7[%c0_63, %c0_64], %97 {strides = array<i32>} : memref<8x128xf32, #tpu.memory_space<vmem>>, vector<8x128xf32>,
    return
  }
  func.func @transform_0(%arg0: i32) -> (i32, i32, i32) {
    %c0_i32 = arith.constant 0 : i32
    %0 = arith.subi %c0_i32, %arg0 : i32
    %c0_i32_0 = arith.constant 0 : i32
    %c0_i32_1 = arith.constant 0 : i32
    %c0_i32_2 = arith.constant 0 : i32
    return %0, %c0_i32_0, %c0_i32_1 : i32, i32, i32
  }
  func.func @transform_1(%arg0: i32) -> (i32, i32) {
    %c0_i32 = arith.constant 0 : i32
    %c0_i32_0 = arith.constant 0 : i32
    %c0_i32_1 = arith.constant 0 : i32
    return %c0_i32, %c0_i32_0 : i32, i32
  }
  func.func @transform_2(%arg0: i32) -> (i32, i32) {
    %c0_i32 = arith.constant 0 : i32
    %c0_i32_0 = arith.constant 0 : i32
    %c0_i32_1 = arith.constant 0 : i32
    return %c0_i32, %c0_i32_0 : i32, i32
  }
  func.func @transform_3(%arg0: i32) -> (i32, i32) {
    %c0_i32 = arith.constant 0 : i32
    %c0_i32_0 = arith.constant 0 : i32
    %c0_i32_1 = arith.constant 0 : i32
    return %c0_i32, %c0_i32_0 : i32, i32
  }
  func.func @transform_4(%arg0: i32) -> (i32, i32) {
    %c0_i32 = arith.constant 0 : i32
    %c0_i32_0 = arith.constant 0 : i32
    %c0_i32_1 = arith.constant 0 : i32
    return %c0_i32, %c0_i32_0 : i32, i32
  }
  func.func @transform_5(%arg0: i32) -> (i32, i32, i32) {
    %c0_i32 = arith.constant 0 : i32
    %0 = arith.subi %c0_i32, %arg0 : i32
    %c0_i32_0 = arith.constant 0 : i32
    %c0_i32_1 = arith.constant 0 : i32
    %c0_i32_2 = arith.constant 0 : i32
    return %0, %c0_i32_0, %c0_i32_1 : i32, i32, i32
  }
}

</mosaic_0001>

<bundles_post_ra>
// kernel: _rnn_forward_impl.5
= control target key start
LH: loop header
LB: loop body
LE: loop exit
PB: predicated region body
PF: predicated region fallthrough
CT: control target
= control target key end

     0   :  { %v1372_v2 = vmov 0.0   ;;  %vm1373_vm0 = vmmov 0   ;;  %s1876_s1 = inlined_call_operand.vmem [shape: f32[128,128], index: 1, kind: input, shape index: {}]   ;;  %s1877_s2 = inlined_call_operand.vmem [shape: f32[128,128], index: 2, kind: input, shape index: {}]   ;;  %s1878_s0 = inlined_call_operand.vmem [shape: f32[8,8,128], index: 0, kind: input, shape index: {}]   ;;  %s1879_s4 = inlined_call_operand.vmem [shape: f32[8,128], index: 4, kind: input, shape index: {}]   ;;  %s1880_s3 = inlined_call_operand.vmem [shape: f32[1,128], index: 3, kind: input, shape index: {}]   ;;  %s1881_s5 = inlined_call_operand.vmem [shape: f32[8,8,128], index: 5, kind: output, shape index: {}]  }
   0x1   :  { %v85_v0 = vld [vmem:[%s1876_s1 + $0x78] sm:$0xff]  ;;  %v84_v1 = vld [vmem:[%s1876_s1 + $0x70] sm:$0xff]  ;;  %1074 = vmatprep.subr.mxu1 %v1372_v2  ;;  %1106 = vmatprep.mubr.msk.f32.mxu1 %vm1373_vm0, %v1372_v2  ;;  %v83_v3 = vld [vmem:[%s1876_s1 + $0x68] sm:$0xff] }
   0x2   :  { %1030 = vmatprep.subr.mxu0 %v85_v0  ;;  %v1419_v4 = vld [vmem:[%s1877_s2 + $0x78] sm:$0xff]  ;;  %v1425_v5 = vld [vmem:[%s1877_s2 + $0x70] sm:$0xff]  ;;  %v82_v6 = vld [vmem:[%s1876_s1 + $0x60] sm:$0xff] }
   0x3   :  { %1031 = vmatpush3.msra.mxu0 %v85_v0  ;;  %1075 = vmatpush3.msra.mxu1 %v1419_v4  ;;  %v1434_v7 = vld [vmem:[%s1877_s2 + $0x68] sm:$0xff]  ;;  %v81_v8 = vld [vmem:[%s1876_s1 + $0x58] sm:$0xff]  ;;  %v1444_v9 = vld [vmem:[%s1877_s2 + $0x60] sm:$0xff] }
   0x4   :  { %1032 = vmatprep.subr.mxu0 %v84_v1  ;;  %1076 = vmatprep.subr.mxu1 %v1372_v2  ;;  %v80_v10 = vld [vmem:[%s1876_s1 + $0x50] sm:$0xff]  ;;  %v1454_v11 = vld [vmem:[%s1877_s2 + $0x58] sm:$0xff]  ;;  %v79_v12 = vld [vmem:[%s1876_s1 + $0x48] sm:$0xff] }
   0x5   :  { %1033 = vmatpush3.msra.mxu0 %v84_v1  ;;  %1077 = vmatpush3.msra.mxu1 %v1425_v5  ;;  %v1464_v13 = vld [vmem:[%s1877_s2 + $0x50] sm:$0xff]  ;;  %v78_v14 = vld [vmem:[%s1876_s1 + $0x40] sm:$0xff]  ;;  %v1474_v15 = vld [vmem:[%s1877_s2 + $0x48] sm:$0xff] }
   0x6   :  { %1034 = vmatprep.subr.mxu0 %v83_v3  ;;  %1078 = vmatprep.subr.mxu1 %v1372_v2  ;;  %v77_v16 = vld [vmem:[%s1876_s1 + $0x38] sm:$0xff]  ;;  %v1484_v17 = vld [vmem:[%s1877_s2 + $0x40] sm:$0xff]  ;;  %v76_v18 = vld [vmem:[%s1876_s1 + $0x30] sm:$0xff] }
   0x7   :  { %1035 = vmatpush3.msra.mxu0 %v83_v3  ;;  %1079 = vmatpush3.msra.mxu1 %v1434_v7  ;;  %v1494_v19 = vld [vmem:[%s1877_s2 + $0x38] sm:$0xff]  ;;  %v75_v20 = vld [vmem:[%s1876_s1 + $0x28] sm:$0xff]  ;;  %v62_v21 = vld [vmem:[%s1878_s0] sm:$0xff] }
   0x8   :  { %1036 = vmatprep.subr.mxu0 %v82_v6  ;;  %1080 = vmatprep.subr.mxu1 %v1372_v2  ;;  %v1508_v22 = vld [vmem:[%s1877_s2 + $0x30] sm:$0xff]  ;;  %v74_v23 = vld [vmem:[%s1876_s1 + $0x20] sm:$0xff]  ;;  %v1517_v24 = vld [vmem:[%s1877_s2 + $0x28] sm:$0xff] }
   0x9   :  { %1037 = vmatpush3.msra.mxu0 %v82_v6  ;;  %1081 = vmatpush3.msra.mxu1 %v1444_v9  ;;  %v73_v25 = vld [vmem:[%s1876_s1 + $0x18] sm:$0xff]  ;;  %v1527_v26 = vld [vmem:[%s1877_s2 + $0x20] sm:$0xff]  ;;  %v72_v27 = vld [vmem:[%s1876_s1 + $0x10] sm:$0xff] }
   0xa   :  { %1038 = vmatprep.subr.mxu0 %v81_v8  ;;  %1082 = vmatprep.subr.mxu1 %v1372_v2  ;;  %v1537_v28 = vld [vmem:[%s1877_s2 + $0x18] sm:$0xff]  ;;  %v71_v29 = vld [vmem:[%s1876_s1 + $0x8] sm:$0xff]  ;;  %v1547_v30 = vld [vmem:[%s1877_s2 + $0x10] sm:$0xff] }
   0xb   :  { %1039 = vmatpush3.msra.mxu0 %v81_v8  ;;  %1083 = vmatpush3.msra.mxu1 %v1454_v11  ;;  %v70_v31 = vld [vmem:[%s1876_s1] sm:$0xff]  ;;  %v1557_v32 = vld [vmem:[%s1877_s2 + $0x8] sm:$0xff]  ;;  %v64_v34 = vld [vmem:[%s1878_s0 + $0x10] sm:$0xff] }
   0xc   :  { %1040 = vmatprep.subr.mxu0 %v80_v10  ;;  %1084 = vmatprep.subr.mxu1 %v1372_v2  ;;  %v63_v33 = vld [vmem:[%s1878_s0 + $0x8] sm:$0xff]  ;;  %v1570_v35 = vld [vmem:[%s1877_s2] sm:$0xff]  ;;  %v65_v37 = vld [vmem:[%s1878_s0 + $0x18] sm:$0xff] }
   0xd   :  { %1041 = vmatpush3.msra.mxu0 %v80_v10  ;;  %1085 = vmatpush3.msra.mxu1 %v1464_v13  ;;  %v60_v36 = vld [vmem:[%s1879_s4] sm:$0xff]  ;;  %v67_v39 = vld [vmem:[%s1878_s0 + $0x28] sm:$0xff]  ;;  %v68_v40 = vld [vmem:[%s1878_s0 + $0x30] sm:$0xff] }
   0xe   :  { %1042 = vmatprep.subr.mxu0 %v79_v12  ;;  %1086 = vmatprep.subr.mxu1 %v1372_v2  ;;  %v66_v38 = vld [vmem:[%s1878_s0 + $0x20] sm:$0xff]  ;;  %v69_v41 = vld [vmem:[%s1878_s0 + $0x38] sm:$0xff] }
   0xf   :  { %1043 = vmatpush3.msra.mxu0 %v79_v12  ;;  %1087 = vmatpush3.msra.mxu1 %v1474_v15  ;;  %v862_v42 = vld [vmem:[%s1880_s3] ss:$0 sm:$0xff] }
  0x10   :  { %1044 = vmatprep.subr.mxu0 %v78_v14  ;;  %1088 = vmatprep.subr.mxu1 %v1372_v2 }
  0x11   :  { %1045 = vmatpush3.msra.mxu0 %v78_v14  ;;  %1089 = vmatpush3.msra.mxu1 %v1484_v17 }
  0x12   :  { %1046 = vmatprep.subr.mxu0 %v77_v16  ;;  %1090 = vmatprep.subr.mxu1 %v1372_v2 }
  0x13   :  { %1047 = vmatpush3.msra.mxu0 %v77_v16  ;;  %1091 = vmatpush3.msra.mxu1 %v1494_v19 }
  0x14   :  { %1048 = vmatprep.subr.mxu0 %v76_v18  ;;  %1092 = vmatprep.subr.mxu1 %v1372_v2 }
  0x15   :  { %1049 = vmatpush3.msra.mxu0 %v76_v18  ;;  %1062 = vmatprep.mubr.f32.mxu0 %v62_v21 }
  0x16   :  { %1050 = vmatprep.subr.mxu0 %v75_v20  ;;  %1093 = vmatpush3.msra.mxu1 %v1508_v22 }
  0x17   :  { %1051 = vmatpush3.msra.mxu0 %v75_v20  ;;  %1094 = vmatprep.subr.mxu1 %v1372_v2 }
  0x18   :  { %1052 = vmatprep.subr.mxu0 %v74_v23  ;;  %1095 = vmatpush3.msra.mxu1 %v1517_v24 }
  0x19   :  { %1053 = vmatpush3.msra.mxu0 %v74_v23  ;;  %1096 = vmatprep.subr.mxu1 %v1372_v2 }
  0x1a   :  { %1054 = vmatprep.subr.mxu0 %v73_v25  ;;  %1097 = vmatpush3.msra.mxu1 %v1527_v26 }
  0x1b   :  { %1055 = vmatpush3.msra.mxu0 %v73_v25  ;;  %1098 = vmatprep.subr.mxu1 %v1372_v2 }
  0x1c   :  { %1056 = vmatprep.subr.mxu0 %v72_v27  ;;  %1099 = vmatpush3.msra.mxu1 %v1537_v28 }
  0x1d   :  { %1057 = vmatpush3.msra.mxu0 %v72_v27  ;;  %1100 = vmatprep.subr.mxu1 %v1372_v2 }
  0x1e   :  { %1058 = vmatprep.subr.mxu0 %v71_v29  ;;  %1101 = vmatpush3.msra.mxu1 %v1547_v30 }
  0x1f   :  { %1059 = vmatpush3.msra.mxu0 %v71_v29  ;;  %1102 = vmatprep.subr.mxu1 %v1372_v2 }
  0x20   :  { %1060 = vmatprep.subr.mxu0 %v70_v31  ;;  %1103 = vmatpush3.msra.mxu1 %v1557_v32 }
  0x21   :  { %1061 = vmatpush3.msra.mxu0 %v70_v31  ;;  %1104 = vmatprep.subr.mxu1 %v1372_v2 }
  0x22   :  { %1063 = vmatmul.mubr.f32.vlgmr.msra.gmra.mxu0 %v63_v33  ;;  %1105 = vmatpush3.msra.mxu1 %v1570_v35 }
  0x23   :  { %1065 = vmatprep.mubr.f32.mxu0 %v64_v34  ;;  %1107 = vmatmul.mubr.f32.vlgmr.msra.gmra.mxu1 %v60_v36 }
  0x24   :  { %1109 = vmatprep.subr.mxu0 %v1372_v2  ;;  %1144 = vmatprep.subr.mxu1 %v1372_v2 }
  0x25   :  { %1110 = vmatpush3.msra.mxu0 %v1419_v4  ;;  %1145 = vmatpush3.msra.mxu1 %v1419_v4 }
  0x26   :  { %1066 = vmatmul.mubr.f32.gmra.mxu0 %v65_v37  ;;  %1111 = vmatprep.subr.mxu0 %v1372_v2 }
  0x27   :  { %1068 = vmatprep.mubr.f32.mxu0 %v66_v38  ;;  %1112 = vmatpush3.msra.mxu0 %v1425_v5 }
  0x28   :  { %1113 = vmatprep.subr.mxu0 %v1372_v2  ;;  %1146 = vmatprep.subr.mxu1 %v1372_v2 }
  0x29   :  { %1114 = vmatpush3.msra.mxu0 %v1434_v7  ;;  %1147 = vmatpush3.msra.mxu1 %v1425_v5 }
  0x2a   :  { %1069 = vmatmul.mubr.f32.gmra.mxu0 %v67_v39  ;;  %1115 = vmatprep.subr.mxu0 %v1372_v2 }
  0x2b   :  { %1071 = vmatprep.mubr.f32.mxu0 %v68_v40  ;;  %1116 = vmatpush3.msra.mxu0 %v1444_v9 }
  0x2c   :  { %1117 = vmatprep.subr.mxu0 %v1372_v2  ;;  %1148 = vmatprep.subr.mxu1 %v1372_v2 }
  0x2d   :  { %1118 = vmatpush3.msra.mxu0 %v1454_v11  ;;  %1149 = vmatpush3.msra.mxu1 %v1434_v7 }
  0x2e   :  { %1072 = vmatmul.mubr.f32.gmra.mxu0 %v69_v41  ;;  %1119 = vmatprep.subr.mxu0 %v1372_v2 }
  0x2f   :  { %1120 = vmatpush3.msra.mxu0 %v1464_v13  ;;  %1141 = vmatprep.mubr.msk.f32.mxu0 %vm1373_vm0, %v1372_v2 }
  0x30   :  { %1121 = vmatprep.subr.mxu0 %v1372_v2  ;;  %1150 = vmatprep.subr.mxu1 %v1372_v2 }
  0x31   :  { %1122 = vmatpush3.msra.mxu0 %v1474_v15  ;;  %1151 = vmatpush3.msra.mxu1 %v1444_v9 }
  0x32   :  { %1123 = vmatprep.subr.mxu0 %v1372_v2  ;;  %1152 = vmatprep.subr.mxu1 %v1372_v2 }
  0x33   :  { %1124 = vmatpush3.msra.mxu0 %v1484_v17  ;;  %1153 = vmatpush3.msra.mxu1 %v1454_v11 }
  0x34   :  { %1125 = vmatprep.subr.mxu0 %v1372_v2  ;;  %1154 = vmatprep.subr.mxu1 %v1372_v2 }
  0x35   :  { %1126 = vmatpush3.msra.mxu0 %v1494_v19  ;;  %1155 = vmatpush3.msra.mxu1 %v1464_v13 }
  0x36   :  { %1127 = vmatprep.subr.mxu0 %v1372_v2  ;;  %1156 = vmatprep.subr.mxu1 %v1372_v2 }
  0x37   :  { %1128 = vmatpush3.msra.mxu0 %v1508_v22  ;;  %1157 = vmatpush3.msra.mxu1 %v1474_v15 }
  0x38   :  { %1129 = vmatprep.subr.mxu0 %v1372_v2  ;;  %1158 = vmatprep.subr.mxu1 %v1372_v2 }
  0x39   :  { %1130 = vmatpush3.msra.mxu0 %v1517_v24  ;;  %1159 = vmatpush3.msra.mxu1 %v1484_v17 }
  0x3a   :  { %1131 = vmatprep.subr.mxu0 %v1372_v2  ;;  %1160 = vmatprep.subr.mxu1 %v1372_v2 }
  0x3b   :  { %1132 = vmatpush3.msra.mxu0 %v1527_v26  ;;  %1161 = vmatpush3.msra.mxu1 %v1494_v19 }
  0x3c   :  { %1133 = vmatprep.subr.mxu0 %v1372_v2  ;;  %1162 = vmatprep.subr.mxu1 %v1372_v2 }
  0x3d   :  { %1134 = vmatpush3.msra.mxu0 %v1537_v28  ;;  %1163 = vmatpush3.msra.mxu1 %v1508_v22 }
  0x3e   :  { %1135 = vmatprep.subr.mxu0 %v1372_v2  ;;  %1164 = vmatprep.subr.mxu1 %v1372_v2 }
  0x3f   :  { %1136 = vmatpush3.msra.mxu0 %v1547_v30  ;;  %1165 = vmatpush3.msra.mxu1 %v1517_v24 }
  0x40   :  { %1137 = vmatprep.subr.mxu0 %v1372_v2  ;;  %1166 = vmatprep.subr.mxu1 %v1372_v2 }
  0x41   :  { %1138 = vmatpush3.msra.mxu0 %v1557_v32  ;;  %1167 = vmatpush3.msra.mxu1 %v1527_v26 }
  0x42   :  { %1139 = vmatprep.subr.mxu0 %v1372_v2  ;;  %1168 = vmatprep.subr.mxu1 %v1372_v2 }
  0x43   :  { %1140 = vmatpush3.msra.mxu0 %v1570_v35  ;;  %1169 = vmatpush3.msra.mxu1 %v1537_v28 }
  0x44   :  { %1176 = vmatprep.mubr.msk.f32.mxu1 %vm1373_vm0, %v1372_v2  ;;  %1170 = vmatprep.subr.mxu1 %v1372_v2 }
  0x45   :  { %1179 = vmatprep.subr.mxu0 %v1372_v2  ;;  %1171 = vmatpush3.msra.mxu1 %v1547_v30 }
  0x46   :  { %1172 = vmatprep.subr.mxu1 %v1372_v2 }
  0x47   :  { %1173 = vmatpush3.msra.mxu1 %v1557_v32 }
  0x48   :  { %1174 = vmatprep.subr.mxu1 %v1372_v2 }
  0x49   :  { %1175 = vmatpush3.msra.mxu1 %v1570_v35 }
  0x4a   :  { %1214 = vmatprep.subr.mxu1 %v1372_v2 }
  0xe2   :  { %v1064_v43 = vpop.f32.mrf.mxu0 }
  0xe3   :  { %v1666_v44 = vadd.f32 %v1064_v43, %v862_v42  ;;  %v291_v46 = vpop.f32.mrf.mxu1 }
  0xe4   :  { %v159_v45 = vpop.f32.mrf.mxu0 }
  0xe5   :  { %v1668_v47 = vadd.f32 %v862_v42, %v159_v45  ;;  %v1108_v49 = vpop.f32.mrf.mxu1 }
  0xe6   :  { %v1067_v48 = vpop.f32.mrf.mxu0 }
  0xe7   :  { %v1670_v50 = vadd.f32 %v1067_v48, %v862_v42 }
  0xe8   :  { %v169_v51 = vpop.f32.mrf.mxu0 }
  0xe9   :  { %v1672_v52 = vadd.f32 %v862_v42, %v169_v51 }
  0xea   :  { %v1070_v53 = vpop.f32.mrf.mxu0 }
  0xeb   :  { %v1674_v54 = vadd.f32 %v1070_v53, %v862_v42 }
  0xec   :  { %v179_v55 = vpop.f32.mrf.mxu0 }
  0xed   :  { %v1676_v56 = vadd.f32 %v862_v42, %v179_v55 }
  0xee   :  { %v1073_v57 = vpop.f32.mrf.mxu0 }
  0xef   :  { %v195_v58 = vadd.f32 %v1073_v57, %v862_v42 }
  0xf0   :  { %v189_v61 = vpop.f32.mrf.mxu0 }
  0xf1   :  { %v295_v59 = vadd.f32 %v291_v46, %v195_v58  ;;  %v190_v62 = vadd.f32 %v862_v42, %v189_v61 }
  0xf3   :  { %1356 = vtanh.f32 %v295_v59 }
 0x100   :  { %v1357_v60 = vpop.eup %1356 }
 0x101   :  { %863 = vst [vmem:[%s1881_s5 + $0x38] sm:$0xff] %v1357_v60  ;;  %1142 = vmatmul.mubr.f32.vlgmr.msra.gmra.mxu0 %v1357_v60 }
 0x102   :  { %1180 = vmatpush3.msra.mxu0 %v1419_v4  ;;  %1211 = vmatprep.mubr.msk.f32.mxu0 %vm1373_vm0, %v1372_v2 }
 0x103   :  { %1181 = vmatprep.subr.mxu0 %v1372_v2 }
 0x104   :  { %1182 = vmatpush3.msra.mxu0 %v1425_v5 }
 0x105   :  { %1183 = vmatprep.subr.mxu0 %v1372_v2 }
 0x106   :  { %1184 = vmatpush3.msra.mxu0 %v1434_v7 }
 0x107   :  { %1185 = vmatprep.subr.mxu0 %v1372_v2 }
 0x108   :  { %1186 = vmatpush3.msra.mxu0 %v1444_v9 }
 0x109   :  { %1187 = vmatprep.subr.mxu0 %v1372_v2 }
 0x10a   :  { %1188 = vmatpush3.msra.mxu0 %v1454_v11 }
 0x10b   :  { %1189 = vmatprep.subr.mxu0 %v1372_v2 }
 0x10c   :  { %1190 = vmatpush3.msra.mxu0 %v1464_v13 }
 0x10d   :  { %1191 = vmatprep.subr.mxu0 %v1372_v2 }
 0x10e   :  { %1192 = vmatpush3.msra.mxu0 %v1474_v15 }
 0x10f   :  { %1193 = vmatprep.subr.mxu0 %v1372_v2 }
 0x110   :  { %1194 = vmatpush3.msra.mxu0 %v1484_v17 }
 0x111   :  { %1195 = vmatprep.subr.mxu0 %v1372_v2 }
 0x112   :  { %1196 = vmatpush3.msra.mxu0 %v1494_v19 }
 0x113   :  { %1197 = vmatprep.subr.mxu0 %v1372_v2 }
 0x114   :  { %1198 = vmatpush3.msra.mxu0 %v1508_v22 }
 0x115   :  { %1199 = vmatprep.subr.mxu0 %v1372_v2 }
 0x116   :  { %1200 = vmatpush3.msra.mxu0 %v1517_v24 }
 0x117   :  { %1201 = vmatprep.subr.mxu0 %v1372_v2 }
 0x118   :  { %1202 = vmatpush3.msra.mxu0 %v1527_v26 }
 0x119   :  { %1203 = vmatprep.subr.mxu0 %v1372_v2 }
 0x11a   :  { %1204 = vmatpush3.msra.mxu0 %v1537_v28 }
 0x11b   :  { %1205 = vmatprep.subr.mxu0 %v1372_v2 }
 0x11c   :  { %1206 = vmatpush3.msra.mxu0 %v1547_v30 }
 0x11d   :  { %1207 = vmatprep.subr.mxu0 %v1372_v2 }
 0x11e   :  { %1208 = vmatpush3.msra.mxu0 %v1557_v32 }
 0x11f   :  { %1209 = vmatprep.subr.mxu0 %v1372_v2 }
 0x120   :  { %1210 = vmatpush3.msra.mxu0 %v1570_v35 }
 0x121   :  { %1249 = vmatprep.subr.mxu0 %v1372_v2 }
 0x1c1   :  { %v367_v63 = vpop.f32.mrf.mxu0 }
 0x1c2   :  { %v371_v0 = vadd.f32 %v367_v63, %v190_v62 }
 0x1c3   :  { %v1143_v1 = vpop.f32.mrf.mxu0 }
 0x1c4   :  { %1358 = vtanh.f32 %v371_v0 }
 0x1d1   :  { %v1359_v3 = vpop.eup %1358 }
 0x1d2   :  { %864 = vst [vmem:[%s1881_s5 + $0x30] sm:$0xff] %v1359_v3  ;;  %1177 = vmatmul.mubr.f32.vlgmr.msra.gmra.mxu1 %v1359_v3 }
 0x1d3   :  { %1215 = vmatpush3.msra.mxu1 %v1419_v4  ;;  %1246 = vmatprep.mubr.msk.f32.mxu1 %vm1373_vm0, %v1372_v2 }
 0x1d4   :  { %1216 = vmatprep.subr.mxu1 %v1372_v2 }
 0x1d5   :  { %1217 = vmatpush3.msra.mxu1 %v1425_v5 }
 0x1d6   :  { %1218 = vmatprep.subr.mxu1 %v1372_v2 }
 0x1d7   :  { %1219 = vmatpush3.msra.mxu1 %v1434_v7 }
 0x1d8   :  { %1220 = vmatprep.subr.mxu1 %v1372_v2 }
 0x1d9   :  { %1221 = vmatpush3.msra.mxu1 %v1444_v9 }
 0x1da   :  { %1222 = vmatprep.subr.mxu1 %v1372_v2 }
 0x1db   :  { %1223 = vmatpush3.msra.mxu1 %v1454_v11 }
 0x1dc   :  { %1224 = vmatprep.subr.mxu1 %v1372_v2 }
 0x1dd   :  { %1225 = vmatpush3.msra.mxu1 %v1464_v13 }
 0x1de   :  { %1226 = vmatprep.subr.mxu1 %v1372_v2 }
 0x1df   :  { %1227 = vmatpush3.msra.mxu1 %v1474_v15 }
 0x1e0   :  { %1228 = vmatprep.subr.mxu1 %v1372_v2 }
 0x1e1   :  { %1229 = vmatpush3.msra.mxu1 %v1484_v17 }
 0x1e2   :  { %1230 = vmatprep.subr.mxu1 %v1372_v2 }
 0x1e3   :  { %1231 = vmatpush3.msra.mxu1 %v1494_v19 }
 0x1e4   :  { %1232 = vmatprep.subr.mxu1 %v1372_v2 }
 0x1e5   :  { %1233 = vmatpush3.msra.mxu1 %v1508_v22 }
 0x1e6   :  { %1234 = vmatprep.subr.mxu1 %v1372_v2 }
 0x1e7   :  { %1235 = vmatpush3.msra.mxu1 %v1517_v24 }
 0x1e8   :  { %1236 = vmatprep.subr.mxu1 %v1372_v2 }
 0x1e9   :  { %1237 = vmatpush3.msra.mxu1 %v1527_v26 }
 0x1ea   :  { %1238 = vmatprep.subr.mxu1 %v1372_v2 }
 0x1eb   :  { %1239 = vmatpush3.msra.mxu1 %v1537_v28 }
 0x1ec   :  { %1240 = vmatprep.subr.mxu1 %v1372_v2 }
 0x1ed   :  { %1241 = vmatpush3.msra.mxu1 %v1547_v30 }
 0x1ee   :  { %1242 = vmatprep.subr.mxu1 %v1372_v2 }
 0x1ef   :  { %1243 = vmatpush3.msra.mxu1 %v1557_v32 }
 0x1f0   :  { %1244 = vmatprep.subr.mxu1 %v1372_v2 }
 0x1f1   :  { %1245 = vmatpush3.msra.mxu1 %v1570_v35 }
 0x1f2   :  { %1284 = vmatprep.subr.mxu1 %v1372_v2 }
 0x292   :  { %v443_v6 = vpop.f32.mrf.mxu1 }
 0x293   :  { %v447_v8 = vadd.f32 %v443_v6, %v1674_v54 }
 0x294   :  { %v1178_v10 = vpop.f32.mrf.mxu1 }
 0x295   :  { %1360 = vtanh.f32 %v447_v8 }
 0x2a2   :  { %v1361_v12 = vpop.eup %1360 }
 0x2a3   :  { %865 = vst [vmem:[%s1881_s5 + $0x28] sm:$0xff] %v1361_v12  ;;  %1212 = vmatmul.mubr.f32.vlgmr.msra.gmra.mxu0 %v1361_v12 }
 0x2a4   :  { %1250 = vmatpush3.msra.mxu0 %v1419_v4  ;;  %1281 = vmatprep.mubr.msk.f32.mxu0 %vm1373_vm0, %v1372_v2 }
 0x2a5   :  { %1251 = vmatprep.subr.mxu0 %v1372_v2 }
 0x2a6   :  { %1252 = vmatpush3.msra.mxu0 %v1425_v5 }
 0x2a7   :  { %1253 = vmatprep.subr.mxu0 %v1372_v2 }
 0x2a8   :  { %1254 = vmatpush3.msra.mxu0 %v1434_v7 }
 0x2a9   :  { %1255 = vmatprep.subr.mxu0 %v1372_v2 }
 0x2aa   :  { %1256 = vmatpush3.msra.mxu0 %v1444_v9 }
 0x2ab   :  { %1257 = vmatprep.subr.mxu0 %v1372_v2 }
 0x2ac   :  { %1258 = vmatpush3.msra.mxu0 %v1454_v11 }
 0x2ad   :  { %1259 = vmatprep.subr.mxu0 %v1372_v2 }
 0x2ae   :  { %1260 = vmatpush3.msra.mxu0 %v1464_v13 }
 0x2af   :  { %1261 = vmatprep.subr.mxu0 %v1372_v2 }
 0x2b0   :  { %1262 = vmatpush3.msra.mxu0 %v1474_v15 }
 0x2b1   :  { %1263 = vmatprep.subr.mxu0 %v1372_v2 }
 0x2b2   :  { %1264 = vmatpush3.msra.mxu0 %v1484_v17 }
 0x2b3   :  { %1265 = vmatprep.subr.mxu0 %v1372_v2 }
 0x2b4   :  { %1266 = vmatpush3.msra.mxu0 %v1494_v19 }
 0x2b5   :  { %1267 = vmatprep.subr.mxu0 %v1372_v2 }
 0x2b6   :  { %1268 = vmatpush3.msra.mxu0 %v1508_v22 }
 0x2b7   :  { %1269 = vmatprep.subr.mxu0 %v1372_v2 }
 0x2b8   :  { %1270 = vmatpush3.msra.mxu0 %v1517_v24 }
 0x2b9   :  { %1271 = vmatprep.subr.mxu0 %v1372_v2 }
 0x2ba   :  { %1272 = vmatpush3.msra.mxu0 %v1527_v26 }
 0x2bb   :  { %1273 = vmatprep.subr.mxu0 %v1372_v2 }
 0x2bc   :  { %1274 = vmatpush3.msra.mxu0 %v1537_v28 }
 0x2bd   :  { %1275 = vmatprep.subr.mxu0 %v1372_v2 }
 0x2be   :  { %1276 = vmatpush3.msra.mxu0 %v1547_v30 }
 0x2bf   :  { %1277 = vmatprep.subr.mxu0 %v1372_v2 }
 0x2c0   :  { %1278 = vmatpush3.msra.mxu0 %v1557_v32 }
 0x2c1   :  { %1279 = vmatprep.subr.mxu0 %v1372_v2 }
 0x2c2   :  { %1280 = vmatpush3.msra.mxu0 %v1570_v35 }
 0x2c3   :  { %1319 = vmatprep.subr.mxu0 %v1372_v2 }
 0x363   :  { %v519_v14 = vpop.f32.mrf.mxu0 }
 0x364   :  { %v523_v16 = vadd.f32 %v519_v14, %v1676_v56 }
 0x365   :  { %v1213_v18 = vpop.f32.mrf.mxu0 }
 0x366   :  { %1362 = vtanh.f32 %v523_v16 }
 0x373   :  { %v1363_v20 = vpop.eup %1362 }
 0x374   :  { %866 = vst [vmem:[%s1881_s5 + $0x20] sm:$0xff] %v1363_v20  ;;  %1247 = vmatmul.mubr.f32.vlgmr.msra.gmra.mxu1 %v1363_v20 }
 0x375   :  { %1285 = vmatpush3.msra.mxu1 %v1419_v4  ;;  %1316 = vmatprep.mubr.msk.f32.mxu1 %vm1373_vm0, %v1372_v2 }
 0x376   :  { %1286 = vmatprep.subr.mxu1 %v1372_v2 }
 0x377   :  { %1287 = vmatpush3.msra.mxu1 %v1425_v5 }
 0x378   :  { %1288 = vmatprep.subr.mxu1 %v1372_v2 }
 0x379   :  { %1289 = vmatpush3.msra.mxu1 %v1434_v7 }
 0x37a   :  { %1290 = vmatprep.subr.mxu1 %v1372_v2 }
 0x37b   :  { %1291 = vmatpush3.msra.mxu1 %v1444_v9 }
 0x37c   :  { %1292 = vmatprep.subr.mxu1 %v1372_v2 }
 0x37d   :  { %1293 = vmatpush3.msra.mxu1 %v1454_v11 }
 0x37e   :  { %1294 = vmatprep.subr.mxu1 %v1372_v2 }
 0x37f   :  { %1295 = vmatpush3.msra.mxu1 %v1464_v13 }
 0x380   :  { %1296 = vmatprep.subr.mxu1 %v1372_v2 }
 0x381   :  { %1297 = vmatpush3.msra.mxu1 %v1474_v15 }
 0x382   :  { %1298 = vmatprep.subr.mxu1 %v1372_v2 }
 0x383   :  { %1299 = vmatpush3.msra.mxu1 %v1484_v17 }
 0x384   :  { %1300 = vmatprep.subr.mxu1 %v1372_v2 }
 0x385   :  { %1301 = vmatpush3.msra.mxu1 %v1494_v19 }
 0x386   :  { %1302 = vmatprep.subr.mxu1 %v1372_v2 }
 0x387   :  { %1303 = vmatpush3.msra.mxu1 %v1508_v22 }
 0x388   :  { %1304 = vmatprep.subr.mxu1 %v1372_v2 }
 0x389   :  { %1305 = vmatpush3.msra.mxu1 %v1517_v24 }
 0x38a   :  { %1306 = vmatprep.subr.mxu1 %v1372_v2 }
 0x38b   :  { %1307 = vmatpush3.msra.mxu1 %v1527_v26 }
 0x38c   :  { %1308 = vmatprep.subr.mxu1 %v1372_v2 }
 0x38d   :  { %1309 = vmatpush3.msra.mxu1 %v1537_v28 }
 0x38e   :  { %1310 = vmatprep.subr.mxu1 %v1372_v2 }
 0x38f   :  { %1311 = vmatpush3.msra.mxu1 %v1547_v30 }
 0x390   :  { %1312 = vmatprep.subr.mxu1 %v1372_v2 }
 0x391   :  { %1313 = vmatpush3.msra.mxu1 %v1557_v32 }
 0x392   :  { %1314 = vmatprep.subr.mxu1 %v1372_v2 }
 0x393   :  { %1315 = vmatpush3.msra.mxu1 %v1570_v35 }
 0x434   :  { %v595_v21 = vpop.f32.mrf.mxu1 }
 0x435   :  { %v599_v23 = vadd.f32 %v595_v21, %v1670_v50 }
 0x436   :  { %v1248_v25 = vpop.f32.mrf.mxu1 }
 0x437   :  { %1364 = vtanh.f32 %v599_v23 }
 0x444   :  { %v1365_v27 = vpop.eup %1364 }
 0x445   :  { %867 = vst [vmem:[%s1881_s5 + $0x18] sm:$0xff] %v1365_v27  ;;  %1282 = vmatmul.mubr.f32.vlgmr.msra.gmra.mxu0 %v1365_v27 }
 0x446   :  { %1320 = vmatpush3.msra.mxu0 %v1419_v4  ;;  %1351 = vmatprep.mubr.msk.f32.mxu0 %vm1373_vm0, %v1372_v2 }
 0x447   :  { %1321 = vmatprep.subr.mxu0 %v1372_v2 }
 0x448   :  { %1322 = vmatpush3.msra.mxu0 %v1425_v5 }
 0x449   :  { %1323 = vmatprep.subr.mxu0 %v1372_v2 }
 0x44a   :  { %1324 = vmatpush3.msra.mxu0 %v1434_v7 }
 0x44b   :  { %1325 = vmatprep.subr.mxu0 %v1372_v2 }
 0x44c   :  { %1326 = vmatpush3.msra.mxu0 %v1444_v9 }
 0x44d   :  { %1327 = vmatprep.subr.mxu0 %v1372_v2 }
 0x44e   :  { %1328 = vmatpush3.msra.mxu0 %v1454_v11 }
 0x44f   :  { %1329 = vmatprep.subr.mxu0 %v1372_v2 }
 0x450   :  { %1330 = vmatpush3.msra.mxu0 %v1464_v13 }
 0x451   :  { %1331 = vmatprep.subr.mxu0 %v1372_v2 }
 0x452   :  { %1332 = vmatpush3.msra.mxu0 %v1474_v15 }
 0x453   :  { %1333 = vmatprep.subr.mxu0 %v1372_v2 }
 0x454   :  { %1334 = vmatpush3.msra.mxu0 %v1484_v17 }
 0x455   :  { %1335 = vmatprep.subr.mxu0 %v1372_v2 }
 0x456   :  { %1336 = vmatpush3.msra.mxu0 %v1494_v19 }
 0x457   :  { %1337 = vmatprep.subr.mxu0 %v1372_v2 }
 0x458   :  { %1338 = vmatpush3.msra.mxu0 %v1508_v22 }
 0x459   :  { %1339 = vmatprep.subr.mxu0 %v1372_v2 }
 0x45a   :  { %1340 = vmatpush3.msra.mxu0 %v1517_v24 }
 0x45b   :  { %1341 = vmatprep.subr.mxu0 %v1372_v2 }
 0x45c   :  { %1342 = vmatpush3.msra.mxu0 %v1527_v26 }
 0x45d   :  { %1343 = vmatprep.subr.mxu0 %v1372_v2 }
 0x45e   :  { %1344 = vmatpush3.msra.mxu0 %v1537_v28 }
 0x45f   :  { %1345 = vmatprep.subr.mxu0 %v1372_v2 }
 0x460   :  { %1346 = vmatpush3.msra.mxu0 %v1547_v30 }
 0x461   :  { %1347 = vmatprep.subr.mxu0 %v1372_v2 }
 0x462   :  { %1348 = vmatpush3.msra.mxu0 %v1557_v32 }
 0x463   :  { %1349 = vmatprep.subr.mxu0 %v1372_v2 }
 0x464   :  { %1350 = vmatpush3.msra.mxu0 %v1570_v35 }
 0x505   :  { %v671_v4 = vpop.f32.mrf.mxu0 }
 0x506   :  { %v675_v5 = vadd.f32 %v671_v4, %v1672_v52 }
 0x507   :  { %v1283_v7 = vpop.f32.mrf.mxu0 }
 0x508   :  { %1366 = vtanh.f32 %v675_v5 }
 0x515   :  { %v1367_v9 = vpop.eup %1366 }
 0x516   :  { %868 = vst [vmem:[%s1881_s5 + $0x10] sm:$0xff] %v1367_v9  ;;  %1317 = vmatmul.mubr.f32.vlgmr.msra.gmra.mxu1 %v1367_v9 }
 0x5d6   :  { %v747_v11 = vpop.f32.mrf.mxu1 }
 0x5d7   :  { %v751_v13 = vadd.f32 %v747_v11, %v1666_v44 }
 0x5d8   :  { %v1318_v15 = vpop.f32.mrf.mxu1 }
 0x5d9   :  { %1368 = vtanh.f32 %v751_v13 }
 0x5e6   :  { %v1369_v17 = vpop.eup %1368 }
 0x5e7   :  { %869 = vst [vmem:[%s1881_s5 + $0x8] sm:$0xff] %v1369_v17  ;;  %1352 = vmatmul.mubr.f32.vlgmr.msra.gmra.mxu0 %v1369_v17 }
 0x6a7   :  { %v822_v2 = vpop.f32.mrf.mxu0 }
 0x6a8   :  { %v826_v19 = vadd.f32 %v822_v2, %v1668_v47 }
 0x6a9   :  { %v1353_v22 = vpop.f32.mrf.mxu0 }
 0x6aa   :  { %1370 = vtanh.f32 %v826_v19 }
 0x6b7   :  { %v1371_v24 = vpop.eup %1370 }
 0x6b8   :  { %828 = vst [vmem:[%s1881_s5] sm:$0xff] %v1371_v24 }

// kernel: _rnn_forward_impl.4
= control target key start
LH: loop header
LB: loop body
LE: loop exit
PB: predicated region body
PF: predicated region fallthrough
CT: control target
= control target key end

     0   :  { %v1308_v2 = vmov 0.0   ;;  %vm1309_vm0 = vmmov 0   ;;  %s1819_s1 = inlined_call_operand.vmem [shape: f32[128,128], index: 1, kind: input, shape index: {}]   ;;  %s1820_s2 = inlined_call_operand.vmem [shape: f32[128,128], index: 2, kind: input, shape index: {}]   ;;  %s1821_s0 = inlined_call_operand.vmem [shape: f32[8,8,128], index: 0, kind: input, shape index: {}]   ;;  %s1822_s4 = inlined_call_operand.vmem [shape: f32[8,128], index: 4, kind: input, shape index: {}]   ;;  %s1823_s3 = inlined_call_operand.vmem [shape: f32[1,128], index: 3, kind: input, shape index: {}]   ;;  %s1824_s5 = inlined_call_operand.vmem [shape: f32[8,8,128], index: 5, kind: output, shape index: {}]  }
   0x1   :  { %v49_v0 = vld [vmem:[%s1819_s1 + $0x78] sm:$0xff]  ;;  %v48_v1 = vld [vmem:[%s1819_s1 + $0x70] sm:$0xff]  ;;  %1010 = vmatprep.subr.mxu1 %v1308_v2  ;;  %1042 = vmatprep.mubr.msk.f32.mxu1 %vm1309_vm0, %v1308_v2  ;;  %v47_v5 = vld [vmem:[%s1819_s1 + $0x68] sm:$0xff] }
   0x2   :  { %v1350_v3 = vld [vmem:[%s1820_s2 + $0x78] sm:$0xff]  ;;  %966 = vmatprep.subr.mxu0 %v49_v0  ;;  %v1358_v4 = vld [vmem:[%s1820_s2 + $0x70] sm:$0xff]  ;;  %v1367_v6 = vld [vmem:[%s1820_s2 + $0x68] sm:$0xff] }
   0x3   :  { %1011 = vmatpush3.msra.mxu1 %v1350_v3  ;;  %967 = vmatpush3.msra.mxu0 %v49_v0  ;;  %v46_v7 = vld [vmem:[%s1819_s1 + $0x60] sm:$0xff]  ;;  %v45_v9 = vld [vmem:[%s1819_s1 + $0x58] sm:$0xff]  ;;  %v44_v11 = vld [vmem:[%s1819_s1 + $0x50] sm:$0xff] }
   0x4   :  { %1012 = vmatprep.subr.mxu1 %v1308_v2  ;;  %968 = vmatprep.subr.mxu0 %v48_v1  ;;  %v1377_v8 = vld [vmem:[%s1820_s2 + $0x60] sm:$0xff]  ;;  %v1387_v10 = vld [vmem:[%s1820_s2 + $0x58] sm:$0xff]  ;;  %v1397_v12 = vld [vmem:[%s1820_s2 + $0x50] sm:$0xff] }
   0x5   :  { %1013 = vmatpush3.msra.mxu1 %v1358_v4  ;;  %969 = vmatpush3.msra.mxu0 %v48_v1  ;;  %v43_v13 = vld [vmem:[%s1819_s1 + $0x48] sm:$0xff]  ;;  %v42_v15 = vld [vmem:[%s1819_s1 + $0x40] sm:$0xff]  ;;  %v41_v17 = vld [vmem:[%s1819_s1 + $0x38] sm:$0xff] }
   0x6   :  { %1014 = vmatprep.subr.mxu1 %v1308_v2  ;;  %970 = vmatprep.subr.mxu0 %v47_v5  ;;  %v1407_v14 = vld [vmem:[%s1820_s2 + $0x48] sm:$0xff]  ;;  %v1417_v16 = vld [vmem:[%s1820_s2 + $0x40] sm:$0xff]  ;;  %v1427_v18 = vld [vmem:[%s1820_s2 + $0x38] sm:$0xff] }
   0x7   :  { %1015 = vmatpush3.msra.mxu1 %v1367_v6  ;;  %971 = vmatpush3.msra.mxu0 %v47_v5  ;;  %v40_v19 = vld [vmem:[%s1819_s1 + $0x30] sm:$0xff]  ;;  %v39_v21 = vld [vmem:[%s1819_s1 + $0x28] sm:$0xff]  ;;  %v38_v23 = vld [vmem:[%s1819_s1 + $0x20] sm:$0xff] }
   0x8   :  { %1016 = vmatprep.subr.mxu1 %v1308_v2  ;;  %972 = vmatprep.subr.mxu0 %v46_v7  ;;  %v1437_v20 = vld [vmem:[%s1820_s2 + $0x30] sm:$0xff]  ;;  %v1447_v22 = vld [vmem:[%s1820_s2 + $0x28] sm:$0xff]  ;;  %v1457_v24 = vld [vmem:[%s1820_s2 + $0x20] sm:$0xff] }
   0x9   :  { %1017 = vmatpush3.msra.mxu1 %v1377_v8  ;;  %973 = vmatpush3.msra.mxu0 %v46_v7  ;;  %v37_v25 = vld [vmem:[%s1819_s1 + $0x18] sm:$0xff]  ;;  %v36_v27 = vld [vmem:[%s1819_s1 + $0x10] sm:$0xff]  ;;  %v35_v29 = vld [vmem:[%s1819_s1 + $0x8] sm:$0xff] }
   0xa   :  { %1018 = vmatprep.subr.mxu1 %v1308_v2  ;;  %974 = vmatprep.subr.mxu0 %v45_v9  ;;  %v1467_v26 = vld [vmem:[%s1820_s2 + $0x18] sm:$0xff]  ;;  %v1477_v28 = vld [vmem:[%s1820_s2 + $0x10] sm:$0xff]  ;;  %v26_v30 = vld [vmem:[%s1821_s0] sm:$0xff] }
   0xb   :  { %1019 = vmatpush3.msra.mxu1 %v1387_v10  ;;  %975 = vmatpush3.msra.mxu0 %v45_v9  ;;  %v1491_v31 = vld [vmem:[%s1820_s2 + $0x8] sm:$0xff]  ;;  %v34_v32 = vld [vmem:[%s1819_s1] sm:$0xff]  ;;  %v28_v36 = vld [vmem:[%s1821_s0 + $0x10] sm:$0xff] }
   0xc   :  { %1020 = vmatprep.subr.mxu1 %v1308_v2  ;;  %976 = vmatprep.subr.mxu0 %v44_v11  ;;  %v1500_v33 = vld [vmem:[%s1820_s2] sm:$0xff]  ;;  %v27_v34 = vld [vmem:[%s1821_s0 + $0x8] sm:$0xff]  ;;  %v29_v37 = vld [vmem:[%s1821_s0 + $0x18] sm:$0xff] }
   0xd   :  { %1021 = vmatpush3.msra.mxu1 %v1397_v12  ;;  %977 = vmatpush3.msra.mxu0 %v44_v11  ;;  %v24_v35 = vld [vmem:[%s1822_s4] sm:$0xff]  ;;  %v31_v39 = vld [vmem:[%s1821_s0 + $0x28] sm:$0xff]  ;;  %v32_v40 = vld [vmem:[%s1821_s0 + $0x30] sm:$0xff] }
   0xe   :  { %1022 = vmatprep.subr.mxu1 %v1308_v2  ;;  %978 = vmatprep.subr.mxu0 %v43_v13  ;;  %v30_v38 = vld [vmem:[%s1821_s0 + $0x20] sm:$0xff]  ;;  %v33_v41 = vld [vmem:[%s1821_s0 + $0x38] sm:$0xff] }
   0xf   :  { %1023 = vmatpush3.msra.mxu1 %v1407_v14  ;;  %979 = vmatpush3.msra.mxu0 %v43_v13  ;;  %v1602_v44 = vld [vmem:[%s1823_s3] ss:$0 sm:$0xff] }
  0x10   :  { %1024 = vmatprep.subr.mxu1 %v1308_v2  ;;  %980 = vmatprep.subr.mxu0 %v42_v15 }
  0x11   :  { %1025 = vmatpush3.msra.mxu1 %v1417_v16  ;;  %981 = vmatpush3.msra.mxu0 %v42_v15 }
  0x12   :  { %1026 = vmatprep.subr.mxu1 %v1308_v2  ;;  %982 = vmatprep.subr.mxu0 %v41_v17 }
  0x13   :  { %1027 = vmatpush3.msra.mxu1 %v1427_v18  ;;  %983 = vmatpush3.msra.mxu0 %v41_v17 }
  0x14   :  { %1028 = vmatprep.subr.mxu1 %v1308_v2  ;;  %984 = vmatprep.subr.mxu0 %v40_v19 }
  0x15   :  { %1029 = vmatpush3.msra.mxu1 %v1437_v20  ;;  %985 = vmatpush3.msra.mxu0 %v40_v19 }
  0x16   :  { %1030 = vmatprep.subr.mxu1 %v1308_v2  ;;  %986 = vmatprep.subr.mxu0 %v39_v21 }
  0x17   :  { %1031 = vmatpush3.msra.mxu1 %v1447_v22  ;;  %987 = vmatpush3.msra.mxu0 %v39_v21 }
  0x18   :  { %1032 = vmatprep.subr.mxu1 %v1308_v2  ;;  %988 = vmatprep.subr.mxu0 %v38_v23 }
  0x19   :  { %1033 = vmatpush3.msra.mxu1 %v1457_v24  ;;  %989 = vmatpush3.msra.mxu0 %v38_v23 }
  0x1a   :  { %1034 = vmatprep.subr.mxu1 %v1308_v2  ;;  %990 = vmatprep.subr.mxu0 %v37_v25 }
  0x1b   :  { %1035 = vmatpush3.msra.mxu1 %v1467_v26  ;;  %991 = vmatpush3.msra.mxu0 %v37_v25 }
  0x1c   :  { %1036 = vmatprep.subr.mxu1 %v1308_v2  ;;  %992 = vmatprep.subr.mxu0 %v36_v27 }
  0x1d   :  { %1037 = vmatpush3.msra.mxu1 %v1477_v28  ;;  %993 = vmatpush3.msra.mxu0 %v36_v27 }
  0x1e   :  { %1038 = vmatprep.subr.mxu1 %v1308_v2  ;;  %994 = vmatprep.subr.mxu0 %v35_v29 }
  0x1f   :  { %998 = vmatprep.mubr.f32.mxu0 %v26_v30  ;;  %995 = vmatpush3.msra.mxu0 %v35_v29 }
  0x20   :  { %1039 = vmatpush3.msra.mxu1 %v1491_v31  ;;  %996 = vmatprep.subr.mxu0 %v34_v32 }
  0x21   :  { %1040 = vmatprep.subr.mxu1 %v1308_v2  ;;  %997 = vmatpush3.msra.mxu0 %v34_v32 }
  0x22   :  { %1041 = vmatpush3.msra.mxu1 %v1500_v33  ;;  %999 = vmatmul.mubr.f32.vlgmr.msra.gmra.mxu0 %v27_v34 }
  0x23   :  { %1043 = vmatmul.mubr.f32.vlgmr.msra.gmra.mxu1 %v24_v35  ;;  %1045 = vmatprep.subr.mxu0 %v1308_v2 }
  0x24   :  { %1080 = vmatprep.subr.mxu1 %v1308_v2  ;;  %1046 = vmatpush3.msra.mxu0 %v1350_v3 }
  0x25   :  { %1081 = vmatpush3.msra.mxu1 %v1350_v3  ;;  %1047 = vmatprep.subr.mxu0 %v1308_v2 }
  0x26   :  { %1082 = vmatprep.subr.mxu1 %v1308_v2  ;;  %1048 = vmatpush3.msra.mxu0 %v1358_v4 }
  0x27   :  { %1083 = vmatpush3.msra.mxu1 %v1358_v4  ;;  %1049 = vmatprep.subr.mxu0 %v1308_v2 }
  0x28   :  { %1084 = vmatprep.subr.mxu1 %v1308_v2  ;;  %1050 = vmatpush3.msra.mxu0 %v1367_v6 }
  0x29   :  { %1085 = vmatpush3.msra.mxu1 %v1367_v6  ;;  %1051 = vmatprep.subr.mxu0 %v1308_v2 }
  0x2a   :  { %1086 = vmatprep.subr.mxu1 %v1308_v2  ;;  %1052 = vmatpush3.msra.mxu0 %v1377_v8 }
  0x2b   :  { %1087 = vmatpush3.msra.mxu1 %v1377_v8  ;;  %1053 = vmatprep.subr.mxu0 %v1308_v2 }
  0x2c   :  { %1088 = vmatprep.subr.mxu1 %v1308_v2  ;;  %1054 = vmatpush3.msra.mxu0 %v1387_v10 }
  0x2d   :  { %1089 = vmatpush3.msra.mxu1 %v1387_v10  ;;  %1055 = vmatprep.subr.mxu0 %v1308_v2 }
  0x2e   :  { %1090 = vmatprep.subr.mxu1 %v1308_v2  ;;  %1056 = vmatpush3.msra.mxu0 %v1397_v12 }
  0x2f   :  { %1091 = vmatpush3.msra.mxu1 %v1397_v12  ;;  %1057 = vmatprep.subr.mxu0 %v1308_v2 }
  0x30   :  { %1092 = vmatprep.subr.mxu1 %v1308_v2  ;;  %1058 = vmatpush3.msra.mxu0 %v1407_v14 }
  0x31   :  { %1093 = vmatpush3.msra.mxu1 %v1407_v14  ;;  %1059 = vmatprep.subr.mxu0 %v1308_v2 }
  0x32   :  { %1094 = vmatprep.subr.mxu1 %v1308_v2  ;;  %1060 = vmatpush3.msra.mxu0 %v1417_v16 }
  0x33   :  { %1095 = vmatpush3.msra.mxu1 %v1417_v16  ;;  %1061 = vmatprep.subr.mxu0 %v1308_v2 }
  0x34   :  { %1096 = vmatprep.subr.mxu1 %v1308_v2  ;;  %1062 = vmatpush3.msra.mxu0 %v1427_v18 }
  0x35   :  { %1097 = vmatpush3.msra.mxu1 %v1427_v18  ;;  %1063 = vmatprep.subr.mxu0 %v1308_v2 }
  0x36   :  { %1098 = vmatprep.subr.mxu1 %v1308_v2  ;;  %1064 = vmatpush3.msra.mxu0 %v1437_v20 }
  0x37   :  { %1099 = vmatpush3.msra.mxu1 %v1437_v20  ;;  %1065 = vmatprep.subr.mxu0 %v1308_v2 }
  0x38   :  { %1100 = vmatprep.subr.mxu1 %v1308_v2  ;;  %1066 = vmatpush3.msra.mxu0 %v1447_v22 }
  0x39   :  { %1101 = vmatpush3.msra.mxu1 %v1447_v22  ;;  %1067 = vmatprep.subr.mxu0 %v1308_v2 }
  0x3a   :  { %1102 = vmatprep.subr.mxu1 %v1308_v2  ;;  %1068 = vmatpush3.msra.mxu0 %v1457_v24 }
  0x3b   :  { %1103 = vmatpush3.msra.mxu1 %v1457_v24  ;;  %1069 = vmatprep.subr.mxu0 %v1308_v2 }
  0x3c   :  { %1104 = vmatprep.subr.mxu1 %v1308_v2  ;;  %1070 = vmatpush3.msra.mxu0 %v1467_v26 }
  0x3d   :  { %1105 = vmatpush3.msra.mxu1 %v1467_v26  ;;  %1071 = vmatprep.subr.mxu0 %v1308_v2 }
  0x3e   :  { %1106 = vmatprep.subr.mxu1 %v1308_v2  ;;  %1072 = vmatpush3.msra.mxu0 %v1477_v28 }
  0x3f   :  { %1107 = vmatpush3.msra.mxu1 %v1477_v28  ;;  %1073 = vmatprep.subr.mxu0 %v1308_v2 }
  0x40   :  { %1108 = vmatprep.subr.mxu1 %v1308_v2  ;;  %1074 = vmatpush3.msra.mxu0 %v1491_v31 }
  0x41   :  { %1109 = vmatpush3.msra.mxu1 %v1491_v31  ;;  %1075 = vmatprep.subr.mxu0 %v1308_v2 }
  0x42   :  { %1110 = vmatprep.subr.mxu1 %v1308_v2  ;;  %1076 = vmatpush3.msra.mxu0 %v1500_v33 }
  0x43   :  { %1111 = vmatpush3.msra.mxu1 %v1500_v33  ;;  %1112 = vmatprep.mubr.msk.f32.mxu1 %vm1309_vm0, %v1308_v2 }
  0x44   :  { %1115 = vmatprep.subr.mxu0 %v1308_v2  ;;  %1150 = vmatprep.subr.mxu1 %v1308_v2 }
  0x45   :  { %1001 = vmatprep.mubr.f32.mxu0 %v28_v36 }
  0x46   :  { %1002 = vmatmul.mubr.f32.gmra.mxu0 %v29_v37 }
  0x47   :  { %1004 = vmatprep.mubr.f32.mxu0 %v30_v38 }
  0x4a   :  { %1005 = vmatmul.mubr.f32.gmra.mxu0 %v31_v39 }
  0x4b   :  { %1007 = vmatprep.mubr.f32.mxu0 %v32_v40 }
  0x4e   :  { %1008 = vmatmul.mubr.f32.gmra.mxu0 %v33_v41 }
  0x4f   :  { %1077 = vmatprep.mubr.msk.f32.mxu0 %vm1309_vm0, %v1308_v2 }
  0xe2   :  { %v1000_v42 = vpop.f32.mrf.mxu0 }
  0xe3   :  { %v254_v43 = vpop.f32.mrf.mxu1  ;;  %v129_v56 = vadd.f32 %v1000_v42, %v1602_v44 }
  0xe4   :  { %v123_v45 = vpop.f32.mrf.mxu0 }
  0xe5   :  { %v1044_v46 = vpop.f32.mrf.mxu1  ;;  %v124_v47 = vadd.f32 %v1602_v44, %v123_v45 }
  0xe7   :  { %v258_v48 = vadd.f32 %v254_v43, %v124_v47 }
  0xe9   :  { %1292 = vtanh.f32 %v258_v48 }
  0xf6   :  { %v1293_v49 = vpop.eup %1292 }
  0xf7   :  { %260 = vst [vmem:[%s1824_s5] sm:$0xff] %v1293_v49  ;;  %1078 = vmatmul.mubr.f32.vlgmr.msra.gmra.mxu0 %v1293_v49 }
  0xf8   :  { %1116 = vmatpush3.msra.mxu0 %v1350_v3  ;;  %1147 = vmatprep.mubr.msk.f32.mxu0 %vm1309_vm0, %v1308_v2 }
  0xf9   :  { %1117 = vmatprep.subr.mxu0 %v1308_v2 }
  0xfa   :  { %1118 = vmatpush3.msra.mxu0 %v1358_v4 }
  0xfb   :  { %1119 = vmatprep.subr.mxu0 %v1308_v2 }
  0xfc   :  { %1120 = vmatpush3.msra.mxu0 %v1367_v6 }
  0xfd   :  { %1121 = vmatprep.subr.mxu0 %v1308_v2 }
  0xfe   :  { %1122 = vmatpush3.msra.mxu0 %v1377_v8 }
  0xff   :  { %1123 = vmatprep.subr.mxu0 %v1308_v2 }
 0x100   :  { %1124 = vmatpush3.msra.mxu0 %v1387_v10 }
 0x101   :  { %1125 = vmatprep.subr.mxu0 %v1308_v2 }
 0x102   :  { %1126 = vmatpush3.msra.mxu0 %v1397_v12 }
 0x103   :  { %1127 = vmatprep.subr.mxu0 %v1308_v2 }
 0x104   :  { %1128 = vmatpush3.msra.mxu0 %v1407_v14 }
 0x105   :  { %1129 = vmatprep.subr.mxu0 %v1308_v2 }
 0x106   :  { %1130 = vmatpush3.msra.mxu0 %v1417_v16  ;;  %v1642_v50 = vpop.f32.mrf.mxu0 }
 0x107   :  { %1131 = vmatprep.subr.mxu0 %v1308_v2  ;;  %v139_v5 = vadd.f32 %v1642_v50, %v1602_v44 }
 0x108   :  { %1132 = vmatpush3.msra.mxu0 %v1427_v18  ;;  %v133_v51 = vpop.f32.mrf.mxu0 }
 0x109   :  { %1133 = vmatprep.subr.mxu0 %v1308_v2  ;;  %v134_v61 = vadd.f32 %v1602_v44, %v133_v51 }
 0x10a   :  { %1134 = vmatpush3.msra.mxu0 %v1437_v20  ;;  %v1644_v52 = vpop.f32.mrf.mxu0 }
 0x10b   :  { %1135 = vmatprep.subr.mxu0 %v1308_v2 }
 0x10c   :  { %1136 = vmatpush3.msra.mxu0 %v1447_v22  ;;  %v1646_v53 = vpop.f32.mrf.mxu0 }
 0x10d   :  { %1137 = vmatprep.subr.mxu0 %v1308_v2  ;;  %v144_v15 = vadd.f32 %v1602_v44, %v1646_v53 }
 0x10e   :  { %1138 = vmatpush3.msra.mxu0 %v1457_v24  ;;  %v1648_v54 = vpop.f32.mrf.mxu0 }
 0x10f   :  { %1139 = vmatprep.subr.mxu0 %v1308_v2 }
 0x110   :  { %1140 = vmatpush3.msra.mxu0 %v1467_v26  ;;  %v1650_v55 = vpop.f32.mrf.mxu0 }
 0x111   :  { %1141 = vmatprep.subr.mxu0 %v1308_v2 }
 0x112   :  { %1142 = vmatpush3.msra.mxu0 %v1477_v28 }
 0x113   :  { %1143 = vmatprep.subr.mxu0 %v1308_v2 }
 0x114   :  { %1144 = vmatpush3.msra.mxu0 %v1491_v31 }
 0x115   :  { %1145 = vmatprep.subr.mxu0 %v1308_v2 }
 0x116   :  { %1146 = vmatpush3.msra.mxu0 %v1500_v33 }
 0x117   :  { %1185 = vmatprep.subr.mxu0 %v1308_v2 }
 0x1b7   :  { %v329_v57 = vpop.f32.mrf.mxu0 }
 0x1b8   :  { %v333_v58 = vadd.f32 %v329_v57, %v129_v56 }
 0x1b9   :  { %v1079_v59 = vpop.f32.mrf.mxu0 }
 0x1ba   :  { %1294 = vtanh.f32 %v333_v58 }
 0x1c7   :  { %v1295_v60 = vpop.eup %1294 }
 0x1c8   :  { %799 = vst [vmem:[%s1824_s5 + $0x8] sm:$0xff] %v1295_v60  ;;  %1113 = vmatmul.mubr.f32.vlgmr.msra.gmra.mxu1 %v1295_v60 }
 0x1c9   :  { %1151 = vmatpush3.msra.mxu1 %v1350_v3  ;;  %1182 = vmatprep.mubr.msk.f32.mxu1 %vm1309_vm0, %v1308_v2 }
 0x1ca   :  { %1152 = vmatprep.subr.mxu1 %v1308_v2 }
 0x1cb   :  { %1153 = vmatpush3.msra.mxu1 %v1358_v4 }
 0x1cc   :  { %1154 = vmatprep.subr.mxu1 %v1308_v2 }
 0x1cd   :  { %1155 = vmatpush3.msra.mxu1 %v1367_v6 }
 0x1ce   :  { %1156 = vmatprep.subr.mxu1 %v1308_v2 }
 0x1cf   :  { %1157 = vmatpush3.msra.mxu1 %v1377_v8 }
 0x1d0   :  { %1158 = vmatprep.subr.mxu1 %v1308_v2 }
 0x1d1   :  { %1159 = vmatpush3.msra.mxu1 %v1387_v10 }
 0x1d2   :  { %1160 = vmatprep.subr.mxu1 %v1308_v2 }
 0x1d3   :  { %1161 = vmatpush3.msra.mxu1 %v1397_v12 }
 0x1d4   :  { %1162 = vmatprep.subr.mxu1 %v1308_v2 }
 0x1d5   :  { %1163 = vmatpush3.msra.mxu1 %v1407_v14 }
 0x1d6   :  { %1164 = vmatprep.subr.mxu1 %v1308_v2 }
 0x1d7   :  { %1165 = vmatpush3.msra.mxu1 %v1417_v16 }
 0x1d8   :  { %1166 = vmatprep.subr.mxu1 %v1308_v2 }
 0x1d9   :  { %1167 = vmatpush3.msra.mxu1 %v1427_v18 }
 0x1da   :  { %1168 = vmatprep.subr.mxu1 %v1308_v2 }
 0x1db   :  { %1169 = vmatpush3.msra.mxu1 %v1437_v20 }
 0x1dc   :  { %1170 = vmatprep.subr.mxu1 %v1308_v2 }
 0x1dd   :  { %1171 = vmatpush3.msra.mxu1 %v1447_v22 }
 0x1de   :  { %1172 = vmatprep.subr.mxu1 %v1308_v2 }
 0x1df   :  { %1173 = vmatpush3.msra.mxu1 %v1457_v24 }
 0x1e0   :  { %1174 = vmatprep.subr.mxu1 %v1308_v2 }
 0x1e1   :  { %1175 = vmatpush3.msra.mxu1 %v1467_v26 }
 0x1e2   :  { %1176 = vmatprep.subr.mxu1 %v1308_v2 }
 0x1e3   :  { %1177 = vmatpush3.msra.mxu1 %v1477_v28 }
 0x1e4   :  { %1178 = vmatprep.subr.mxu1 %v1308_v2 }
 0x1e5   :  { %1179 = vmatpush3.msra.mxu1 %v1491_v31 }
 0x1e6   :  { %1180 = vmatprep.subr.mxu1 %v1308_v2 }
 0x1e7   :  { %1181 = vmatpush3.msra.mxu1 %v1500_v33 }
 0x1e8   :  { %1220 = vmatprep.subr.mxu1 %v1308_v2 }
 0x288   :  { %v405_v62 = vpop.f32.mrf.mxu1 }
 0x289   :  { %v409_v63 = vadd.f32 %v405_v62, %v134_v61 }
 0x28a   :  { %v1114_v0 = vpop.f32.mrf.mxu1 }
 0x28b   :  { %1296 = vtanh.f32 %v409_v63 }
 0x298   :  { %v1297_v1 = vpop.eup %1296 }
 0x299   :  { %800 = vst [vmem:[%s1824_s5 + $0x10] sm:$0xff] %v1297_v1  ;;  %1148 = vmatmul.mubr.f32.vlgmr.msra.gmra.mxu0 %v1297_v1 }
 0x29a   :  { %1186 = vmatpush3.msra.mxu0 %v1350_v3  ;;  %1217 = vmatprep.mubr.msk.f32.mxu0 %vm1309_vm0, %v1308_v2 }
 0x29b   :  { %1187 = vmatprep.subr.mxu0 %v1308_v2 }
 0x29c   :  { %1188 = vmatpush3.msra.mxu0 %v1358_v4 }
 0x29d   :  { %1189 = vmatprep.subr.mxu0 %v1308_v2 }
 0x29e   :  { %1190 = vmatpush3.msra.mxu0 %v1367_v6 }
 0x29f   :  { %1191 = vmatprep.subr.mxu0 %v1308_v2 }
 0x2a0   :  { %1192 = vmatpush3.msra.mxu0 %v1377_v8 }
 0x2a1   :  { %1193 = vmatprep.subr.mxu0 %v1308_v2 }
 0x2a2   :  { %1194 = vmatpush3.msra.mxu0 %v1387_v10 }
 0x2a3   :  { %1195 = vmatprep.subr.mxu0 %v1308_v2 }
 0x2a4   :  { %1196 = vmatpush3.msra.mxu0 %v1397_v12 }
 0x2a5   :  { %1197 = vmatprep.subr.mxu0 %v1308_v2 }
 0x2a6   :  { %1198 = vmatpush3.msra.mxu0 %v1407_v14 }
 0x2a7   :  { %1199 = vmatprep.subr.mxu0 %v1308_v2 }
 0x2a8   :  { %1200 = vmatpush3.msra.mxu0 %v1417_v16 }
 0x2a9   :  { %1201 = vmatprep.subr.mxu0 %v1308_v2 }
 0x2aa   :  { %1202 = vmatpush3.msra.mxu0 %v1427_v18 }
 0x2ab   :  { %1203 = vmatprep.subr.mxu0 %v1308_v2 }
 0x2ac   :  { %1204 = vmatpush3.msra.mxu0 %v1437_v20 }
 0x2ad   :  { %1205 = vmatprep.subr.mxu0 %v1308_v2 }
 0x2ae   :  { %1206 = vmatpush3.msra.mxu0 %v1447_v22 }
 0x2af   :  { %1207 = vmatprep.subr.mxu0 %v1308_v2 }
 0x2b0   :  { %1208 = vmatpush3.msra.mxu0 %v1457_v24 }
 0x2b1   :  { %1209 = vmatprep.subr.mxu0 %v1308_v2 }
 0x2b2   :  { %1210 = vmatpush3.msra.mxu0 %v1467_v26 }
 0x2b3   :  { %1211 = vmatprep.subr.mxu0 %v1308_v2 }
 0x2b4   :  { %1212 = vmatpush3.msra.mxu0 %v1477_v28 }
 0x2b5   :  { %1213 = vmatprep.subr.mxu0 %v1308_v2 }
 0x2b6   :  { %1214 = vmatpush3.msra.mxu0 %v1491_v31 }
 0x2b7   :  { %1215 = vmatprep.subr.mxu0 %v1308_v2 }
 0x2b8   :  { %1216 = vmatpush3.msra.mxu0 %v1500_v33 }
 0x2b9   :  { %1255 = vmatprep.subr.mxu0 %v1308_v2 }
 0x359   :  { %v481_v7 = vpop.f32.mrf.mxu0 }
 0x35a   :  { %v485_v9 = vadd.f32 %v481_v7, %v139_v5 }
 0x35b   :  { %v1149_v11 = vpop.f32.mrf.mxu0 }
 0x35c   :  { %1298 = vtanh.f32 %v485_v9 }
 0x369   :  { %v1299_v13 = vpop.eup %1298 }
 0x36a   :  { %801 = vst [vmem:[%s1824_s5 + $0x18] sm:$0xff] %v1299_v13  ;;  %1183 = vmatmul.mubr.f32.vlgmr.msra.gmra.mxu1 %v1299_v13 }
 0x36b   :  { %1221 = vmatpush3.msra.mxu1 %v1350_v3  ;;  %1252 = vmatprep.mubr.msk.f32.mxu1 %vm1309_vm0, %v1308_v2 }
 0x36c   :  { %1222 = vmatprep.subr.mxu1 %v1308_v2 }
 0x36d   :  { %1223 = vmatpush3.msra.mxu1 %v1358_v4 }
 0x36e   :  { %1224 = vmatprep.subr.mxu1 %v1308_v2 }
 0x36f   :  { %1225 = vmatpush3.msra.mxu1 %v1367_v6 }
 0x370   :  { %1226 = vmatprep.subr.mxu1 %v1308_v2 }
 0x371   :  { %1227 = vmatpush3.msra.mxu1 %v1377_v8 }
 0x372   :  { %1228 = vmatprep.subr.mxu1 %v1308_v2 }
 0x373   :  { %1229 = vmatpush3.msra.mxu1 %v1387_v10 }
 0x374   :  { %1230 = vmatprep.subr.mxu1 %v1308_v2 }
 0x375   :  { %1231 = vmatpush3.msra.mxu1 %v1397_v12 }
 0x376   :  { %1232 = vmatprep.subr.mxu1 %v1308_v2 }
 0x377   :  { %1233 = vmatpush3.msra.mxu1 %v1407_v14 }
 0x378   :  { %1234 = vmatprep.subr.mxu1 %v1308_v2 }
 0x379   :  { %1235 = vmatpush3.msra.mxu1 %v1417_v16 }
 0x37a   :  { %1236 = vmatprep.subr.mxu1 %v1308_v2 }
 0x37b   :  { %1237 = vmatpush3.msra.mxu1 %v1427_v18 }
 0x37c   :  { %1238 = vmatprep.subr.mxu1 %v1308_v2 }
 0x37d   :  { %1239 = vmatpush3.msra.mxu1 %v1437_v20 }
 0x37e   :  { %1240 = vmatprep.subr.mxu1 %v1308_v2 }
 0x37f   :  { %1241 = vmatpush3.msra.mxu1 %v1447_v22 }
 0x380   :  { %1242 = vmatprep.subr.mxu1 %v1308_v2 }
 0x381   :  { %1243 = vmatpush3.msra.mxu1 %v1457_v24 }
 0x382   :  { %1244 = vmatprep.subr.mxu1 %v1308_v2 }
 0x383   :  { %1245 = vmatpush3.msra.mxu1 %v1467_v26 }
 0x384   :  { %1246 = vmatprep.subr.mxu1 %v1308_v2 }
 0x385   :  { %1247 = vmatpush3.msra.mxu1 %v1477_v28 }
 0x386   :  { %1248 = vmatprep.subr.mxu1 %v1308_v2 }
 0x387   :  { %1249 = vmatpush3.msra.mxu1 %v1491_v31 }
 0x388   :  { %1250 = vmatprep.subr.mxu1 %v1308_v2 }
 0x389   :  { %1251 = vmatpush3.msra.mxu1 %v1500_v33 }
 0x42a   :  { %v557_v17 = vpop.f32.mrf.mxu1 }
 0x42b   :  { %v561_v19 = vadd.f32 %v557_v17, %v144_v15 }
 0x42c   :  { %v1184_v21 = vpop.f32.mrf.mxu1 }
 0x42d   :  { %1300 = vtanh.f32 %v561_v19 }
 0x43a   :  { %v1301_v23 = vpop.eup %1300 }
 0x43b   :  { %802 = vst [vmem:[%s1824_s5 + $0x20] sm:$0xff] %v1301_v23  ;;  %1218 = vmatmul.mubr.f32.vlgmr.msra.gmra.mxu0 %v1301_v23 }
 0x43c   :  { %1256 = vmatpush3.msra.mxu0 %v1350_v3  ;;  %1287 = vmatprep.mubr.msk.f32.mxu0 %vm1309_vm0, %v1308_v2  ;;  %v149_v3 = vadd.f32 %v1644_v52, %v1602_v44 }
 0x43d   :  { %1257 = vmatprep.subr.mxu0 %v1308_v2 }
 0x43e   :  { %1258 = vmatpush3.msra.mxu0 %v1358_v4 }
 0x43f   :  { %1259 = vmatprep.subr.mxu0 %v1308_v2 }
 0x440   :  { %1260 = vmatpush3.msra.mxu0 %v1367_v6 }
 0x441   :  { %1261 = vmatprep.subr.mxu0 %v1308_v2 }
 0x442   :  { %1262 = vmatpush3.msra.mxu0 %v1377_v8 }
 0x443   :  { %1263 = vmatprep.subr.mxu0 %v1308_v2 }
 0x444   :  { %1264 = vmatpush3.msra.mxu0 %v1387_v10 }
 0x445   :  { %1265 = vmatprep.subr.mxu0 %v1308_v2 }
 0x446   :  { %1266 = vmatpush3.msra.mxu0 %v1397_v12  ;;  %v154_v12 = vadd.f32 %v1602_v44, %v1650_v55 }
 0x447   :  { %1267 = vmatprep.subr.mxu0 %v1308_v2 }
 0x448   :  { %1268 = vmatpush3.msra.mxu0 %v1407_v14 }
 0x449   :  { %1269 = vmatprep.subr.mxu0 %v1308_v2 }
 0x44a   :  { %1270 = vmatpush3.msra.mxu0 %v1417_v16 }
 0x44b   :  { %1271 = vmatprep.subr.mxu0 %v1308_v2 }
 0x44c   :  { %1272 = vmatpush3.msra.mxu0 %v1427_v18 }
 0x44d   :  { %1273 = vmatprep.subr.mxu0 %v1308_v2 }
 0x44e   :  { %1274 = vmatpush3.msra.mxu0 %v1437_v20  ;;  %v159_v20 = vadd.f32 %v1648_v54, %v1602_v44 }
 0x44f   :  { %1275 = vmatprep.subr.mxu0 %v1308_v2 }
 0x450   :  { %1276 = vmatpush3.msra.mxu0 %v1447_v22 }
 0x451   :  { %1277 = vmatprep.subr.mxu0 %v1308_v2 }
 0x452   :  { %1278 = vmatpush3.msra.mxu0 %v1457_v24 }
 0x453   :  { %1279 = vmatprep.subr.mxu0 %v1308_v2 }
 0x454   :  { %1280 = vmatpush3.msra.mxu0 %v1467_v26 }
 0x455   :  { %1281 = vmatprep.subr.mxu0 %v1308_v2 }
 0x456   :  { %1282 = vmatpush3.msra.mxu0 %v1477_v28 }
 0x457   :  { %1283 = vmatprep.subr.mxu0 %v1308_v2 }
 0x458   :  { %1284 = vmatpush3.msra.mxu0 %v1491_v31 }
 0x459   :  { %1285 = vmatprep.subr.mxu0 %v1308_v2 }
 0x45a   :  { %1286 = vmatpush3.msra.mxu0 %v1500_v33 }
 0x4fb   :  { %v633_v4 = vpop.f32.mrf.mxu0 }
 0x4fc   :  { %v637_v6 = vadd.f32 %v633_v4, %v149_v3 }
 0x4fd   :  { %v1219_v8 = vpop.f32.mrf.mxu0 }
 0x4fe   :  { %1302 = vtanh.f32 %v637_v6 }
 0x50b   :  { %v1303_v10 = vpop.eup %1302 }
 0x50c   :  { %803 = vst [vmem:[%s1824_s5 + $0x28] sm:$0xff] %v1303_v10  ;;  %1253 = vmatmul.mubr.f32.vlgmr.msra.gmra.mxu1 %v1303_v10 }
 0x5cc   :  { %v709_v14 = vpop.f32.mrf.mxu1 }
 0x5cd   :  { %v713_v2 = vadd.f32 %v709_v14, %v154_v12 }
 0x5ce   :  { %v1254_v16 = vpop.f32.mrf.mxu1 }
 0x5cf   :  { %1304 = vtanh.f32 %v713_v2 }
 0x5dc   :  { %v1305_v18 = vpop.eup %1304 }
 0x5dd   :  { %804 = vst [vmem:[%s1824_s5 + $0x30] sm:$0xff] %v1305_v18  ;;  %1288 = vmatmul.mubr.f32.vlgmr.msra.gmra.mxu0 %v1305_v18 }
 0x69d   :  { %v785_v22 = vpop.f32.mrf.mxu0 }
 0x69e   :  { %v789_v24 = vadd.f32 %v785_v22, %v159_v20 }
 0x69f   :  { %v1289_v25 = vpop.f32.mrf.mxu0 }
 0x6a0   :  { %1306 = vtanh.f32 %v789_v24 }
 0x6ad   :  { %v1307_v26 = vpop.eup %1306 }
 0x6ae   :  { %805 = vst [vmem:[%s1824_s5 + $0x38] sm:$0xff] %v1307_v26 }

// kernel: _rnn_forward_impl.6
= control target key start
LH: loop header
LB: loop body
LE: loop exit
PB: predicated region body
PF: predicated region fallthrough
CT: control target
= control target key end

     0   :  { %v1320_v3 = vmov 0.0   ;;  %vm1321_vm0 = vmmov 0   ;;  %s1909_s1 = inlined_call_operand.vmem [shape: f32[256,128], index: 1, kind: input, shape index: {}]   ;;  %s1910_s2 = inlined_call_operand.vmem [shape: f32[128,128], index: 2, kind: input, shape index: {}]   ;;  %s1911_s0 = inlined_call_operand.vmem [shape: f32[8,8,256], index: 0, kind: input, shape index: {}]   ;;  %s1912_s4 = inlined_call_operand.vmem [shape: f32[8,128], index: 4, kind: input, shape index: {}]   ;;  %s1913_s3 = inlined_call_operand.vmem [shape: f32[1,128], index: 3, kind: input, shape index: {}]   ;;  %s1914_s5 = inlined_call_operand.vmem [shape: f32[8,8,128], index: 5, kind: output, shape index: {}]  }
   0x1   :  { %v73_v0 = vld [vmem:[%s1909_s1 + $0xf8] sm:$0xff]  ;;  %v72_v2 = vld [vmem:[%s1909_s1 + $0xf0] sm:$0xff]  ;;  %1022 = vmatprep.subr.mxu1 %v1320_v3  ;;  %1054 = vmatprep.mubr.msk.f32.mxu1 %vm1321_vm0, %v1320_v3  ;;  %v71_v5 = vld [vmem:[%s1909_s1 + $0xe8] sm:$0xff] }
   0x2   :  { %v57_v1 = vld [vmem:[%s1909_s1 + $0x78] sm:$0xff]  ;;  %830 = vmatprep.subr.mxu0 %v73_v0  ;;  %v56_v4 = vld [vmem:[%s1909_s1 + $0x70] sm:$0xff]  ;;  %v55_v7 = vld [vmem:[%s1909_s1 + $0x68] sm:$0xff] }
   0x3   :  { %831 = vmatpush3.msra.mxu0 %v57_v1  ;;  %v1373_v6 = vld [vmem:[%s1910_s2 + $0x78] sm:$0xff]  ;;  %v1382_v8 = vld [vmem:[%s1910_s2 + $0x70] sm:$0xff]  ;;  %v70_v9 = vld [vmem:[%s1909_s1 + $0xe0] sm:$0xff] }
   0x4   :  { %832 = vmatprep.subr.mxu0 %v72_v2  ;;  %1023 = vmatpush3.msra.mxu1 %v1373_v6  ;;  %v1391_v10 = vld [vmem:[%s1910_s2 + $0x68] sm:$0xff]  ;;  %v54_v11 = vld [vmem:[%s1909_s1 + $0x60] sm:$0xff]  ;;  %v69_v12 = vld [vmem:[%s1909_s1 + $0xd8] sm:$0xff] }
   0x5   :  { %833 = vmatpush3.msra.mxu0 %v56_v4  ;;  %1024 = vmatprep.subr.mxu1 %v1320_v3  ;;  %v1404_v13 = vld [vmem:[%s1910_s2 + $0x60] sm:$0xff]  ;;  %v53_v14 = vld [vmem:[%s1909_s1 + $0x58] sm:$0xff]  ;;  %v68_v15 = vld [vmem:[%s1909_s1 + $0xd0] sm:$0xff] }
   0x6   :  { %834 = vmatprep.subr.mxu0 %v71_v5  ;;  %1025 = vmatpush3.msra.mxu1 %v1382_v8  ;;  %v1417_v16 = vld [vmem:[%s1910_s2 + $0x58] sm:$0xff]  ;;  %v52_v17 = vld [vmem:[%s1909_s1 + $0x50] sm:$0xff]  ;;  %v67_v18 = vld [vmem:[%s1909_s1 + $0xc8] sm:$0xff] }
   0x7   :  { %835 = vmatpush3.msra.mxu0 %v55_v7  ;;  %1026 = vmatprep.subr.mxu1 %v1320_v3  ;;  %v1430_v19 = vld [vmem:[%s1910_s2 + $0x50] sm:$0xff]  ;;  %v51_v20 = vld [vmem:[%s1909_s1 + $0x48] sm:$0xff]  ;;  %v66_v21 = vld [vmem:[%s1909_s1 + $0xc0] sm:$0xff] }
   0x8   :  { %836 = vmatprep.subr.mxu0 %v70_v9  ;;  %1027 = vmatpush3.msra.mxu1 %v1391_v10  ;;  %v1443_v22 = vld [vmem:[%s1910_s2 + $0x48] sm:$0xff]  ;;  %v50_v23 = vld [vmem:[%s1909_s1 + $0x40] sm:$0xff]  ;;  %v65_v24 = vld [vmem:[%s1909_s1 + $0xb8] sm:$0xff] }
   0x9   :  { %837 = vmatpush3.msra.mxu0 %v54_v11  ;;  %1028 = vmatprep.subr.mxu1 %v1320_v3  ;;  %v1456_v25 = vld [vmem:[%s1910_s2 + $0x40] sm:$0xff]  ;;  %v49_v26 = vld [vmem:[%s1909_s1 + $0x38] sm:$0xff]  ;;  %v64_v27 = vld [vmem:[%s1909_s1 + $0xb0] sm:$0xff] }
   0xa   :  { %838 = vmatprep.subr.mxu0 %v69_v12  ;;  %1029 = vmatpush3.msra.mxu1 %v1404_v13  ;;  %v1469_v28 = vld [vmem:[%s1910_s2 + $0x38] sm:$0xff]  ;;  %v48_v29 = vld [vmem:[%s1909_s1 + $0x30] sm:$0xff]  ;;  %v63_v30 = vld [vmem:[%s1909_s1 + $0xa8] sm:$0xff] }
   0xb   :  { %839 = vmatpush3.msra.mxu0 %v53_v14  ;;  %1030 = vmatprep.subr.mxu1 %v1320_v3  ;;  %v1482_v31 = vld [vmem:[%s1910_s2 + $0x30] sm:$0xff]  ;;  %v47_v32 = vld [vmem:[%s1909_s1 + $0x28] sm:$0xff]  ;;  %v62_v33 = vld [vmem:[%s1909_s1 + $0xa0] sm:$0xff] }
   0xc   :  { %840 = vmatprep.subr.mxu0 %v68_v15  ;;  %1031 = vmatpush3.msra.mxu1 %v1417_v16  ;;  %v1495_v34 = vld [vmem:[%s1910_s2 + $0x28] sm:$0xff]  ;;  %v46_v35 = vld [vmem:[%s1909_s1 + $0x20] sm:$0xff]  ;;  %v61_v36 = vld [vmem:[%s1909_s1 + $0x98] sm:$0xff] }
   0xd   :  { %841 = vmatpush3.msra.mxu0 %v52_v17  ;;  %1032 = vmatprep.subr.mxu1 %v1320_v3  ;;  %v1508_v37 = vld [vmem:[%s1910_s2 + $0x20] sm:$0xff]  ;;  %v45_v38 = vld [vmem:[%s1909_s1 + $0x18] sm:$0xff]  ;;  %v60_v39 = vld [vmem:[%s1909_s1 + $0x90] sm:$0xff] }
   0xe   :  { %842 = vmatprep.subr.mxu0 %v67_v18  ;;  %1033 = vmatpush3.msra.mxu1 %v1430_v19  ;;  %v1521_v40 = vld [vmem:[%s1910_s2 + $0x18] sm:$0xff]  ;;  %v44_v41 = vld [vmem:[%s1909_s1 + $0x10] sm:$0xff]  ;;  %v59_v42 = vld [vmem:[%s1909_s1 + $0x88] sm:$0xff] }
   0xf   :  { %843 = vmatpush3.msra.mxu0 %v51_v20  ;;  %1034 = vmatprep.subr.mxu1 %v1320_v3  ;;  %v27_v43 = vld [vmem:[%s1911_s0 + $0x8] sm:$0xff]  ;;  %v1541_v45 = vld [vmem:[%s1910_s2 + $0x10] sm:$0xff]  ;;  %v58_v46 = vld [vmem:[%s1909_s1 + $0x80] sm:$0xff] }
  0x10   :  { %844 = vmatprep.subr.mxu0 %v66_v21  ;;  %1035 = vmatpush3.msra.mxu1 %v1443_v22  ;;  %v43_v44 = vld [vmem:[%s1909_s1 + $0x8] sm:$0xff]  ;;  %v42_v47 = vld [vmem:[%s1909_s1] sm:$0xff]  ;;  %v29_v52 = vld [vmem:[%s1911_s0 + $0x18] sm:$0xff] }
  0x11   :  { %845 = vmatpush3.msra.mxu0 %v50_v23  ;;  %1036 = vmatprep.subr.mxu1 %v1320_v3  ;;  %v1553_v48 = vld [vmem:[%s1910_s2 + $0x8] sm:$0xff]  ;;  %v26_v49 = vld [vmem:[%s1911_s0] sm:$0xff]  ;;  %v28_v53 = vld [vmem:[%s1911_s0 + $0x10] sm:$0xff] }
  0x12   :  { %846 = vmatprep.subr.mxu0 %v65_v24  ;;  %1037 = vmatpush3.msra.mxu1 %v1456_v25  ;;  %v1563_v50 = vld [vmem:[%s1910_s2] sm:$0xff]  ;;  %v31_v54 = vld [vmem:[%s1911_s0 + $0x28] sm:$0xff]  ;;  %v33_v56 = vld [vmem:[%s1911_s0 + $0x38] sm:$0xff] }
  0x13   :  { %847 = vmatpush3.msra.mxu0 %v49_v26  ;;  %1038 = vmatprep.subr.mxu1 %v1320_v3  ;;  %v24_v51 = vld [vmem:[%s1912_s4] sm:$0xff]  ;;  %v32_v57 = vld [vmem:[%s1911_s0 + $0x30] sm:$0xff]  ;;  %v35_v58 = vld [vmem:[%s1911_s0 + $0x48] sm:$0xff] }
  0x14   :  { %848 = vmatprep.subr.mxu0 %v64_v27  ;;  %1039 = vmatpush3.msra.mxu1 %v1469_v28  ;;  %v30_v55 = vld [vmem:[%s1911_s0 + $0x20] sm:$0xff]  ;;  %v37_v60 = vld [vmem:[%s1911_s0 + $0x58] sm:$0xff]  ;;  %v36_v61 = vld [vmem:[%s1911_s0 + $0x50] sm:$0xff] }
  0x15   :  { %849 = vmatpush3.msra.mxu0 %v48_v29  ;;  %1040 = vmatprep.subr.mxu1 %v1320_v3  ;;  %v34_v59 = vld [vmem:[%s1911_s0 + $0x40] sm:$0xff]  ;;  %v39_v62 = vld [vmem:[%s1911_s0 + $0x68] sm:$0xff]  ;;  %v41_v0 = vld [vmem:[%s1911_s0 + $0x78] sm:$0xff] }
  0x16   :  { %850 = vmatprep.subr.mxu0 %v63_v30  ;;  %1041 = vmatpush3.msra.mxu1 %v1482_v31  ;;  %v38_v63 = vld [vmem:[%s1911_s0 + $0x60] sm:$0xff]  ;;  %v40_v1 = vld [vmem:[%s1911_s0 + $0x70] sm:$0xff] }
  0x17   :  { %851 = vmatpush3.msra.mxu0 %v47_v32  ;;  %1042 = vmatprep.subr.mxu1 %v1320_v3  ;;  %v1686_v5 = vld [vmem:[%s1913_s3] ss:$0 sm:$0xff] }
  0x18   :  { %852 = vmatprep.subr.mxu0 %v62_v33  ;;  %1043 = vmatpush3.msra.mxu1 %v1495_v34 }
  0x19   :  { %853 = vmatpush3.msra.mxu0 %v46_v35  ;;  %1044 = vmatprep.subr.mxu1 %v1320_v3 }
  0x1a   :  { %854 = vmatprep.subr.mxu0 %v61_v36  ;;  %1045 = vmatpush3.msra.mxu1 %v1508_v37 }
  0x1b   :  { %855 = vmatpush3.msra.mxu0 %v45_v38  ;;  %1046 = vmatprep.subr.mxu1 %v1320_v3 }
  0x1c   :  { %856 = vmatprep.subr.mxu0 %v60_v39  ;;  %1047 = vmatpush3.msra.mxu1 %v1521_v40 }
  0x1d   :  { %857 = vmatpush3.msra.mxu0 %v44_v41  ;;  %1048 = vmatprep.subr.mxu1 %v1320_v3 }
  0x1e   :  { %858 = vmatprep.subr.mxu0 %v59_v42  ;;  %145 = vmatprep.mubr.f32.mxu0 %v27_v43 }
  0x1f   :  { %859 = vmatpush3.msra.mxu0 %v43_v44  ;;  %1049 = vmatpush3.msra.mxu1 %v1541_v45 }
  0x20   :  { %860 = vmatprep.subr.mxu0 %v58_v46  ;;  %1050 = vmatprep.subr.mxu1 %v1320_v3 }
  0x21   :  { %861 = vmatpush3.msra.mxu0 %v42_v47  ;;  %1051 = vmatpush3.msra.mxu1 %v1553_v48 }
  0x22   :  { %146 = vmatmul.mubr.f32.vlgmr.msra.gmra.mxu0 %v26_v49  ;;  %1052 = vmatprep.subr.mxu1 %v1320_v3 }
  0x23   :  { %1053 = vmatpush3.msra.mxu1 %v1563_v50  ;;  %1057 = vmatprep.subr.mxu0 %v1320_v3 }
  0x24   :  { %1055 = vmatmul.mubr.f32.vlgmr.msra.gmra.mxu1 %v24_v51  ;;  %1058 = vmatpush3.msra.mxu0 %v1373_v6 }
  0x25   :  { %150 = vmatprep.mubr.f32.mxu0 %v29_v52  ;;  %1059 = vmatprep.subr.mxu0 %v1320_v3 }
  0x26   :  { %151 = vmatmul.mubr.f32.gmra.mxu0 %v28_v53  ;;  %1092 = vmatprep.subr.mxu1 %v1320_v3 }
  0x27   :  { %1060 = vmatpush3.msra.mxu0 %v1382_v8  ;;  %155 = vmatprep.mubr.f32.mxu0 %v31_v54 }
  0x28   :  { %1061 = vmatprep.subr.mxu0 %v1320_v3  ;;  %1093 = vmatpush3.msra.mxu1 %v1373_v6 }
  0x29   :  { %1062 = vmatpush3.msra.mxu0 %v1391_v10  ;;  %1094 = vmatprep.subr.mxu1 %v1320_v3 }
  0x2a   :  { %1063 = vmatprep.subr.mxu0 %v1320_v3  ;;  %156 = vmatmul.mubr.f32.gmra.mxu0 %v30_v55 }
  0x2b   :  { %1064 = vmatpush3.msra.mxu0 %v1404_v13  ;;  %1095 = vmatpush3.msra.mxu1 %v1382_v8 }
  0x2c   :  { %1065 = vmatprep.subr.mxu0 %v1320_v3  ;;  %1096 = vmatprep.subr.mxu1 %v1320_v3 }
  0x2d   :  { %1066 = vmatpush3.msra.mxu0 %v1417_v16  ;;  %1097 = vmatpush3.msra.mxu1 %v1391_v10 }
  0x2e   :  { %1067 = vmatprep.subr.mxu0 %v1320_v3  ;;  %1098 = vmatprep.subr.mxu1 %v1320_v3 }
  0x2f   :  { %1068 = vmatpush3.msra.mxu0 %v1430_v19  ;;  %1099 = vmatpush3.msra.mxu1 %v1404_v13 }
  0x30   :  { %1069 = vmatprep.subr.mxu0 %v1320_v3  ;;  %1100 = vmatprep.subr.mxu1 %v1320_v3 }
  0x31   :  { %1070 = vmatpush3.msra.mxu0 %v1443_v22  ;;  %1101 = vmatpush3.msra.mxu1 %v1417_v16 }
  0x32   :  { %1071 = vmatprep.subr.mxu0 %v1320_v3  ;;  %1102 = vmatprep.subr.mxu1 %v1320_v3 }
  0x33   :  { %1072 = vmatpush3.msra.mxu0 %v1456_v25  ;;  %1103 = vmatpush3.msra.mxu1 %v1430_v19 }
  0x34   :  { %1073 = vmatprep.subr.mxu0 %v1320_v3  ;;  %1104 = vmatprep.subr.mxu1 %v1320_v3 }
  0x35   :  { %1074 = vmatpush3.msra.mxu0 %v1469_v28  ;;  %1105 = vmatpush3.msra.mxu1 %v1443_v22 }
  0x36   :  { %1075 = vmatprep.subr.mxu0 %v1320_v3  ;;  %1106 = vmatprep.subr.mxu1 %v1320_v3 }
  0x37   :  { %1076 = vmatpush3.msra.mxu0 %v1482_v31  ;;  %1107 = vmatpush3.msra.mxu1 %v1456_v25 }
  0x38   :  { %1077 = vmatprep.subr.mxu0 %v1320_v3  ;;  %1108 = vmatprep.subr.mxu1 %v1320_v3 }
  0x39   :  { %1078 = vmatpush3.msra.mxu0 %v1495_v34  ;;  %1109 = vmatpush3.msra.mxu1 %v1469_v28 }
  0x3a   :  { %1079 = vmatprep.subr.mxu0 %v1320_v3  ;;  %1110 = vmatprep.subr.mxu1 %v1320_v3 }
  0x3b   :  { %1080 = vmatpush3.msra.mxu0 %v1508_v37  ;;  %1111 = vmatpush3.msra.mxu1 %v1482_v31 }
  0x3c   :  { %1081 = vmatprep.subr.mxu0 %v1320_v3  ;;  %1112 = vmatprep.subr.mxu1 %v1320_v3 }
  0x3d   :  { %1082 = vmatpush3.msra.mxu0 %v1521_v40  ;;  %1113 = vmatpush3.msra.mxu1 %v1495_v34 }
  0x3e   :  { %1083 = vmatprep.subr.mxu0 %v1320_v3  ;;  %1114 = vmatprep.subr.mxu1 %v1320_v3 }
  0x3f   :  { %1084 = vmatpush3.msra.mxu0 %v1541_v45  ;;  %1115 = vmatpush3.msra.mxu1 %v1508_v37 }
  0x40   :  { %1085 = vmatprep.subr.mxu0 %v1320_v3  ;;  %1116 = vmatprep.subr.mxu1 %v1320_v3 }
  0x41   :  { %1086 = vmatpush3.msra.mxu0 %v1553_v48  ;;  %1117 = vmatpush3.msra.mxu1 %v1521_v40 }
  0x42   :  { %1087 = vmatprep.subr.mxu0 %v1320_v3  ;;  %1118 = vmatprep.subr.mxu1 %v1320_v3 }
  0x43   :  { %1088 = vmatpush3.msra.mxu0 %v1563_v50  ;;  %1119 = vmatpush3.msra.mxu1 %v1541_v45 }
  0x44   :  { %1120 = vmatprep.subr.mxu1 %v1320_v3  ;;  %1124 = vmatprep.mubr.msk.f32.mxu1 %vm1321_vm0, %v1320_v3 }
  0x45   :  { %1121 = vmatpush3.msra.mxu1 %v1553_v48  ;;  %1127 = vmatprep.subr.mxu0 %v1320_v3 }
  0x46   :  { %1122 = vmatprep.subr.mxu1 %v1320_v3  ;;  %160 = vmatprep.mubr.f32.mxu0 %v33_v56 }
  0x47   :  { %1123 = vmatpush3.msra.mxu1 %v1563_v50  ;;  %161 = vmatmul.mubr.f32.gmra.mxu0 %v32_v57 }
  0x48   :  { %1162 = vmatprep.subr.mxu1 %v1320_v3  ;;  %165 = vmatprep.mubr.f32.mxu0 %v35_v58 }
  0x4b   :  { %166 = vmatmul.mubr.f32.gmra.mxu0 %v34_v59 }
  0x4c   :  { %170 = vmatprep.mubr.f32.mxu0 %v37_v60 }
  0x4f   :  { %171 = vmatmul.mubr.f32.gmra.mxu0 %v36_v61 }
  0x50   :  { %175 = vmatprep.mubr.f32.mxu0 %v39_v62 }
  0x53   :  { %176 = vmatmul.mubr.f32.gmra.mxu0 %v38_v63 }
  0x54   :  { %180 = vmatprep.mubr.f32.mxu0 %v41_v0 }
  0x57   :  { %181 = vmatmul.mubr.f32.gmra.mxu0 %v40_v1 }
  0x58   :  { %1089 = vmatprep.mubr.msk.f32.mxu0 %vm1321_vm0, %v1320_v3 }
  0xe2   :  { %v862_v2 = vpop.f32.mrf.mxu0 }
  0xe4   :  { %v863_v4 = vpop.f32.mrf.mxu0  ;;  %v278_v7 = vpop.f32.mrf.mxu1 }
  0xe5   :  { %v864_v9 = vadd.f32 %v863_v4, %v862_v2 }
  0xe6   :  { %v1056_v11 = vpop.f32.mrf.mxu1  ;;  %v865_v12 = vpop.f32.mrf.mxu0 }
  0xe7   :  { %v148_v14 = vadd.f32 %v864_v9, %v1686_v5 }
  0xe8   :  { %v866_v15 = vpop.f32.mrf.mxu0 }
  0xe9   :  { %v282_v17 = vadd.f32 %v278_v7, %v148_v14  ;;  %v867_v43 = vadd.f32 %v866_v15, %v865_v12 }
  0xea   :  { %v868_v18 = vpop.f32.mrf.mxu0 }
  0xeb   :  { %1304 = vtanh.f32 %v282_v17  ;;  %v153_v46 = vadd.f32 %v867_v43, %v1686_v5 }
  0xec   :  { %v869_v20 = vpop.f32.mrf.mxu0 }
  0xed   :  { %v1689_v21 = vadd.f32 %v869_v20, %v868_v18 }
  0xef   :  { %v158_v53 = vadd.f32 %v1689_v21, %v1686_v5 }
  0xf8   :  { %v1305_v23 = vpop.eup %1304 }
  0xf9   :  { %284 = vst [vmem:[%s1914_s5] sm:$0xff] %v1305_v23  ;;  %1090 = vmatmul.mubr.f32.vlgmr.msra.gmra.mxu0 %v1305_v23 }
  0xfa   :  { %1128 = vmatpush3.msra.mxu0 %v1373_v6  ;;  %1159 = vmatprep.mubr.msk.f32.mxu0 %vm1321_vm0, %v1320_v3 }
  0xfb   :  { %1129 = vmatprep.subr.mxu0 %v1320_v3 }
  0xfc   :  { %1130 = vmatpush3.msra.mxu0 %v1382_v8 }
  0xfd   :  { %1131 = vmatprep.subr.mxu0 %v1320_v3 }
  0xfe   :  { %1132 = vmatpush3.msra.mxu0 %v1391_v10 }
  0xff   :  { %1133 = vmatprep.subr.mxu0 %v1320_v3 }
 0x100   :  { %1134 = vmatpush3.msra.mxu0 %v1404_v13 }
 0x101   :  { %1135 = vmatprep.subr.mxu0 %v1320_v3 }
 0x102   :  { %1136 = vmatpush3.msra.mxu0 %v1417_v16 }
 0x103   :  { %1137 = vmatprep.subr.mxu0 %v1320_v3 }
 0x104   :  { %1138 = vmatpush3.msra.mxu0 %v1430_v19 }
 0x105   :  { %1139 = vmatprep.subr.mxu0 %v1320_v3 }
 0x106   :  { %1140 = vmatpush3.msra.mxu0 %v1443_v22 }
 0x107   :  { %1141 = vmatprep.subr.mxu0 %v1320_v3  ;;  %v871_v24 = vpop.f32.mrf.mxu0 }
 0x108   :  { %1142 = vmatpush3.msra.mxu0 %v1456_v25 }
 0x109   :  { %1143 = vmatprep.subr.mxu0 %v1320_v3  ;;  %v872_v26 = vpop.f32.mrf.mxu0 }
 0x10a   :  { %1144 = vmatpush3.msra.mxu0 %v1469_v28  ;;  %v1728_v27 = vadd.f32 %v872_v26, %v871_v24 }
 0x10b   :  { %1145 = vmatprep.subr.mxu0 %v1320_v3  ;;  %v874_v29 = vpop.f32.mrf.mxu0 }
 0x10c   :  { %1146 = vmatpush3.msra.mxu0 %v1482_v31  ;;  %v163_v58 = vadd.f32 %v1728_v27, %v1686_v5 }
 0x10d   :  { %1147 = vmatprep.subr.mxu0 %v1320_v3  ;;  %v875_v30 = vpop.f32.mrf.mxu0 }
 0x10e   :  { %1148 = vmatpush3.msra.mxu0 %v1495_v34  ;;  %v1730_v32 = vadd.f32 %v875_v30, %v874_v29 }
 0x10f   :  { %1149 = vmatprep.subr.mxu0 %v1320_v3  ;;  %v877_v33 = vpop.f32.mrf.mxu0 }
 0x110   :  { %1150 = vmatpush3.msra.mxu0 %v1508_v37  ;;  %v168_v63 = vadd.f32 %v1730_v32, %v1686_v5 }
 0x111   :  { %1151 = vmatprep.subr.mxu0 %v1320_v3  ;;  %v878_v35 = vpop.f32.mrf.mxu0 }
 0x112   :  { %1152 = vmatpush3.msra.mxu0 %v1521_v40  ;;  %v1732_v36 = vadd.f32 %v878_v35, %v877_v33 }
 0x113   :  { %1153 = vmatprep.subr.mxu0 %v1320_v3  ;;  %v880_v38 = vpop.f32.mrf.mxu0 }
 0x114   :  { %1154 = vmatpush3.msra.mxu0 %v1541_v45 }
 0x115   :  { %1155 = vmatprep.subr.mxu0 %v1320_v3  ;;  %v881_v39 = vpop.f32.mrf.mxu0 }
 0x116   :  { %1156 = vmatpush3.msra.mxu0 %v1553_v48  ;;  %v1734_v41 = vadd.f32 %v881_v39, %v880_v38 }
 0x117   :  { %1157 = vmatprep.subr.mxu0 %v1320_v3  ;;  %v1736_v42 = vpop.f32.mrf.mxu0 }
 0x118   :  { %1158 = vmatpush3.msra.mxu0 %v1563_v50 }
 0x119   :  { %1197 = vmatprep.subr.mxu0 %v1320_v3  ;;  %v1738_v44 = vpop.f32.mrf.mxu0 }
 0x1b9   :  { %v353_v47 = vpop.f32.mrf.mxu0 }
 0x1ba   :  { %v357_v49 = vadd.f32 %v353_v47, %v153_v46 }
 0x1bb   :  { %v1091_v51 = vpop.f32.mrf.mxu0 }
 0x1bc   :  { %1306 = vtanh.f32 %v357_v49 }
 0x1c9   :  { %v1307_v52 = vpop.eup %1306 }
 0x1ca   :  { %823 = vst [vmem:[%s1914_s5 + $0x8] sm:$0xff] %v1307_v52  ;;  %1125 = vmatmul.mubr.f32.vlgmr.msra.gmra.mxu1 %v1307_v52 }
 0x1cb   :  { %1163 = vmatpush3.msra.mxu1 %v1373_v6  ;;  %1194 = vmatprep.mubr.msk.f32.mxu1 %vm1321_vm0, %v1320_v3 }
 0x1cc   :  { %1164 = vmatprep.subr.mxu1 %v1320_v3 }
 0x1cd   :  { %1165 = vmatpush3.msra.mxu1 %v1382_v8 }
 0x1ce   :  { %1166 = vmatprep.subr.mxu1 %v1320_v3 }
 0x1cf   :  { %1167 = vmatpush3.msra.mxu1 %v1391_v10 }
 0x1d0   :  { %1168 = vmatprep.subr.mxu1 %v1320_v3 }
 0x1d1   :  { %1169 = vmatpush3.msra.mxu1 %v1404_v13 }
 0x1d2   :  { %1170 = vmatprep.subr.mxu1 %v1320_v3 }
 0x1d3   :  { %1171 = vmatpush3.msra.mxu1 %v1417_v16 }
 0x1d4   :  { %1172 = vmatprep.subr.mxu1 %v1320_v3 }
 0x1d5   :  { %1173 = vmatpush3.msra.mxu1 %v1430_v19 }
 0x1d6   :  { %1174 = vmatprep.subr.mxu1 %v1320_v3 }
 0x1d7   :  { %1175 = vmatpush3.msra.mxu1 %v1443_v22 }
 0x1d8   :  { %1176 = vmatprep.subr.mxu1 %v1320_v3 }
 0x1d9   :  { %1177 = vmatpush3.msra.mxu1 %v1456_v25 }
 0x1da   :  { %1178 = vmatprep.subr.mxu1 %v1320_v3 }
 0x1db   :  { %1179 = vmatpush3.msra.mxu1 %v1469_v28 }
 0x1dc   :  { %1180 = vmatprep.subr.mxu1 %v1320_v3 }
 0x1dd   :  { %1181 = vmatpush3.msra.mxu1 %v1482_v31 }
 0x1de   :  { %1182 = vmatprep.subr.mxu1 %v1320_v3 }
 0x1df   :  { %1183 = vmatpush3.msra.mxu1 %v1495_v34 }
 0x1e0   :  { %1184 = vmatprep.subr.mxu1 %v1320_v3 }
 0x1e1   :  { %1185 = vmatpush3.msra.mxu1 %v1508_v37 }
 0x1e2   :  { %1186 = vmatprep.subr.mxu1 %v1320_v3 }
 0x1e3   :  { %1187 = vmatpush3.msra.mxu1 %v1521_v40 }
 0x1e4   :  { %1188 = vmatprep.subr.mxu1 %v1320_v3 }
 0x1e5   :  { %1189 = vmatpush3.msra.mxu1 %v1541_v45 }
 0x1e6   :  { %1190 = vmatprep.subr.mxu1 %v1320_v3 }
 0x1e7   :  { %1191 = vmatpush3.msra.mxu1 %v1553_v48 }
 0x1e8   :  { %1192 = vmatprep.subr.mxu1 %v1320_v3 }
 0x1e9   :  { %1193 = vmatpush3.msra.mxu1 %v1563_v50 }
 0x1ea   :  { %1232 = vmatprep.subr.mxu1 %v1320_v3 }
 0x28a   :  { %v429_v54 = vpop.f32.mrf.mxu1 }
 0x28b   :  { %v433_v55 = vadd.f32 %v429_v54, %v158_v53 }
 0x28c   :  { %v1126_v56 = vpop.f32.mrf.mxu1 }
 0x28d   :  { %1308 = vtanh.f32 %v433_v55 }
 0x29a   :  { %v1309_v57 = vpop.eup %1308 }
 0x29b   :  { %824 = vst [vmem:[%s1914_s5 + $0x10] sm:$0xff] %v1309_v57  ;;  %1160 = vmatmul.mubr.f32.vlgmr.msra.gmra.mxu0 %v1309_v57 }
 0x29c   :  { %1198 = vmatpush3.msra.mxu0 %v1373_v6  ;;  %1229 = vmatprep.mubr.msk.f32.mxu0 %vm1321_vm0, %v1320_v3 }
 0x29d   :  { %1199 = vmatprep.subr.mxu0 %v1320_v3 }
 0x29e   :  { %1200 = vmatpush3.msra.mxu0 %v1382_v8 }
 0x29f   :  { %1201 = vmatprep.subr.mxu0 %v1320_v3 }
 0x2a0   :  { %1202 = vmatpush3.msra.mxu0 %v1391_v10 }
 0x2a1   :  { %1203 = vmatprep.subr.mxu0 %v1320_v3 }
 0x2a2   :  { %1204 = vmatpush3.msra.mxu0 %v1404_v13 }
 0x2a3   :  { %1205 = vmatprep.subr.mxu0 %v1320_v3 }
 0x2a4   :  { %1206 = vmatpush3.msra.mxu0 %v1417_v16 }
 0x2a5   :  { %1207 = vmatprep.subr.mxu0 %v1320_v3 }
 0x2a6   :  { %1208 = vmatpush3.msra.mxu0 %v1430_v19 }
 0x2a7   :  { %1209 = vmatprep.subr.mxu0 %v1320_v3 }
 0x2a8   :  { %1210 = vmatpush3.msra.mxu0 %v1443_v22 }
 0x2a9   :  { %1211 = vmatprep.subr.mxu0 %v1320_v3 }
 0x2aa   :  { %1212 = vmatpush3.msra.mxu0 %v1456_v25 }
 0x2ab   :  { %1213 = vmatprep.subr.mxu0 %v1320_v3 }
 0x2ac   :  { %1214 = vmatpush3.msra.mxu0 %v1469_v28 }
 0x2ad   :  { %1215 = vmatprep.subr.mxu0 %v1320_v3 }
 0x2ae   :  { %1216 = vmatpush3.msra.mxu0 %v1482_v31 }
 0x2af   :  { %1217 = vmatprep.subr.mxu0 %v1320_v3 }
 0x2b0   :  { %1218 = vmatpush3.msra.mxu0 %v1495_v34 }
 0x2b1   :  { %1219 = vmatprep.subr.mxu0 %v1320_v3 }
 0x2b2   :  { %1220 = vmatpush3.msra.mxu0 %v1508_v37 }
 0x2b3   :  { %1221 = vmatprep.subr.mxu0 %v1320_v3 }
 0x2b4   :  { %1222 = vmatpush3.msra.mxu0 %v1521_v40 }
 0x2b5   :  { %1223 = vmatprep.subr.mxu0 %v1320_v3 }
 0x2b6   :  { %1224 = vmatpush3.msra.mxu0 %v1541_v45 }
 0x2b7   :  { %1225 = vmatprep.subr.mxu0 %v1320_v3 }
 0x2b8   :  { %1226 = vmatpush3.msra.mxu0 %v1553_v48 }
 0x2b9   :  { %1227 = vmatprep.subr.mxu0 %v1320_v3 }
 0x2ba   :  { %1228 = vmatpush3.msra.mxu0 %v1563_v50 }
 0x2bb   :  { %1267 = vmatprep.subr.mxu0 %v1320_v3 }
 0x35b   :  { %v505_v59 = vpop.f32.mrf.mxu0 }
 0x35c   :  { %v509_v60 = vadd.f32 %v505_v59, %v163_v58 }
 0x35d   :  { %v1161_v61 = vpop.f32.mrf.mxu0 }
 0x35e   :  { %1310 = vtanh.f32 %v509_v60 }
 0x36b   :  { %v1311_v62 = vpop.eup %1310 }
 0x36c   :  { %825 = vst [vmem:[%s1914_s5 + $0x18] sm:$0xff] %v1311_v62  ;;  %1195 = vmatmul.mubr.f32.vlgmr.msra.gmra.mxu1 %v1311_v62 }
 0x36d   :  { %1233 = vmatpush3.msra.mxu1 %v1373_v6  ;;  %1264 = vmatprep.mubr.msk.f32.mxu1 %vm1321_vm0, %v1320_v3 }
 0x36e   :  { %1234 = vmatprep.subr.mxu1 %v1320_v3 }
 0x36f   :  { %1235 = vmatpush3.msra.mxu1 %v1382_v8 }
 0x370   :  { %1236 = vmatprep.subr.mxu1 %v1320_v3 }
 0x371   :  { %1237 = vmatpush3.msra.mxu1 %v1391_v10 }
 0x372   :  { %1238 = vmatprep.subr.mxu1 %v1320_v3 }
 0x373   :  { %1239 = vmatpush3.msra.mxu1 %v1404_v13 }
 0x374   :  { %1240 = vmatprep.subr.mxu1 %v1320_v3 }
 0x375   :  { %1241 = vmatpush3.msra.mxu1 %v1417_v16 }
 0x376   :  { %1242 = vmatprep.subr.mxu1 %v1320_v3 }
 0x377   :  { %1243 = vmatpush3.msra.mxu1 %v1430_v19 }
 0x378   :  { %1244 = vmatprep.subr.mxu1 %v1320_v3 }
 0x379   :  { %1245 = vmatpush3.msra.mxu1 %v1443_v22 }
 0x37a   :  { %1246 = vmatprep.subr.mxu1 %v1320_v3 }
 0x37b   :  { %1247 = vmatpush3.msra.mxu1 %v1456_v25 }
 0x37c   :  { %1248 = vmatprep.subr.mxu1 %v1320_v3 }
 0x37d   :  { %1249 = vmatpush3.msra.mxu1 %v1469_v28 }
 0x37e   :  { %1250 = vmatprep.subr.mxu1 %v1320_v3 }
 0x37f   :  { %1251 = vmatpush3.msra.mxu1 %v1482_v31 }
 0x380   :  { %1252 = vmatprep.subr.mxu1 %v1320_v3 }
 0x381   :  { %1253 = vmatpush3.msra.mxu1 %v1495_v34 }
 0x382   :  { %1254 = vmatprep.subr.mxu1 %v1320_v3 }
 0x383   :  { %1255 = vmatpush3.msra.mxu1 %v1508_v37 }
 0x384   :  { %1256 = vmatprep.subr.mxu1 %v1320_v3 }
 0x385   :  { %1257 = vmatpush3.msra.mxu1 %v1521_v40 }
 0x386   :  { %1258 = vmatprep.subr.mxu1 %v1320_v3 }
 0x387   :  { %1259 = vmatpush3.msra.mxu1 %v1541_v45 }
 0x388   :  { %1260 = vmatprep.subr.mxu1 %v1320_v3 }
 0x389   :  { %1261 = vmatpush3.msra.mxu1 %v1553_v48 }
 0x38a   :  { %1262 = vmatprep.subr.mxu1 %v1320_v3 }
 0x38b   :  { %1263 = vmatpush3.msra.mxu1 %v1563_v50 }
 0x42c   :  { %v581_v0 = vpop.f32.mrf.mxu1 }
 0x42d   :  { %v585_v1 = vadd.f32 %v581_v0, %v168_v63 }
 0x42e   :  { %v1196_v2 = vpop.f32.mrf.mxu1 }
 0x42f   :  { %1312 = vtanh.f32 %v585_v1 }
 0x43c   :  { %v1313_v4 = vpop.eup %1312 }
 0x43d   :  { %826 = vst [vmem:[%s1914_s5 + $0x20] sm:$0xff] %v1313_v4  ;;  %1230 = vmatmul.mubr.f32.vlgmr.msra.gmra.mxu0 %v1313_v4 }
 0x43e   :  { %1268 = vmatpush3.msra.mxu0 %v1373_v6  ;;  %1299 = vmatprep.mubr.msk.f32.mxu0 %vm1321_vm0, %v1320_v3  ;;  %v173_v6 = vadd.f32 %v1732_v36, %v1686_v5 }
 0x43f   :  { %1269 = vmatprep.subr.mxu0 %v1320_v3 }
 0x440   :  { %1270 = vmatpush3.msra.mxu0 %v1382_v8 }
 0x441   :  { %1271 = vmatprep.subr.mxu0 %v1320_v3 }
 0x442   :  { %1272 = vmatpush3.msra.mxu0 %v1391_v10 }
 0x443   :  { %1273 = vmatprep.subr.mxu0 %v1320_v3 }
 0x444   :  { %1274 = vmatpush3.msra.mxu0 %v1404_v13 }
 0x445   :  { %1275 = vmatprep.subr.mxu0 %v1320_v3 }
 0x446   :  { %1276 = vmatpush3.msra.mxu0 %v1417_v16 }
 0x447   :  { %1277 = vmatprep.subr.mxu0 %v1320_v3 }
 0x448   :  { %1278 = vmatpush3.msra.mxu0 %v1430_v19  ;;  %v178_v19 = vadd.f32 %v1734_v41, %v1686_v5 }
 0x449   :  { %1279 = vmatprep.subr.mxu0 %v1320_v3 }
 0x44a   :  { %1280 = vmatpush3.msra.mxu0 %v1443_v22 }
 0x44b   :  { %1281 = vmatprep.subr.mxu0 %v1320_v3 }
 0x44c   :  { %1282 = vmatpush3.msra.mxu0 %v1456_v25 }
 0x44d   :  { %1283 = vmatprep.subr.mxu0 %v1320_v3 }
 0x44e   :  { %1284 = vmatpush3.msra.mxu0 %v1469_v28 }
 0x44f   :  { %1285 = vmatprep.subr.mxu0 %v1320_v3 }
 0x450   :  { %1286 = vmatpush3.msra.mxu0 %v1482_v31  ;;  %v885_v31 = vadd.f32 %v1738_v44, %v1736_v42 }
 0x451   :  { %1287 = vmatprep.subr.mxu0 %v1320_v3 }
 0x452   :  { %1288 = vmatpush3.msra.mxu0 %v1495_v34  ;;  %v183_v34 = vadd.f32 %v885_v31, %v1686_v5 }
 0x453   :  { %1289 = vmatprep.subr.mxu0 %v1320_v3 }
 0x454   :  { %1290 = vmatpush3.msra.mxu0 %v1508_v37 }
 0x455   :  { %1291 = vmatprep.subr.mxu0 %v1320_v3 }
 0x456   :  { %1292 = vmatpush3.msra.mxu0 %v1521_v40 }
 0x457   :  { %1293 = vmatprep.subr.mxu0 %v1320_v3 }
 0x458   :  { %1294 = vmatpush3.msra.mxu0 %v1541_v45 }
 0x459   :  { %1295 = vmatprep.subr.mxu0 %v1320_v3 }
 0x45a   :  { %1296 = vmatpush3.msra.mxu0 %v1553_v48 }
 0x45b   :  { %1297 = vmatprep.subr.mxu0 %v1320_v3 }
 0x45c   :  { %1298 = vmatpush3.msra.mxu0 %v1563_v50 }
 0x4fd   :  { %v657_v8 = vpop.f32.mrf.mxu0 }
 0x4fe   :  { %v661_v10 = vadd.f32 %v657_v8, %v173_v6 }
 0x4ff   :  { %v1231_v13 = vpop.f32.mrf.mxu0 }
 0x500   :  { %1314 = vtanh.f32 %v661_v10 }
 0x50d   :  { %v1315_v16 = vpop.eup %1314 }
 0x50e   :  { %827 = vst [vmem:[%s1914_s5 + $0x28] sm:$0xff] %v1315_v16  ;;  %1265 = vmatmul.mubr.f32.vlgmr.msra.gmra.mxu1 %v1315_v16 }
 0x5ce   :  { %v733_v22 = vpop.f32.mrf.mxu1 }
 0x5cf   :  { %v737_v3 = vadd.f32 %v733_v22, %v178_v19 }
 0x5d0   :  { %v1266_v25 = vpop.f32.mrf.mxu1 }
 0x5d1   :  { %1316 = vtanh.f32 %v737_v3 }
 0x5de   :  { %v1317_v28 = vpop.eup %1316 }
 0x5df   :  { %828 = vst [vmem:[%s1914_s5 + $0x30] sm:$0xff] %v1317_v28  ;;  %1300 = vmatmul.mubr.f32.vlgmr.msra.gmra.mxu0 %v1317_v28 }
 0x69f   :  { %v809_v37 = vpop.f32.mrf.mxu0 }
 0x6a0   :  { %v813_v40 = vadd.f32 %v809_v37, %v183_v34 }
 0x6a1   :  { %v1301_v45 = vpop.f32.mrf.mxu0 }
 0x6a2   :  { %1318 = vtanh.f32 %v813_v40 }
 0x6af   :  { %v1319_v48 = vpop.eup %1318 }
 0x6b0   :  { %829 = vst [vmem:[%s1914_s5 + $0x38] sm:$0xff] %v1319_v48 }

// kernel: _rnn_forward_impl.7
= control target key start
LH: loop header
LB: loop body
LE: loop exit
PB: predicated region body
PF: predicated region fallthrough
CT: control target
= control target key end

     0   :  { %v1387_v3 = vmov 0.0   ;;  %vm1388_vm0 = vmmov 0   ;;  %s1963_s1 = inlined_call_operand.vmem [shape: f32[256,128], index: 1, kind: input, shape index: {}]   ;;  %s1964_s0 = inlined_call_operand.vmem [shape: f32[8,8,256], index: 0, kind: input, shape index: {}]   ;;  %s1965_s2 = inlined_call_operand.vmem [shape: f32[128,128], index: 2, kind: input, shape index: {}]   ;;  %s1966_s4 = inlined_call_operand.vmem [shape: f32[8,128], index: 4, kind: input, shape index: {}]   ;;  %s1967_s3 = inlined_call_operand.vmem [shape: f32[1,128], index: 3, kind: input, shape index: {}]   ;;  %s1968_s5 = inlined_call_operand.vmem [shape: f32[8,8,128], index: 5, kind: output, shape index: {}]  }
   0x1   :  { %v112_v0 = vld [vmem:[%s1963_s1 + $0xf8] sm:$0xff]  ;;  %v111_v2 = vld [vmem:[%s1963_s1 + $0xf0] sm:$0xff]  ;;  %1089 = vmatprep.subr.mxu1 %v1387_v3  ;;  %1121 = vmatprep.mubr.msk.f32.mxu1 %vm1388_vm0, %v1387_v3  ;;  %v110_v5 = vld [vmem:[%s1963_s1 + $0xe8] sm:$0xff] }
   0x2   :  { %v96_v1 = vld [vmem:[%s1963_s1 + $0x78] sm:$0xff]  ;;  %897 = vmatprep.subr.mxu0 %v112_v0  ;;  %v95_v4 = vld [vmem:[%s1963_s1 + $0x70] sm:$0xff]  ;;  %v94_v6 = vld [vmem:[%s1963_s1 + $0x68] sm:$0xff] }
   0x3   :  { %898 = vmatpush3.msra.mxu0 %v96_v1  ;;  %v109_v7 = vld [vmem:[%s1963_s1 + $0xe0] sm:$0xff]  ;;  %v108_v9 = vld [vmem:[%s1963_s1 + $0xd8] sm:$0xff]  ;;  %v107_v11 = vld [vmem:[%s1963_s1 + $0xd0] sm:$0xff] }
   0x4   :  { %899 = vmatprep.subr.mxu0 %v111_v2  ;;  %v93_v8 = vld [vmem:[%s1963_s1 + $0x60] sm:$0xff]  ;;  %v92_v10 = vld [vmem:[%s1963_s1 + $0x58] sm:$0xff]  ;;  %v91_v12 = vld [vmem:[%s1963_s1 + $0x50] sm:$0xff] }
   0x5   :  { %900 = vmatpush3.msra.mxu0 %v95_v4  ;;  %v106_v13 = vld [vmem:[%s1963_s1 + $0xc8] sm:$0xff]  ;;  %v1470_v16 = vld [vmem:[%s1965_s2 + $0x78] sm:$0xff]  ;;  %v105_v17 = vld [vmem:[%s1963_s1 + $0xc0] sm:$0xff] }
   0x6   :  { %901 = vmatprep.subr.mxu0 %v110_v5  ;;  %v66_v14 = vld [vmem:[%s1964_s0 + $0x8] sm:$0xff]  ;;  %1090 = vmatpush3.msra.mxu1 %v1470_v16  ;;  %v1479_v18 = vld [vmem:[%s1965_s2 + $0x70] sm:$0xff]  ;;  %v89_v19 = vld [vmem:[%s1963_s1 + $0x40] sm:$0xff] }
   0x7   :  { %902 = vmatpush3.msra.mxu0 %v94_v6  ;;  %v90_v15 = vld [vmem:[%s1963_s1 + $0x48] sm:$0xff]  ;;  %184 = vmatprep.mubr.f32.mxu0 %v66_v14  ;;  %v104_v21 = vld [vmem:[%s1963_s1 + $0xb8] sm:$0xff]  ;;  %v1501_v23 = vld [vmem:[%s1965_s2 + $0x60] sm:$0xff] }
   0x8   :  { %903 = vmatprep.subr.mxu0 %v109_v7  ;;  %1091 = vmatprep.subr.mxu1 %v1387_v3  ;;  %v1488_v20 = vld [vmem:[%s1965_s2 + $0x68] sm:$0xff]  ;;  %v88_v22 = vld [vmem:[%s1963_s1 + $0x38] sm:$0xff]  ;;  %v103_v24 = vld [vmem:[%s1963_s1 + $0xb0] sm:$0xff] }
   0x9   :  { %904 = vmatpush3.msra.mxu0 %v93_v8  ;;  %1092 = vmatpush3.msra.mxu1 %v1479_v18  ;;  %v87_v25 = vld [vmem:[%s1963_s1 + $0x30] sm:$0xff]  ;;  %v1514_v26 = vld [vmem:[%s1965_s2 + $0x58] sm:$0xff]  ;;  %v102_v27 = vld [vmem:[%s1963_s1 + $0xa8] sm:$0xff] }
   0xa   :  { %905 = vmatprep.subr.mxu0 %v108_v9  ;;  %1093 = vmatprep.subr.mxu1 %v1387_v3  ;;  %v86_v28 = vld [vmem:[%s1963_s1 + $0x28] sm:$0xff]  ;;  %v1527_v29 = vld [vmem:[%s1965_s2 + $0x50] sm:$0xff]  ;;  %v101_v30 = vld [vmem:[%s1963_s1 + $0xa0] sm:$0xff] }
   0xb   :  { %906 = vmatpush3.msra.mxu0 %v92_v10  ;;  %1094 = vmatpush3.msra.mxu1 %v1488_v20  ;;  %v85_v31 = vld [vmem:[%s1963_s1 + $0x20] sm:$0xff]  ;;  %v1540_v32 = vld [vmem:[%s1965_s2 + $0x48] sm:$0xff]  ;;  %v100_v33 = vld [vmem:[%s1963_s1 + $0x98] sm:$0xff] }
   0xc   :  { %907 = vmatprep.subr.mxu0 %v107_v11  ;;  %1095 = vmatprep.subr.mxu1 %v1387_v3  ;;  %v84_v34 = vld [vmem:[%s1963_s1 + $0x18] sm:$0xff]  ;;  %v1553_v35 = vld [vmem:[%s1965_s2 + $0x40] sm:$0xff]  ;;  %v99_v36 = vld [vmem:[%s1963_s1 + $0x90] sm:$0xff] }
   0xd   :  { %908 = vmatpush3.msra.mxu0 %v91_v12  ;;  %1096 = vmatpush3.msra.mxu1 %v1501_v23  ;;  %v83_v37 = vld [vmem:[%s1963_s1 + $0x10] sm:$0xff]  ;;  %v1566_v38 = vld [vmem:[%s1965_s2 + $0x38] sm:$0xff]  ;;  %v98_v39 = vld [vmem:[%s1963_s1 + $0x88] sm:$0xff] }
   0xe   :  { %909 = vmatprep.subr.mxu0 %v106_v13  ;;  %1097 = vmatprep.subr.mxu1 %v1387_v3  ;;  %v82_v40 = vld [vmem:[%s1963_s1 + $0x8] sm:$0xff]  ;;  %v1579_v41 = vld [vmem:[%s1965_s2 + $0x30] sm:$0xff]  ;;  %v97_v42 = vld [vmem:[%s1963_s1 + $0x80] sm:$0xff] }
   0xf   :  { %910 = vmatpush3.msra.mxu0 %v90_v15  ;;  %1098 = vmatpush3.msra.mxu1 %v1514_v26  ;;  %v81_v43 = vld [vmem:[%s1963_s1] sm:$0xff]  ;;  %v1592_v44 = vld [vmem:[%s1965_s2 + $0x28] sm:$0xff]  ;;  %v68_v46 = vld [vmem:[%s1964_s0 + $0x18] sm:$0xff] }
  0x10   :  { %911 = vmatprep.subr.mxu0 %v105_v17  ;;  %1099 = vmatprep.subr.mxu1 %v1387_v3  ;;  %v65_v45 = vld [vmem:[%s1964_s0] sm:$0xff]  ;;  %v1612_v48 = vld [vmem:[%s1965_s2 + $0x18] sm:$0xff]  ;;  %v67_v49 = vld [vmem:[%s1964_s0 + $0x10] sm:$0xff] }
  0x11   :  { %912 = vmatpush3.msra.mxu0 %v89_v19  ;;  %1100 = vmatpush3.msra.mxu1 %v1527_v29  ;;  %v1605_v47 = vld [vmem:[%s1965_s2 + $0x20] sm:$0xff]  ;;  %v70_v50 = vld [vmem:[%s1964_s0 + $0x28] sm:$0xff]  ;;  %v1625_v51 = vld [vmem:[%s1965_s2 + $0x10] sm:$0xff] }
  0x12   :  { %913 = vmatprep.subr.mxu0 %v104_v21  ;;  %1101 = vmatprep.subr.mxu1 %v1387_v3  ;;  %v1634_v52 = vld [vmem:[%s1965_s2 + $0x8] sm:$0xff]  ;;  %v69_v53 = vld [vmem:[%s1964_s0 + $0x20] sm:$0xff]  ;;  %v72_v54 = vld [vmem:[%s1964_s0 + $0x38] sm:$0xff] }
  0x13   :  { %914 = vmatpush3.msra.mxu0 %v88_v22  ;;  %1102 = vmatpush3.msra.mxu1 %v1540_v32  ;;  %v1647_v55 = vld [vmem:[%s1965_s2] sm:$0xff]  ;;  %v71_v57 = vld [vmem:[%s1964_s0 + $0x30] sm:$0xff]  ;;  %v74_v58 = vld [vmem:[%s1964_s0 + $0x48] sm:$0xff] }
  0x14   :  { %915 = vmatprep.subr.mxu0 %v103_v24  ;;  %1103 = vmatprep.subr.mxu1 %v1387_v3  ;;  %v63_v56 = vld [vmem:[%s1966_s4] sm:$0xff]  ;;  %v76_v60 = vld [vmem:[%s1964_s0 + $0x58] sm:$0xff]  ;;  %v75_v61 = vld [vmem:[%s1964_s0 + $0x50] sm:$0xff] }
  0x15   :  { %916 = vmatpush3.msra.mxu0 %v87_v25  ;;  %1104 = vmatpush3.msra.mxu1 %v1553_v35  ;;  %v73_v59 = vld [vmem:[%s1964_s0 + $0x40] sm:$0xff]  ;;  %v78_v62 = vld [vmem:[%s1964_s0 + $0x68] sm:$0xff]  ;;  %v80_v0 = vld [vmem:[%s1964_s0 + $0x78] sm:$0xff] }
  0x16   :  { %917 = vmatprep.subr.mxu0 %v102_v27  ;;  %1105 = vmatprep.subr.mxu1 %v1387_v3  ;;  %v77_v63 = vld [vmem:[%s1964_s0 + $0x60] sm:$0xff]  ;;  %v79_v1 = vld [vmem:[%s1964_s0 + $0x70] sm:$0xff] }
  0x17   :  { %918 = vmatpush3.msra.mxu0 %v86_v28  ;;  %1106 = vmatpush3.msra.mxu1 %v1566_v38  ;;  %v889_v5 = vld [vmem:[%s1967_s3] ss:$0 sm:$0xff] }
  0x18   :  { %919 = vmatprep.subr.mxu0 %v101_v30  ;;  %1107 = vmatprep.subr.mxu1 %v1387_v3 }
  0x19   :  { %920 = vmatpush3.msra.mxu0 %v85_v31  ;;  %1108 = vmatpush3.msra.mxu1 %v1579_v41 }
  0x1a   :  { %921 = vmatprep.subr.mxu0 %v100_v33  ;;  %1109 = vmatprep.subr.mxu1 %v1387_v3 }
  0x1b   :  { %922 = vmatpush3.msra.mxu0 %v84_v34  ;;  %1110 = vmatpush3.msra.mxu1 %v1592_v44 }
  0x1c   :  { %923 = vmatprep.subr.mxu0 %v99_v36  ;;  %1111 = vmatprep.subr.mxu1 %v1387_v3 }
  0x1d   :  { %924 = vmatpush3.msra.mxu0 %v83_v37  ;;  %1112 = vmatpush3.msra.mxu1 %v1605_v47 }
  0x1e   :  { %925 = vmatprep.subr.mxu0 %v98_v39  ;;  %1113 = vmatprep.subr.mxu1 %v1387_v3 }
  0x1f   :  { %926 = vmatpush3.msra.mxu0 %v82_v40  ;;  %1114 = vmatpush3.msra.mxu1 %v1612_v48 }
  0x20   :  { %927 = vmatprep.subr.mxu0 %v97_v42  ;;  %1115 = vmatprep.subr.mxu1 %v1387_v3 }
  0x21   :  { %928 = vmatpush3.msra.mxu0 %v81_v43  ;;  %1116 = vmatpush3.msra.mxu1 %v1625_v51 }
  0x22   :  { %185 = vmatmul.mubr.f32.vlgmr.msra.gmra.mxu0 %v65_v45  ;;  %1124 = vmatprep.subr.mxu0 %v1387_v3 }
  0x23   :  { %189 = vmatprep.mubr.f32.mxu0 %v68_v46  ;;  %1125 = vmatpush3.msra.mxu0 %v1470_v16 }
  0x24   :  { %1117 = vmatprep.subr.mxu1 %v1387_v3  ;;  %1126 = vmatprep.subr.mxu0 %v1387_v3 }
  0x25   :  { %1118 = vmatpush3.msra.mxu1 %v1634_v52  ;;  %1127 = vmatpush3.msra.mxu0 %v1479_v18 }
  0x26   :  { %190 = vmatmul.mubr.f32.gmra.mxu0 %v67_v49  ;;  %1119 = vmatprep.subr.mxu1 %v1387_v3 }
  0x27   :  { %194 = vmatprep.mubr.f32.mxu0 %v70_v50  ;;  %1120 = vmatpush3.msra.mxu1 %v1647_v55 }
  0x28   :  { %1122 = vmatmul.mubr.f32.vlgmr.msra.gmra.mxu1 %v63_v56  ;;  %1128 = vmatprep.subr.mxu0 %v1387_v3 }
  0x29   :  { %1129 = vmatpush3.msra.mxu0 %v1488_v20  ;;  %1159 = vmatprep.subr.mxu1 %v1387_v3 }
  0x2a   :  { %195 = vmatmul.mubr.f32.gmra.mxu0 %v69_v53  ;;  %1130 = vmatprep.subr.mxu0 %v1387_v3 }
  0x2b   :  { %199 = vmatprep.mubr.f32.mxu0 %v72_v54  ;;  %1131 = vmatpush3.msra.mxu0 %v1501_v23 }
  0x2c   :  { %1132 = vmatprep.subr.mxu0 %v1387_v3  ;;  %1160 = vmatpush3.msra.mxu1 %v1470_v16 }
  0x2d   :  { %1133 = vmatpush3.msra.mxu0 %v1514_v26  ;;  %1161 = vmatprep.subr.mxu1 %v1387_v3 }
  0x2e   :  { %200 = vmatmul.mubr.f32.gmra.mxu0 %v71_v57  ;;  %1134 = vmatprep.subr.mxu0 %v1387_v3 }
  0x2f   :  { %204 = vmatprep.mubr.f32.mxu0 %v74_v58  ;;  %1135 = vmatpush3.msra.mxu0 %v1527_v29 }
  0x30   :  { %1136 = vmatprep.subr.mxu0 %v1387_v3  ;;  %1162 = vmatpush3.msra.mxu1 %v1479_v18 }
  0x31   :  { %1137 = vmatpush3.msra.mxu0 %v1540_v32  ;;  %1163 = vmatprep.subr.mxu1 %v1387_v3 }
  0x32   :  { %205 = vmatmul.mubr.f32.gmra.mxu0 %v73_v59  ;;  %1138 = vmatprep.subr.mxu0 %v1387_v3 }
  0x33   :  { %209 = vmatprep.mubr.f32.mxu0 %v76_v60  ;;  %1139 = vmatpush3.msra.mxu0 %v1553_v35 }
  0x34   :  { %1140 = vmatprep.subr.mxu0 %v1387_v3  ;;  %1164 = vmatpush3.msra.mxu1 %v1488_v20 }
  0x35   :  { %1141 = vmatpush3.msra.mxu0 %v1566_v38  ;;  %1165 = vmatprep.subr.mxu1 %v1387_v3 }
  0x36   :  { %210 = vmatmul.mubr.f32.gmra.mxu0 %v75_v61  ;;  %1142 = vmatprep.subr.mxu0 %v1387_v3 }
  0x37   :  { %214 = vmatprep.mubr.f32.mxu0 %v78_v62  ;;  %1143 = vmatpush3.msra.mxu0 %v1579_v41 }
  0x38   :  { %1144 = vmatprep.subr.mxu0 %v1387_v3  ;;  %1166 = vmatpush3.msra.mxu1 %v1501_v23 }
  0x39   :  { %1145 = vmatpush3.msra.mxu0 %v1592_v44  ;;  %1167 = vmatprep.subr.mxu1 %v1387_v3 }
  0x3a   :  { %215 = vmatmul.mubr.f32.gmra.mxu0 %v77_v63  ;;  %1146 = vmatprep.subr.mxu0 %v1387_v3 }
  0x3b   :  { %219 = vmatprep.mubr.f32.mxu0 %v80_v0  ;;  %1147 = vmatpush3.msra.mxu0 %v1605_v47 }
  0x3c   :  { %1148 = vmatprep.subr.mxu0 %v1387_v3  ;;  %1168 = vmatpush3.msra.mxu1 %v1514_v26 }
  0x3d   :  { %1149 = vmatpush3.msra.mxu0 %v1612_v48  ;;  %1169 = vmatprep.subr.mxu1 %v1387_v3 }
  0x3e   :  { %220 = vmatmul.mubr.f32.gmra.mxu0 %v79_v1  ;;  %1150 = vmatprep.subr.mxu0 %v1387_v3 }
  0x3f   :  { %1156 = vmatprep.mubr.msk.f32.mxu0 %vm1388_vm0, %v1387_v3  ;;  %1170 = vmatpush3.msra.mxu1 %v1527_v29 }
  0x40   :  { %1151 = vmatpush3.msra.mxu0 %v1625_v51  ;;  %1171 = vmatprep.subr.mxu1 %v1387_v3 }
  0x41   :  { %1152 = vmatprep.subr.mxu0 %v1387_v3  ;;  %1172 = vmatpush3.msra.mxu1 %v1540_v32 }
  0x42   :  { %1153 = vmatpush3.msra.mxu0 %v1634_v52  ;;  %1173 = vmatprep.subr.mxu1 %v1387_v3 }
  0x43   :  { %1154 = vmatprep.subr.mxu0 %v1387_v3  ;;  %1174 = vmatpush3.msra.mxu1 %v1553_v35 }
  0x44   :  { %1155 = vmatpush3.msra.mxu0 %v1647_v55  ;;  %1175 = vmatprep.subr.mxu1 %v1387_v3 }
  0x45   :  { %1176 = vmatpush3.msra.mxu1 %v1566_v38  ;;  %1191 = vmatprep.mubr.msk.f32.mxu1 %vm1388_vm0, %v1387_v3 }
  0x46   :  { %1177 = vmatprep.subr.mxu1 %v1387_v3  ;;  %1194 = vmatprep.subr.mxu0 %v1387_v3 }
  0x47   :  { %1178 = vmatpush3.msra.mxu1 %v1579_v41 }
  0x48   :  { %1179 = vmatprep.subr.mxu1 %v1387_v3 }
  0x49   :  { %1180 = vmatpush3.msra.mxu1 %v1592_v44 }
  0x4a   :  { %1181 = vmatprep.subr.mxu1 %v1387_v3 }
  0x4b   :  { %1182 = vmatpush3.msra.mxu1 %v1605_v47 }
  0x4c   :  { %1183 = vmatprep.subr.mxu1 %v1387_v3 }
  0x4d   :  { %1184 = vmatpush3.msra.mxu1 %v1612_v48 }
  0x4e   :  { %1185 = vmatprep.subr.mxu1 %v1387_v3 }
  0x4f   :  { %1186 = vmatpush3.msra.mxu1 %v1625_v51 }
  0x50   :  { %1187 = vmatprep.subr.mxu1 %v1387_v3 }
  0x51   :  { %1188 = vmatpush3.msra.mxu1 %v1634_v52 }
  0x52   :  { %1189 = vmatprep.subr.mxu1 %v1387_v3 }
  0x53   :  { %1190 = vmatpush3.msra.mxu1 %v1647_v55 }
  0x54   :  { %1229 = vmatprep.subr.mxu1 %v1387_v3 }
  0xe2   :  { %v929_v2 = vpop.f32.mrf.mxu0 }
  0xe4   :  { %v930_v4 = vpop.f32.mrf.mxu0 }
  0xe5   :  { %v931_v6 = vadd.f32 %v930_v4, %v929_v2 }
  0xe6   :  { %v932_v7 = vpop.f32.mrf.mxu0 }
  0xe7   :  { %v1753_v8 = vadd.f32 %v931_v6, %v889_v5 }
  0xe8   :  { %v933_v9 = vpop.f32.mrf.mxu0  ;;  %v318_v14 = vpop.f32.mrf.mxu1 }
  0xe9   :  { %v934_v10 = vadd.f32 %v933_v9, %v932_v7 }
  0xea   :  { %v935_v11 = vpop.f32.mrf.mxu0  ;;  %v1123_v19 = vpop.f32.mrf.mxu1 }
  0xeb   :  { %v1755_v12 = vadd.f32 %v934_v10, %v889_v5 }
  0xec   :  { %v936_v13 = vpop.f32.mrf.mxu0 }
  0xed   :  { %v937_v15 = vadd.f32 %v936_v13, %v935_v11 }
  0xee   :  { %v938_v17 = vpop.f32.mrf.mxu0 }
  0xef   :  { %v1757_v21 = vadd.f32 %v937_v15, %v889_v5 }
  0xf0   :  { %v939_v22 = vpop.f32.mrf.mxu0 }
  0xf1   :  { %v940_v24 = vadd.f32 %v939_v22, %v938_v17 }
  0xf2   :  { %v941_v25 = vpop.f32.mrf.mxu0 }
  0xf3   :  { %v1759_v27 = vadd.f32 %v940_v24, %v889_v5 }
  0xf4   :  { %v942_v28 = vpop.f32.mrf.mxu0 }
  0xf5   :  { %v943_v30 = vadd.f32 %v942_v28, %v941_v25 }
  0xf6   :  { %v944_v31 = vpop.f32.mrf.mxu0 }
  0xf7   :  { %v1761_v33 = vadd.f32 %v943_v30, %v889_v5 }
  0xf8   :  { %v945_v34 = vpop.f32.mrf.mxu0 }
  0xf9   :  { %v946_v36 = vadd.f32 %v945_v34, %v944_v31 }
  0xfa   :  { %v947_v37 = vpop.f32.mrf.mxu0 }
  0xfb   :  { %v1763_v39 = vadd.f32 %v946_v36, %v889_v5 }
  0xfc   :  { %v948_v40 = vpop.f32.mrf.mxu0 }
  0xfd   :  { %v949_v42 = vadd.f32 %v948_v40, %v947_v37 }
  0xfe   :  { %v950_v43 = vpop.f32.mrf.mxu0 }
  0xff   :  { %v217_v45 = vadd.f32 %v949_v42, %v889_v5 }
 0x100   :  { %v951_v46 = vpop.f32.mrf.mxu0 }
 0x101   :  { %v952_v49 = vadd.f32 %v951_v46, %v950_v43 }
 0x103   :  { %v222_v50 = vadd.f32 %v952_v49, %v889_v5 }
 0x105   :  { %v322_v53 = vadd.f32 %v318_v14, %v222_v50 }
 0x107   :  { %1371 = vtanh.f32 %v322_v53 }
 0x114   :  { %v1372_v54 = vpop.eup %1371 }
 0x115   :  { %890 = vst [vmem:[%s1968_s5 + $0x38] sm:$0xff] %v1372_v54  ;;  %1157 = vmatmul.mubr.f32.vlgmr.msra.gmra.mxu0 %v1372_v54 }
 0x116   :  { %1195 = vmatpush3.msra.mxu0 %v1470_v16  ;;  %1226 = vmatprep.mubr.msk.f32.mxu0 %vm1388_vm0, %v1387_v3 }
 0x117   :  { %1196 = vmatprep.subr.mxu0 %v1387_v3 }
 0x118   :  { %1197 = vmatpush3.msra.mxu0 %v1479_v18 }
 0x119   :  { %1198 = vmatprep.subr.mxu0 %v1387_v3 }
 0x11a   :  { %1199 = vmatpush3.msra.mxu0 %v1488_v20 }
 0x11b   :  { %1200 = vmatprep.subr.mxu0 %v1387_v3 }
 0x11c   :  { %1201 = vmatpush3.msra.mxu0 %v1501_v23 }
 0x11d   :  { %1202 = vmatprep.subr.mxu0 %v1387_v3 }
 0x11e   :  { %1203 = vmatpush3.msra.mxu0 %v1514_v26 }
 0x11f   :  { %1204 = vmatprep.subr.mxu0 %v1387_v3 }
 0x120   :  { %1205 = vmatpush3.msra.mxu0 %v1527_v29 }
 0x121   :  { %1206 = vmatprep.subr.mxu0 %v1387_v3 }
 0x122   :  { %1207 = vmatpush3.msra.mxu0 %v1540_v32 }
 0x123   :  { %1208 = vmatprep.subr.mxu0 %v1387_v3 }
 0x124   :  { %1209 = vmatpush3.msra.mxu0 %v1553_v35 }
 0x125   :  { %1210 = vmatprep.subr.mxu0 %v1387_v3 }
 0x126   :  { %1211 = vmatpush3.msra.mxu0 %v1566_v38 }
 0x127   :  { %1212 = vmatprep.subr.mxu0 %v1387_v3 }
 0x128   :  { %1213 = vmatpush3.msra.mxu0 %v1579_v41 }
 0x129   :  { %1214 = vmatprep.subr.mxu0 %v1387_v3 }
 0x12a   :  { %1215 = vmatpush3.msra.mxu0 %v1592_v44 }
 0x12b   :  { %1216 = vmatprep.subr.mxu0 %v1387_v3 }
 0x12c   :  { %1217 = vmatpush3.msra.mxu0 %v1605_v47 }
 0x12d   :  { %1218 = vmatprep.subr.mxu0 %v1387_v3 }
 0x12e   :  { %1219 = vmatpush3.msra.mxu0 %v1612_v48 }
 0x12f   :  { %1220 = vmatprep.subr.mxu0 %v1387_v3 }
 0x130   :  { %1221 = vmatpush3.msra.mxu0 %v1625_v51 }
 0x131   :  { %1222 = vmatprep.subr.mxu0 %v1387_v3 }
 0x132   :  { %1223 = vmatpush3.msra.mxu0 %v1634_v52 }
 0x133   :  { %1224 = vmatprep.subr.mxu0 %v1387_v3 }
 0x134   :  { %1225 = vmatpush3.msra.mxu0 %v1647_v55 }
 0x135   :  { %1264 = vmatprep.subr.mxu0 %v1387_v3 }
 0x1d5   :  { %v394_v56 = vpop.f32.mrf.mxu0 }
 0x1d6   :  { %v398_v57 = vadd.f32 %v394_v56, %v217_v45 }
 0x1d7   :  { %v1158_v58 = vpop.f32.mrf.mxu0 }
 0x1d8   :  { %1373 = vtanh.f32 %v398_v57 }
 0x1e5   :  { %v1374_v59 = vpop.eup %1373 }
 0x1e6   :  { %891 = vst [vmem:[%s1968_s5 + $0x30] sm:$0xff] %v1374_v59  ;;  %1192 = vmatmul.mubr.f32.vlgmr.msra.gmra.mxu1 %v1374_v59 }
 0x1e7   :  { %1230 = vmatpush3.msra.mxu1 %v1470_v16  ;;  %1261 = vmatprep.mubr.msk.f32.mxu1 %vm1388_vm0, %v1387_v3 }
 0x1e8   :  { %1231 = vmatprep.subr.mxu1 %v1387_v3 }
 0x1e9   :  { %1232 = vmatpush3.msra.mxu1 %v1479_v18 }
 0x1ea   :  { %1233 = vmatprep.subr.mxu1 %v1387_v3 }
 0x1eb   :  { %1234 = vmatpush3.msra.mxu1 %v1488_v20 }
 0x1ec   :  { %1235 = vmatprep.subr.mxu1 %v1387_v3 }
 0x1ed   :  { %1236 = vmatpush3.msra.mxu1 %v1501_v23 }
 0x1ee   :  { %1237 = vmatprep.subr.mxu1 %v1387_v3 }
 0x1ef   :  { %1238 = vmatpush3.msra.mxu1 %v1514_v26 }
 0x1f0   :  { %1239 = vmatprep.subr.mxu1 %v1387_v3 }
 0x1f1   :  { %1240 = vmatpush3.msra.mxu1 %v1527_v29 }
 0x1f2   :  { %1241 = vmatprep.subr.mxu1 %v1387_v3 }
 0x1f3   :  { %1242 = vmatpush3.msra.mxu1 %v1540_v32 }
 0x1f4   :  { %1243 = vmatprep.subr.mxu1 %v1387_v3 }
 0x1f5   :  { %1244 = vmatpush3.msra.mxu1 %v1553_v35 }
 0x1f6   :  { %1245 = vmatprep.subr.mxu1 %v1387_v3 }
 0x1f7   :  { %1246 = vmatpush3.msra.mxu1 %v1566_v38 }
 0x1f8   :  { %1247 = vmatprep.subr.mxu1 %v1387_v3 }
 0x1f9   :  { %1248 = vmatpush3.msra.mxu1 %v1579_v41 }
 0x1fa   :  { %1249 = vmatprep.subr.mxu1 %v1387_v3 }
 0x1fb   :  { %1250 = vmatpush3.msra.mxu1 %v1592_v44 }
 0x1fc   :  { %1251 = vmatprep.subr.mxu1 %v1387_v3 }
 0x1fd   :  { %1252 = vmatpush3.msra.mxu1 %v1605_v47 }
 0x1fe   :  { %1253 = vmatprep.subr.mxu1 %v1387_v3 }
 0x1ff   :  { %1254 = vmatpush3.msra.mxu1 %v1612_v48 }
 0x200   :  { %1255 = vmatprep.subr.mxu1 %v1387_v3 }
 0x201   :  { %1256 = vmatpush3.msra.mxu1 %v1625_v51 }
 0x202   :  { %1257 = vmatprep.subr.mxu1 %v1387_v3 }
 0x203   :  { %1258 = vmatpush3.msra.mxu1 %v1634_v52 }
 0x204   :  { %1259 = vmatprep.subr.mxu1 %v1387_v3 }
 0x205   :  { %1260 = vmatpush3.msra.mxu1 %v1647_v55 }
 0x206   :  { %1299 = vmatprep.subr.mxu1 %v1387_v3 }
 0x2a6   :  { %v470_v60 = vpop.f32.mrf.mxu1 }
 0x2a7   :  { %v474_v61 = vadd.f32 %v470_v60, %v1763_v39 }
 0x2a8   :  { %v1193_v62 = vpop.f32.mrf.mxu1 }
 0x2a9   :  { %1375 = vtanh.f32 %v474_v61 }
 0x2b6   :  { %v1376_v63 = vpop.eup %1375 }
 0x2b7   :  { %892 = vst [vmem:[%s1968_s5 + $0x28] sm:$0xff] %v1376_v63  ;;  %1227 = vmatmul.mubr.f32.vlgmr.msra.gmra.mxu0 %v1376_v63 }
 0x2b8   :  { %1265 = vmatpush3.msra.mxu0 %v1470_v16  ;;  %1296 = vmatprep.mubr.msk.f32.mxu0 %vm1388_vm0, %v1387_v3 }
 0x2b9   :  { %1266 = vmatprep.subr.mxu0 %v1387_v3 }
 0x2ba   :  { %1267 = vmatpush3.msra.mxu0 %v1479_v18 }
 0x2bb   :  { %1268 = vmatprep.subr.mxu0 %v1387_v3 }
 0x2bc   :  { %1269 = vmatpush3.msra.mxu0 %v1488_v20 }
 0x2bd   :  { %1270 = vmatprep.subr.mxu0 %v1387_v3 }
 0x2be   :  { %1271 = vmatpush3.msra.mxu0 %v1501_v23 }
 0x2bf   :  { %1272 = vmatprep.subr.mxu0 %v1387_v3 }
 0x2c0   :  { %1273 = vmatpush3.msra.mxu0 %v1514_v26 }
 0x2c1   :  { %1274 = vmatprep.subr.mxu0 %v1387_v3 }
 0x2c2   :  { %1275 = vmatpush3.msra.mxu0 %v1527_v29 }
 0x2c3   :  { %1276 = vmatprep.subr.mxu0 %v1387_v3 }
 0x2c4   :  { %1277 = vmatpush3.msra.mxu0 %v1540_v32 }
 0x2c5   :  { %1278 = vmatprep.subr.mxu0 %v1387_v3 }
 0x2c6   :  { %1279 = vmatpush3.msra.mxu0 %v1553_v35 }
 0x2c7   :  { %1280 = vmatprep.subr.mxu0 %v1387_v3 }
 0x2c8   :  { %1281 = vmatpush3.msra.mxu0 %v1566_v38 }
 0x2c9   :  { %1282 = vmatprep.subr.mxu0 %v1387_v3 }
 0x2ca   :  { %1283 = vmatpush3.msra.mxu0 %v1579_v41 }
 0x2cb   :  { %1284 = vmatprep.subr.mxu0 %v1387_v3 }
 0x2cc   :  { %1285 = vmatpush3.msra.mxu0 %v1592_v44 }
 0x2cd   :  { %1286 = vmatprep.subr.mxu0 %v1387_v3 }
 0x2ce   :  { %1287 = vmatpush3.msra.mxu0 %v1605_v47 }
 0x2cf   :  { %1288 = vmatprep.subr.mxu0 %v1387_v3 }
 0x2d0   :  { %1289 = vmatpush3.msra.mxu0 %v1612_v48 }
 0x2d1   :  { %1290 = vmatprep.subr.mxu0 %v1387_v3 }
 0x2d2   :  { %1291 = vmatpush3.msra.mxu0 %v1625_v51 }
 0x2d3   :  { %1292 = vmatprep.subr.mxu0 %v1387_v3 }
 0x2d4   :  { %1293 = vmatpush3.msra.mxu0 %v1634_v52 }
 0x2d5   :  { %1294 = vmatprep.subr.mxu0 %v1387_v3 }
 0x2d6   :  { %1295 = vmatpush3.msra.mxu0 %v1647_v55 }
 0x2d7   :  { %1334 = vmatprep.subr.mxu0 %v1387_v3 }
 0x377   :  { %v546_v0 = vpop.f32.mrf.mxu0 }
 0x378   :  { %v550_v1 = vadd.f32 %v546_v0, %v1761_v33 }
 0x379   :  { %v1228_v2 = vpop.f32.mrf.mxu0 }
 0x37a   :  { %1377 = vtanh.f32 %v550_v1 }
 0x387   :  { %v1378_v4 = vpop.eup %1377 }
 0x388   :  { %893 = vst [vmem:[%s1968_s5 + $0x20] sm:$0xff] %v1378_v4  ;;  %1262 = vmatmul.mubr.f32.vlgmr.msra.gmra.mxu1 %v1378_v4 }
 0x389   :  { %1300 = vmatpush3.msra.mxu1 %v1470_v16  ;;  %1331 = vmatprep.mubr.msk.f32.mxu1 %vm1388_vm0, %v1387_v3 }
 0x38a   :  { %1301 = vmatprep.subr.mxu1 %v1387_v3 }
 0x38b   :  { %1302 = vmatpush3.msra.mxu1 %v1479_v18 }
 0x38c   :  { %1303 = vmatprep.subr.mxu1 %v1387_v3 }
 0x38d   :  { %1304 = vmatpush3.msra.mxu1 %v1488_v20 }
 0x38e   :  { %1305 = vmatprep.subr.mxu1 %v1387_v3 }
 0x38f   :  { %1306 = vmatpush3.msra.mxu1 %v1501_v23 }
 0x390   :  { %1307 = vmatprep.subr.mxu1 %v1387_v3 }
 0x391   :  { %1308 = vmatpush3.msra.mxu1 %v1514_v26 }
 0x392   :  { %1309 = vmatprep.subr.mxu1 %v1387_v3 }
 0x393   :  { %1310 = vmatpush3.msra.mxu1 %v1527_v29 }
 0x394   :  { %1311 = vmatprep.subr.mxu1 %v1387_v3 }
 0x395   :  { %1312 = vmatpush3.msra.mxu1 %v1540_v32 }
 0x396   :  { %1313 = vmatprep.subr.mxu1 %v1387_v3 }
 0x397   :  { %1314 = vmatpush3.msra.mxu1 %v1553_v35 }
 0x398   :  { %1315 = vmatprep.subr.mxu1 %v1387_v3 }
 0x399   :  { %1316 = vmatpush3.msra.mxu1 %v1566_v38 }
 0x39a   :  { %1317 = vmatprep.subr.mxu1 %v1387_v3 }
 0x39b   :  { %1318 = vmatpush3.msra.mxu1 %v1579_v41 }
 0x39c   :  { %1319 = vmatprep.subr.mxu1 %v1387_v3 }
 0x39d   :  { %1320 = vmatpush3.msra.mxu1 %v1592_v44 }
 0x39e   :  { %1321 = vmatprep.subr.mxu1 %v1387_v3 }
 0x39f   :  { %1322 = vmatpush3.msra.mxu1 %v1605_v47 }
 0x3a0   :  { %1323 = vmatprep.subr.mxu1 %v1387_v3 }
 0x3a1   :  { %1324 = vmatpush3.msra.mxu1 %v1612_v48 }
 0x3a2   :  { %1325 = vmatprep.subr.mxu1 %v1387_v3 }
 0x3a3   :  { %1326 = vmatpush3.msra.mxu1 %v1625_v51 }
 0x3a4   :  { %1327 = vmatprep.subr.mxu1 %v1387_v3 }
 0x3a5   :  { %1328 = vmatpush3.msra.mxu1 %v1634_v52 }
 0x3a6   :  { %1329 = vmatprep.subr.mxu1 %v1387_v3 }
 0x3a7   :  { %1330 = vmatpush3.msra.mxu1 %v1647_v55 }
 0x448   :  { %v622_v5 = vpop.f32.mrf.mxu1 }
 0x449   :  { %v626_v6 = vadd.f32 %v622_v5, %v1759_v27 }
 0x44a   :  { %v1263_v7 = vpop.f32.mrf.mxu1 }
 0x44b   :  { %1379 = vtanh.f32 %v626_v6 }
 0x458   :  { %v1380_v9 = vpop.eup %1379 }
 0x459   :  { %894 = vst [vmem:[%s1968_s5 + $0x18] sm:$0xff] %v1380_v9  ;;  %1297 = vmatmul.mubr.f32.vlgmr.msra.gmra.mxu0 %v1380_v9 }
 0x45a   :  { %1335 = vmatpush3.msra.mxu0 %v1470_v16  ;;  %1366 = vmatprep.mubr.msk.f32.mxu0 %vm1388_vm0, %v1387_v3 }
 0x45b   :  { %1336 = vmatprep.subr.mxu0 %v1387_v3 }
 0x45c   :  { %1337 = vmatpush3.msra.mxu0 %v1479_v18 }
 0x45d   :  { %1338 = vmatprep.subr.mxu0 %v1387_v3 }
 0x45e   :  { %1339 = vmatpush3.msra.mxu0 %v1488_v20 }
 0x45f   :  { %1340 = vmatprep.subr.mxu0 %v1387_v3 }
 0x460   :  { %1341 = vmatpush3.msra.mxu0 %v1501_v23 }
 0x461   :  { %1342 = vmatprep.subr.mxu0 %v1387_v3 }
 0x462   :  { %1343 = vmatpush3.msra.mxu0 %v1514_v26 }
 0x463   :  { %1344 = vmatprep.subr.mxu0 %v1387_v3 }
 0x464   :  { %1345 = vmatpush3.msra.mxu0 %v1527_v29 }
 0x465   :  { %1346 = vmatprep.subr.mxu0 %v1387_v3 }
 0x466   :  { %1347 = vmatpush3.msra.mxu0 %v1540_v32 }
 0x467   :  { %1348 = vmatprep.subr.mxu0 %v1387_v3 }
 0x468   :  { %1349 = vmatpush3.msra.mxu0 %v1553_v35 }
 0x469   :  { %1350 = vmatprep.subr.mxu0 %v1387_v3 }
 0x46a   :  { %1351 = vmatpush3.msra.mxu0 %v1566_v38 }
 0x46b   :  { %1352 = vmatprep.subr.mxu0 %v1387_v3 }
 0x46c   :  { %1353 = vmatpush3.msra.mxu0 %v1579_v41 }
 0x46d   :  { %1354 = vmatprep.subr.mxu0 %v1387_v3 }
 0x46e   :  { %1355 = vmatpush3.msra.mxu0 %v1592_v44 }
 0x46f   :  { %1356 = vmatprep.subr.mxu0 %v1387_v3 }
 0x470   :  { %1357 = vmatpush3.msra.mxu0 %v1605_v47 }
 0x471   :  { %1358 = vmatprep.subr.mxu0 %v1387_v3 }
 0x472   :  { %1359 = vmatpush3.msra.mxu0 %v1612_v48 }
 0x473   :  { %1360 = vmatprep.subr.mxu0 %v1387_v3 }
 0x474   :  { %1361 = vmatpush3.msra.mxu0 %v1625_v51 }
 0x475   :  { %1362 = vmatprep.subr.mxu0 %v1387_v3 }
 0x476   :  { %1363 = vmatpush3.msra.mxu0 %v1634_v52 }
 0x477   :  { %1364 = vmatprep.subr.mxu0 %v1387_v3 }
 0x478   :  { %1365 = vmatpush3.msra.mxu0 %v1647_v55 }
 0x519   :  { %v698_v16 = vpop.f32.mrf.mxu0 }
 0x51a   :  { %v702_v18 = vadd.f32 %v698_v16, %v1757_v21 }
 0x51b   :  { %v1298_v20 = vpop.f32.mrf.mxu0 }
 0x51c   :  { %1381 = vtanh.f32 %v702_v18 }
 0x529   :  { %v1382_v23 = vpop.eup %1381 }
 0x52a   :  { %895 = vst [vmem:[%s1968_s5 + $0x10] sm:$0xff] %v1382_v23  ;;  %1332 = vmatmul.mubr.f32.vlgmr.msra.gmra.mxu1 %v1382_v23 }
 0x5ea   :  { %v774_v26 = vpop.f32.mrf.mxu1 }
 0x5eb   :  { %v778_v29 = vadd.f32 %v774_v26, %v1755_v12 }
 0x5ec   :  { %v1333_v32 = vpop.f32.mrf.mxu1 }
 0x5ed   :  { %1383 = vtanh.f32 %v778_v29 }
 0x5fa   :  { %v1384_v35 = vpop.eup %1383 }
 0x5fb   :  { %896 = vst [vmem:[%s1968_s5 + $0x8] sm:$0xff] %v1384_v35  ;;  %1367 = vmatmul.mubr.f32.vlgmr.msra.gmra.mxu0 %v1384_v35 }
 0x6bb   :  { %v849_v3 = vpop.f32.mrf.mxu0 }
 0x6bc   :  { %v853_v38 = vadd.f32 %v849_v3, %v1753_v8 }
 0x6bd   :  { %v1368_v41 = vpop.f32.mrf.mxu0 }
 0x6be   :  { %1385 = vtanh.f32 %v853_v38 }
 0x6cb   :  { %v1386_v44 = vpop.eup %1385 }
 0x6cc   :  { %855 = vst [vmem:[%s1968_s5] sm:$0xff] %v1386_v44 }

</bundles_post_ra>
